<compile_context>
chip_gen: v7x
topology: tpu7x:2x2x1
jax: 0.10.0
libtpu: 0.0.40
codegen_flags: <defaults>
</compile_context>

<pallas_src>
import jax
import jax.numpy as jnp
from jax.experimental import pallas as pl
from jax.experimental.pallas import tpu as pltpu
import numpy as np

VMEM_SPEC = pl.BlockSpec(memory_space=pltpu.MemorySpace.VMEM)


# ----------------------------- fused Pallas kernel ---------------------------

def make_fused_lstm_kernel(num_layers, B, T, H, O):
    """Builds a kernel computing: num_layers-deep LSTM over T steps, then
    out = tanh(h_last @ W_fc^T + b_fc).   Gate column order is (i, f, o, g)."""

    def kernel(*refs):
        # refs: x_tm, (wih_t, whh_t, b) * num_layers, fc_w_t, fc_b, out_ref
        x_ref = refs[0]
        layer_refs = [(refs[1 + 3 * l], refs[2 + 3 * l], refs[3 + 3 * l])
                      for l in range(num_layers)]
        fc_w_ref = refs[1 + 3 * num_layers]
        fc_b_ref = refs[2 + 3 * num_layers]
        out_ref = refs[3 + 3 * num_layers]

        # time-major flat sequence: row order (t0,b0),(t0,b1),(t1,b0),...
        seq = x_ref[...].astype(jnp.float32)            # (T*B, D_in)
        h = None
        for layer_idx, (wih_ref, whh_ref, b_ref) in enumerate(layer_refs):
            wih_t = wih_ref[...].astype(jnp.float32)    # (D, 4H)  cols (i,f,o,g)
            whh_t = whh_ref[...].astype(jnp.float32)    # (H, 4H)
            b = b_ref[...].astype(jnp.float32)          # (1, 4H)

            # One MXU pass for the whole layer's input projection (+ bias).
            gates_x = jnp.dot(seq, wih_t,
                              preferred_element_type=jnp.float32) + b  # (T*B, 4H)

            h = jnp.zeros((B, H), jnp.float32)
            c = jnp.zeros((B, H), jnp.float32)
            h_list = []
            for t in range(T):                          # static unroll (T small)
                z = gates_x[t * B:(t + 1) * B, :] + jnp.dot(
                    h, whh_t, preferred_element_type=jnp.float32)      # (B, 4H)
                sig = jax.nn.sigmoid(z[:, :3 * H])      # i | f | o contiguous
                i_g = sig[:, 0 * H:1 * H]
                f_g = sig[:, 1 * H:2 * H]
                o_g = sig[:, 2 * H:3 * H]
                g_g = jnp.tanh(z[:, 3 * H:4 * H])
                c = f_g * c + i_g * g_g
                h = o_g * jnp.tanh(c)
                if layer_idx + 1 < num_layers:
                    h_list.append(h)
            if layer_idx + 1 < num_layers:
                seq = jnp.concatenate(h_list, axis=0)   # (T*B, H) next-layer input

        out = jnp.tanh(
            jnp.dot(h, fc_w_ref[...].astype(jnp.float32),
                    preferred_element_type=jnp.float32)
            + fc_b_ref[...].astype(jnp.float32))        # (B, O)
        out_ref[...] = out.astype(out_ref.dtype)

    return kernel


# ------------------------------ JAX wrapper ----------------------------------

def basic_lstm_net_forward(x, kern_params):
    """x: (B, input_size, seq) float32  ->  (B, output_size, 1) float32."""
    B, D_in, T = x.shape
    H = kern_params["lstm"][0][1].shape[0]
    O = kern_params["fc"][0].shape[1]
    num_layers = len(kern_params["lstm"])

    # time-major flat input: (T*B, D_in) — plain JAX, done once per call.
    x_tm = jnp.transpose(x, (2, 0, 1)).reshape(T * B, D_in)

    flat_args = [x_tm]
    for (wih_t, whh_t, b) in kern_params["lstm"]:
        flat_args += [wih_t, whh_t, b]
    flat_args += [kern_params["fc"][0], kern_params["fc"][1]]

    out = pl.pallas_call(
        make_fused_lstm_kernel(num_layers, B, T, H, O),
        out_shape=jax.ShapeDtypeStruct((B, O), jnp.float32),
        in_specs=[VMEM_SPEC] * len(flat_args),
        out_specs=VMEM_SPEC,
    )(*flat_args)
    return out[:, :, None]                              # unsqueeze(-1)


# --------------------------------- params ------------------------------------

def init_params(key, input_size, hidden_size, num_layers, output_size):
    """PyTorch-style init U(-1/sqrt(H), 1/sqrt(H)).

    Returns (torch_params, kern_params):
      torch_params : weights in PyTorch layout / gate order (i, f, g, o) — used
                     by the pure-JAX reference.
      kern_params  : transposed, bias-combined weights with gate columns
                     permuted to (i, f, o, g) — used by the Pallas kernel.
    """
    H = hidden_size
    k = 1.0 / np.sqrt(H)
    # PyTorch gate order (i, f, g, o) -> kernel order (i, f, o, g)
    perm = np.concatenate([np.arange(0, H), np.arange(H, 2 * H),
                           np.arange(3 * H, 4 * H), np.arange(2 * H, 3 * H)])
    torch_params = {"lstm": [], "fc": None}
    kern_params = {"lstm": [], "fc": None}
    for layer in range(num_layers):
        d_in = input_size if layer == 0 else H
        key, k1, k2, k3, k4 = jax.random.split(key, 5)
        w_ih = jax.random.uniform(k1, (4 * H, d_in), jnp.float32, -k, k)
        w_hh = jax.random.uniform(k2, (4 * H, H), jnp.float32, -k, k)
        b_ih = jax.random.uniform(k3, (4 * H,), jnp.float32, -k, k)
        b_hh = jax.random.uniform(k4, (4 * H,), jnp.float32, -k, k)
        torch_params["lstm"].append((w_ih, w_hh, b_ih, b_hh))
        kern_params["lstm"].append((
            w_ih.T[:, perm],                               # (d_in, 4H)
            w_hh.T[:, perm],                               # (H, 4H)
            (b_ih + b_hh)[perm].reshape(1, 4 * H),         # (1, 4H)
        ))
    key, k5, k6 = jax.random.split(key, 3)
    w_fc = jax.random.uniform(k5, (output_size, H), jnp.float32, -k, k)
    b_fc = jax.random.uniform(k6, (output_size,), jnp.float32, -k, k)
    torch_params["fc"] = (w_fc, b_fc)
    kern_params["fc"] = (w_fc.T, b_fc.reshape(1, output_size))
    return torch_params, kern_params


# --------------------------- pure-JAX reference -------------------------------

def reference_forward(x, torch_params):
    """Mirrors the PyTorch module exactly (gate order i, f, g, o)."""
    h_seq = jnp.transpose(x, (0, 2, 1))                  # (B, T, D)
    for (w_ih, w_hh, b_ih, b_hh) in torch_params["lstm"]:
        B, T, _ = h_seq.shape
        H = w_hh.shape[1]
        h = jnp.zeros((B, H), jnp.float32)
        c = jnp.zeros((B, H), jnp.float32)
        ys = []
        for t in range(T):
            gates = h_seq[:, t, :] @ w_ih.T + h @ w_hh.T + b_ih + b_hh
            i_g = jax.nn.sigmoid(gates[:, 0 * H:1 * H])
            f_g = jax.nn.sigmoid(gates[:, 1 * H:2 * H])
            g_g = jnp.tanh(gates[:, 2 * H:3 * H])
            o_g = jax.nn.sigmoid(gates[:, 3 * H:4 * H])
            c = f_g * c + i_g * g_g
            h = o_g * jnp.tanh(c)
            ys.append(h)
        h_seq = jnp.stack(ys, axis=1)
    w_fc, b_fc = torch_params["fc"]
    out = jnp.tanh(h_seq[:, -1, :] @ w_fc.T + b_fc)
    return out[:, :, None]


# ---------------------------------- main --------------------------------------

if __name__ == "__main__":
    # Module defaults: input_size=9, hidden_size=64, num_layers=4, output_size=5
    batch = 2
    input_size = 9
    seq_len = 8
    hidden_size = 64
    num_layers = 4
    output_size = 5

    key = jax.random.PRNGKey(0)
    key, kx, kp = jax.random.split(key, 3)
    x = jax.random.normal(kx, (batch, input_size, seq_len), dtype=jnp.float32)
    torch_params, kern_params = init_params(kp, input_size, hidden_size,
                                            num_layers, output_size)

    fwd = jax.jit(basic_lstm_net_forward)
    out = jax.block_until_ready(fwd(x, kern_params))

    ref = reference_forward(x, torch_params)
    assert out.shape == (batch, output_size, 1), out.shape
    np.testing.assert_allclose(np.asarray(out), np.asarray(ref),
                               rtol=2e-4, atol=2e-5)

    print("KERNEL_OK")
</pallas_src>

<mosaic_0001>
module attributes {stable_mosaic.version = 11 : i64} {
  func.func @kernel(%arg0: memref<16x9xf32, #tpu.memory_space<vmem>>, %arg1: memref<9x256xf32, #tpu.memory_space<vmem>>, %arg2: memref<64x256xf32, #tpu.memory_space<vmem>>, %arg3: memref<1x256xf32, #tpu.memory_space<vmem>>, %arg4: memref<64x256xf32, #tpu.memory_space<vmem>>, %arg5: memref<64x256xf32, #tpu.memory_space<vmem>>, %arg6: memref<1x256xf32, #tpu.memory_space<vmem>>, %arg7: memref<64x256xf32, #tpu.memory_space<vmem>>, %arg8: memref<64x256xf32, #tpu.memory_space<vmem>>, %arg9: memref<1x256xf32, #tpu.memory_space<vmem>>, %arg10: memref<64x256xf32, #tpu.memory_space<vmem>>, %arg11: memref<64x256xf32, #tpu.memory_space<vmem>>, %arg12: memref<1x256xf32, #tpu.memory_space<vmem>>, %arg13: memref<64x5xf32, #tpu.memory_space<vmem>>, %arg14: memref<1x5xf32, #tpu.memory_space<vmem>>, %arg15: memref<2x5xf32, #tpu.memory_space<vmem>>) attributes {dimension_semantics = [], scalar_prefetch = 0 : i64, scratch_operands = 0 : i64, tpu.core_type = #tpu.core_type<tc>} {
    %c0 = arith.constant 0 : index
    %c0_0 = arith.constant 0 : index
    %0 = vector.load %arg0[%c0, %c0_0] : memref<16x9xf32, #tpu.memory_space<vmem>>, vector<16x9xf32>
    %c0_1 = arith.constant 0 : index
    %c0_2 = arith.constant 0 : index
    %1 = vector.load %arg1[%c0_1, %c0_2] : memref<9x256xf32, #tpu.memory_space<vmem>>, vector<9x256xf32>
    %c0_3 = arith.constant 0 : index
    %c0_4 = arith.constant 0 : index
    %2 = vector.load %arg2[%c0_3, %c0_4] : memref<64x256xf32, #tpu.memory_space<vmem>>, vector<64x256xf32>
    %c0_5 = arith.constant 0 : index
    %c0_6 = arith.constant 0 : index
    %3 = vector.load %arg3[%c0_5, %c0_6] : memref<1x256xf32, #tpu.memory_space<vmem>>, vector<1x256xf32>
    %cst = arith.constant dense<0.000000e+00> : vector<16x256xf32>
    %4 = tpu.matmul %0, %1, %cst {dimension_numbers = #tpu.dot_dimension_numbers<[1], [0], [0], [1], [0, 0, 1, 1], [], []>} : vector<16x9xf32>, vector<9x256xf32>, vector<16x256xf32> -> vector<16x256xf32>
    %5 = vector.broadcast %3 : vector<1x256xf32> to vector<16x256xf32>
    %6 = arith.addf %4, %5 : vector<16x256xf32>
    %cst_7 = arith.constant 0.000000e+00 : f32
    %7 = vector.broadcast %cst_7 : f32 to vector<2x64xf32>
    %cst_8 = arith.constant 0.000000e+00 : f32
    %8 = vector.broadcast %cst_8 : f32 to vector<2x64xf32>
    %9 = vector.extract_strided_slice %6 {offsets = [0, 0], sizes = [2, 256], strides = [1, 1]} : vector<16x256xf32> to vector<2x256xf32>
    %cst_9 = arith.constant dense<0.000000e+00> : vector<2x256xf32>
    %10 = tpu.matmul %7, %2, %cst_9 {dimension_numbers = #tpu.dot_dimension_numbers<[1], [0], [0], [1], [0, 0, 1, 1], [], []>} : vector<2x64xf32>, vector<64x256xf32>, vector<2x256xf32> -> vector<2x256xf32>
    %11 = arith.addf %9, %10 : vector<2x256xf32>
    %12 = vector.extract_strided_slice %11 {offsets = [0, 0], sizes = [2, 192], strides = [1, 1]} : vector<2x256xf32> to vector<2x192xf32>
    %13 = arith.negf %12 : vector<2x192xf32>
    %14 = math.exp %13 : vector<2x192xf32>
    %cst_10 = arith.constant 1.000000e+00 : f32
    %15 = vector.broadcast %cst_10 : f32 to vector<2x192xf32>
    %16 = arith.addf %15, %14 : vector<2x192xf32>
    %17 = arith.divf %15, %16 : vector<2x192xf32>
    %18 = vector.extract_strided_slice %17 {offsets = [0, 0], sizes = [2, 64], strides = [1, 1]} : vector<2x192xf32> to vector<2x64xf32>
    %19 = vector.extract_strided_slice %17 {offsets = [0, 64], sizes = [2, 64], strides = [1, 1]} : vector<2x192xf32> to vector<2x64xf32>
    %20 = vector.extract_strided_slice %17 {offsets = [0, 128], sizes = [2, 64], strides = [1, 1]} : vector<2x192xf32> to vector<2x64xf32>
    %21 = vector.extract_strided_slice %11 {offsets = [0, 192], sizes = [2, 64], strides = [1, 1]} : vector<2x256xf32> to vector<2x64xf32>
    %22 = math.tanh %21 : vector<2x64xf32>
    %23 = arith.mulf %19, %8 : vector<2x64xf32>
    %24 = arith.mulf %18, %22 : vector<2x64xf32>
    %25 = arith.addf %23, %24 : vector<2x64xf32>
    %26 = math.tanh %25 : vector<2x64xf32>
    %27 = arith.mulf %20, %26 : vector<2x64xf32>
    %28 = vector.extract_strided_slice %6 {offsets = [2, 0], sizes = [2, 256], strides = [1, 1]} : vector<16x256xf32> to vector<2x256xf32>
    %cst_11 = arith.constant dense<0.000000e+00> : vector<2x256xf32>
    %29 = tpu.matmul %27, %2, %cst_11 {dimension_numbers = #tpu.dot_dimension_numbers<[1], [0], [0], [1], [0, 0, 1, 1], [], []>} : vector<2x64xf32>, vector<64x256xf32>, vector<2x256xf32> -> vector<2x256xf32>
    %30 = arith.addf %28, %29 : vector<2x256xf32>
    %31 = vector.extract_strided_slice %30 {offsets = [0, 0], sizes = [2, 192], strides = [1, 1]} : vector<2x256xf32> to vector<2x192xf32>
    %32 = arith.negf %31 : vector<2x192xf32>
    %33 = math.exp %32 : vector<2x192xf32>
    %cst_12 = arith.constant 1.000000e+00 : f32
    %34 = vector.broadcast %cst_12 : f32 to vector<2x192xf32>
    %35 = arith.addf %34, %33 : vector<2x192xf32>
    %36 = arith.divf %34, %35 : vector<2x192xf32>
    %37 = vector.extract_strided_slice %36 {offsets = [0, 0], sizes = [2, 64], strides = [1, 1]} : vector<2x192xf32> to vector<2x64xf32>
    %38 = vector.extract_strided_slice %36 {offsets = [0, 64], sizes = [2, 64], strides = [1, 1]} : vector<2x192xf32> to vector<2x64xf32>
    %39 = vector.extract_strided_slice %36 {offsets = [0, 128], sizes = [2, 64], strides = [1, 1]} : vector<2x192xf32> to vector<2x64xf32>
    %40 = vector.extract_strided_slice %30 {offsets = [0, 192], sizes = [2, 64], strides = [1, 1]} : vector<2x256xf32> to vector<2x64xf32>
    %41 = math.tanh %40 : vector<2x64xf32>
    %42 = arith.mulf %38, %25 : vector<2x64xf32>
    %43 = arith.mulf %37, %41 : vector<2x64xf32>
    %44 = arith.addf %42, %43 : vector<2x64xf32>
    %45 = math.tanh %44 : vector<2x64xf32>
    %46 = arith.mulf %39, %45 : vector<2x64xf32>
    %47 = vector.extract_strided_slice %6 {offsets = [4, 0], sizes = [2, 256], strides = [1, 1]} : vector<16x256xf32> to vector<2x256xf32>
    %cst_13 = arith.constant dense<0.000000e+00> : vector<2x256xf32>
    %48 = tpu.matmul %46, %2, %cst_13 {dimension_numbers = #tpu.dot_dimension_numbers<[1], [0], [0], [1], [0, 0, 1, 1], [], []>} : vector<2x64xf32>, vector<64x256xf32>, vector<2x256xf32> -> vector<2x256xf32>
    %49 = arith.addf %47, %48 : vector<2x256xf32>
    %50 = vector.extract_strided_slice %49 {offsets = [0, 0], sizes = [2, 192], strides = [1, 1]} : vector<2x256xf32> to vector<2x192xf32>
    %51 = arith.negf %50 : vector<2x192xf32>
    %52 = math.exp %51 : vector<2x192xf32>
    %cst_14 = arith.constant 1.000000e+00 : f32
    %53 = vector.broadcast %cst_14 : f32 to vector<2x192xf32>
    %54 = arith.addf %53, %52 : vector<2x192xf32>
    %55 = arith.divf %53, %54 : vector<2x192xf32>
    %56 = vector.extract_strided_slice %55 {offsets = [0, 0], sizes = [2, 64], strides = [1, 1]} : vector<2x192xf32> to vector<2x64xf32>
    %57 = vector.extract_strided_slice %55 {offsets = [0, 64], sizes = [2, 64], strides = [1, 1]} : vector<2x192xf32> to vector<2x64xf32>
    %58 = vector.extract_strided_slice %55 {offsets = [0, 128], sizes = [2, 64], strides = [1, 1]} : vector<2x192xf32> to vector<2x64xf32>
    %59 = vector.extract_strided_slice %49 {offsets = [0, 192], sizes = [2, 64], strides = [1, 1]} : vector<2x256xf32> to vector<2x64xf32>
    %60 = math.tanh %59 : vector<2x64xf32>
    %61 = arith.mulf %57, %44 : vector<2x64xf32>
    %62 = arith.mulf %56, %60 : vector<2x64xf32>
    %63 = arith.addf %61, %62 : vector<2x64xf32>
    %64 = math.tanh %63 : vector<2x64xf32>
    %65 = arith.mulf %58, %64 : vector<2x64xf32>
    %66 = vector.extract_strided_slice %6 {offsets = [6, 0], sizes = [2, 256], strides = [1, 1]} : vector<16x256xf32> to vector<2x256xf32>
    %cst_15 = arith.constant dense<0.000000e+00> : vector<2x256xf32>
    %67 = tpu.matmul %65, %2, %cst_15 {dimension_numbers = #tpu.dot_dimension_numbers<[1], [0], [0], [1], [0, 0, 1, 1], [], []>} : vector<2x64xf32>, vector<64x256xf32>, vector<2x256xf32> -> vector<2x256xf32>
    %68 = arith.addf %66, %67 : vector<2x256xf32>
    %69 = vector.extract_strided_slice %68 {offsets = [0, 0], sizes = [2, 192], strides = [1, 1]} : vector<2x256xf32> to vector<2x192xf32>
    %70 = arith.negf %69 : vector<2x192xf32>
    %71 = math.exp %70 : vector<2x192xf32>
    %cst_16 = arith.constant 1.000000e+00 : f32
    %72 = vector.broadcast %cst_16 : f32 to vector<2x192xf32>
    %73 = arith.addf %72, %71 : vector<2x192xf32>
    %74 = arith.divf %72, %73 : vector<2x192xf32>
    %75 = vector.extract_strided_slice %74 {offsets = [0, 0], sizes = [2, 64], strides = [1, 1]} : vector<2x192xf32> to vector<2x64xf32>
    %76 = vector.extract_strided_slice %74 {offsets = [0, 64], sizes = [2, 64], strides = [1, 1]} : vector<2x192xf32> to vector<2x64xf32>
    %77 = vector.extract_strided_slice %74 {offsets = [0, 128], sizes = [2, 64], strides = [1, 1]} : vector<2x192xf32> to vector<2x64xf32>
    %78 = vector.extract_strided_slice %68 {offsets = [0, 192], sizes = [2, 64], strides = [1, 1]} : vector<2x256xf32> to vector<2x64xf32>
    %79 = math.tanh %78 : vector<2x64xf32>
    %80 = arith.mulf %76, %63 : vector<2x64xf32>
    %81 = arith.mulf %75, %79 : vector<2x64xf32>
    %82 = arith.addf %80, %81 : vector<2x64xf32>
    %83 = math.tanh %82 : vector<2x64xf32>
    %84 = arith.mulf %77, %83 : vector<2x64xf32>
    %85 = vector.extract_strided_slice %6 {offsets = [8, 0], sizes = [2, 256], strides = [1, 1]} : vector<16x256xf32> to vector<2x256xf32>
    %cst_17 = arith.constant dense<0.000000e+00> : vector<2x256xf32>
    %86 = tpu.matmul %84, %2, %cst_17 {dimension_numbers = #tpu.dot_dimension_numbers<[1], [0], [0], [1], [0, 0, 1, 1], [], []>} : vector<2x64xf32>, vector<64x256xf32>, vector<2x256xf32> -> vector<2x256xf32>
    %87 = arith.addf %85, %86 : vector<2x256xf32>
    %88 = vector.extract_strided_slice %87 {offsets = [0, 0], sizes = [2, 192], strides = [1, 1]} : vector<2x256xf32> to vector<2x192xf32>
    %89 = arith.negf %88 : vector<2x192xf32>
    %90 = math.exp %89 : vector<2x192xf32>
    %cst_18 = arith.constant 1.000000e+00 : f32
    %91 = vector.broadcast %cst_18 : f32 to vector<2x192xf32>
    %92 = arith.addf %91, %90 : vector<2x192xf32>
    %93 = arith.divf %91, %92 : vector<2x192xf32>
    %94 = vector.extract_strided_slice %93 {offsets = [0, 0], sizes = [2, 64], strides = [1, 1]} : vector<2x192xf32> to vector<2x64xf32>
    %95 = vector.extract_strided_slice %93 {offsets = [0, 64], sizes = [2, 64], strides = [1, 1]} : vector<2x192xf32> to vector<2x64xf32>
    %96 = vector.extract_strided_slice %93 {offsets = [0, 128], sizes = [2, 64], strides = [1, 1]} : vector<2x192xf32> to vector<2x64xf32>
    %97 = vector.extract_strided_slice %87 {offsets = [0, 192], sizes = [2, 64], strides = [1, 1]} : vector<2x256xf32> to vector<2x64xf32>
    %98 = math.tanh %97 : vector<2x64xf32>
    %99 = arith.mulf %95, %82 : vector<2x64xf32>
    %100 = arith.mulf %94, %98 : vector<2x64xf32>
    %101 = arith.addf %99, %100 : vector<2x64xf32>
    %102 = math.tanh %101 : vector<2x64xf32>
    %103 = arith.mulf %96, %102 : vector<2x64xf32>
    %104 = vector.extract_strided_slice %6 {offsets = [10, 0], sizes = [2, 256], strides = [1, 1]} : vector<16x256xf32> to vector<2x256xf32>
    %cst_19 = arith.constant dense<0.000000e+00> : vector<2x256xf32>
    %105 = tpu.matmul %103, %2, %cst_19 {dimension_numbers = #tpu.dot_dimension_numbers<[1], [0], [0], [1], [0, 0, 1, 1], [], []>} : vector<2x64xf32>, vector<64x256xf32>, vector<2x256xf32> -> vector<2x256xf32>
    %106 = arith.addf %104, %105 : vector<2x256xf32>
    %107 = vector.extract_strided_slice %106 {offsets = [0, 0], sizes = [2, 192], strides = [1, 1]} : vector<2x256xf32> to vector<2x192xf32>
    %108 = arith.negf %107 : vector<2x192xf32>
    %109 = math.exp %108 : vector<2x192xf32>
    %cst_20 = arith.constant 1.000000e+00 : f32
    %110 = vector.broadcast %cst_20 : f32 to vector<2x192xf32>
    %111 = arith.addf %110, %109 : vector<2x192xf32>
    %112 = arith.divf %110, %111 : vector<2x192xf32>
    %113 = vector.extract_strided_slice %112 {offsets = [0, 0], sizes = [2, 64], strides = [1, 1]} : vector<2x192xf32> to vector<2x64xf32>
    %114 = vector.extract_strided_slice %112 {offsets = [0, 64], sizes = [2, 64], strides = [1, 1]} : vector<2x192xf32> to vector<2x64xf32>
    %115 = vector.extract_strided_slice %112 {offsets = [0, 128], sizes = [2, 64], strides = [1, 1]} : vector<2x192xf32> to vector<2x64xf32>
    %116 = vector.extract_strided_slice %106 {offsets = [0, 192], sizes = [2, 64], strides = [1, 1]} : vector<2x256xf32> to vector<2x64xf32>
    %117 = math.tanh %116 : vector<2x64xf32>
    %118 = arith.mulf %114, %101 : vector<2x64xf32>
    %119 = arith.mulf %113, %117 : vector<2x64xf32>
    %120 = arith.addf %118, %119 : vector<2x64xf32>
    %121 = math.tanh %120 : vector<2x64xf32>
    %122 = arith.mulf %115, %121 : vector<2x64xf32>
    %123 = vector.extract_strided_slice %6 {offsets = [12, 0], sizes = [2, 256], strides = [1, 1]} : vector<16x256xf32> to vector<2x256xf32>
    %cst_21 = arith.constant dense<0.000000e+00> : vector<2x256xf32>
    %124 = tpu.matmul %122, %2, %cst_21 {dimension_numbers = #tpu.dot_dimension_numbers<[1], [0], [0], [1], [0, 0, 1, 1], [], []>} : vector<2x64xf32>, vector<64x256xf32>, vector<2x256xf32> -> vector<2x256xf32>
    %125 = arith.addf %123, %124 : vector<2x256xf32>
    %126 = vector.extract_strided_slice %125 {offsets = [0, 0], sizes = [2, 192], strides = [1, 1]} : vector<2x256xf32> to vector<2x192xf32>
    %127 = arith.negf %126 : vector<2x192xf32>
    %128 = math.exp %127 : vector<2x192xf32>
    %cst_22 = arith.constant 1.000000e+00 : f32
    %129 = vector.broadcast %cst_22 : f32 to vector<2x192xf32>
    %130 = arith.addf %129, %128 : vector<2x192xf32>
    %131 = arith.divf %129, %130 : vector<2x192xf32>
    %132 = vector.extract_strided_slice %131 {offsets = [0, 0], sizes = [2, 64], strides = [1, 1]} : vector<2x192xf32> to vector<2x64xf32>
    %133 = vector.extract_strided_slice %131 {offsets = [0, 64], sizes = [2, 64], strides = [1, 1]} : vector<2x192xf32> to vector<2x64xf32>
    %134 = vector.extract_strided_slice %131 {offsets = [0, 128], sizes = [2, 64], strides = [1, 1]} : vector<2x192xf32> to vector<2x64xf32>
    %135 = vector.extract_strided_slice %125 {offsets = [0, 192], sizes = [2, 64], strides = [1, 1]} : vector<2x256xf32> to vector<2x64xf32>
    %136 = math.tanh %135 : vector<2x64xf32>
    %137 = arith.mulf %133, %120 : vector<2x64xf32>
    %138 = arith.mulf %132, %136 : vector<2x64xf32>
    %139 = arith.addf %137, %138 : vector<2x64xf32>
    %140 = math.tanh %139 : vector<2x64xf32>
    %141 = arith.mulf %134, %140 : vector<2x64xf32>
    %142 = vector.extract_strided_slice %6 {offsets = [14, 0], sizes = [2, 256], strides = [1, 1]} : vector<16x256xf32> to vector<2x256xf32>
    %cst_23 = arith.constant dense<0.000000e+00> : vector<2x256xf32>
    %143 = tpu.matmul %141, %2, %cst_23 {dimension_numbers = #tpu.dot_dimension_numbers<[1], [0], [0], [1], [0, 0, 1, 1], [], []>} : vector<2x64xf32>, vector<64x256xf32>, vector<2x256xf32> -> vector<2x256xf32>
    %144 = arith.addf %142, %143 : vector<2x256xf32>
    %145 = vector.extract_strided_slice %144 {offsets = [0, 0], sizes = [2, 192], strides = [1, 1]} : vector<2x256xf32> to vector<2x192xf32>
    %146 = arith.negf %145 : vector<2x192xf32>
    %147 = math.exp %146 : vector<2x192xf32>
    %cst_24 = arith.constant 1.000000e+00 : f32
    %148 = vector.broadcast %cst_24 : f32 to vector<2x192xf32>
    %149 = arith.addf %148, %147 : vector<2x192xf32>
    %150 = arith.divf %148, %149 : vector<2x192xf32>
    %151 = vector.extract_strided_slice %150 {offsets = [0, 0], sizes = [2, 64], strides = [1, 1]} : vector<2x192xf32> to vector<2x64xf32>
    %152 = vector.extract_strided_slice %150 {offsets = [0, 64], sizes = [2, 64], strides = [1, 1]} : vector<2x192xf32> to vector<2x64xf32>
    %153 = vector.extract_strided_slice %150 {offsets = [0, 128], sizes = [2, 64], strides = [1, 1]} : vector<2x192xf32> to vector<2x64xf32>
    %154 = vector.extract_strided_slice %144 {offsets = [0, 192], sizes = [2, 64], strides = [1, 1]} : vector<2x256xf32> to vector<2x64xf32>
    %155 = math.tanh %154 : vector<2x64xf32>
    %156 = arith.mulf %152, %139 : vector<2x64xf32>
    %157 = arith.mulf %151, %155 : vector<2x64xf32>
    %158 = arith.addf %156, %157 : vector<2x64xf32>
    %159 = math.tanh %158 : vector<2x64xf32>
    %160 = arith.mulf %153, %159 : vector<2x64xf32>
    %161 = tpu.concatenate %27, %46, %65, %84, %103, %122, %141, %160 in 0 : vector<2x64xf32>, vector<2x64xf32>, vector<2x64xf32>, vector<2x64xf32>, vector<2x64xf32>, vector<2x64xf32>, vector<2x64xf32>, vector<2x64xf32> -> vector<16x64xf32>
    %c0_25 = arith.constant 0 : index
    %c0_26 = arith.constant 0 : index
    %162 = vector.load %arg4[%c0_25, %c0_26] : memref<64x256xf32, #tpu.memory_space<vmem>>, vector<64x256xf32>
    %c0_27 = arith.constant 0 : index
    %c0_28 = arith.constant 0 : index
    %163 = vector.load %arg5[%c0_27, %c0_28] : memref<64x256xf32, #tpu.memory_space<vmem>>, vector<64x256xf32>
    %c0_29 = arith.constant 0 : index
    %c0_30 = arith.constant 0 : index
    %164 = vector.load %arg6[%c0_29, %c0_30] : memref<1x256xf32, #tpu.memory_space<vmem>>, vector<1x256xf32>
    %cst_31 = arith.constant dense<0.000000e+00> : vector<16x256xf32>
    %165 = tpu.matmul %161, %162, %cst_31 {dimension_numbers = #tpu.dot_dimension_numbers<[1], [0], [0], [1], [0, 0, 1, 1], [], []>} : vector<16x64xf32>, vector<64x256xf32>, vector<16x256xf32> -> vector<16x256xf32>
    %166 = vector.broadcast %164 : vector<1x256xf32> to vector<16x256xf32>
    %167 = arith.addf %165, %166 : vector<16x256xf32>
    %cst_32 = arith.constant 0.000000e+00 : f32
    %168 = vector.broadcast %cst_32 : f32 to vector<2x64xf32>
    %cst_33 = arith.constant 0.000000e+00 : f32
    %169 = vector.broadcast %cst_33 : f32 to vector<2x64xf32>
    %170 = vector.extract_strided_slice %167 {offsets = [0, 0], sizes = [2, 256], strides = [1, 1]} : vector<16x256xf32> to vector<2x256xf32>
    %cst_34 = arith.constant dense<0.000000e+00> : vector<2x256xf32>
    %171 = tpu.matmul %168, %163, %cst_34 {dimension_numbers = #tpu.dot_dimension_numbers<[1], [0], [0], [1], [0, 0, 1, 1], [], []>} : vector<2x64xf32>, vector<64x256xf32>, vector<2x256xf32> -> vector<2x256xf32>
    %172 = arith.addf %170, %171 : vector<2x256xf32>
    %173 = vector.extract_strided_slice %172 {offsets = [0, 0], sizes = [2, 192], strides = [1, 1]} : vector<2x256xf32> to vector<2x192xf32>
    %174 = arith.negf %173 : vector<2x192xf32>
    %175 = math.exp %174 : vector<2x192xf32>
    %cst_35 = arith.constant 1.000000e+00 : f32
    %176 = vector.broadcast %cst_35 : f32 to vector<2x192xf32>
    %177 = arith.addf %176, %175 : vector<2x192xf32>
    %178 = arith.divf %176, %177 : vector<2x192xf32>
    %179 = vector.extract_strided_slice %178 {offsets = [0, 0], sizes = [2, 64], strides = [1, 1]} : vector<2x192xf32> to vector<2x64xf32>
    %180 = vector.extract_strided_slice %178 {offsets = [0, 64], sizes = [2, 64], strides = [1, 1]} : vector<2x192xf32> to vector<2x64xf32>
    %181 = vector.extract_strided_slice %178 {offsets = [0, 128], sizes = [2, 64], strides = [1, 1]} : vector<2x192xf32> to vector<2x64xf32>
    %182 = vector.extract_strided_slice %172 {offsets = [0, 192], sizes = [2, 64], strides = [1, 1]} : vector<2x256xf32> to vector<2x64xf32>
    %183 = math.tanh %182 : vector<2x64xf32>
    %184 = arith.mulf %180, %169 : vector<2x64xf32>
    %185 = arith.mulf %179, %183 : vector<2x64xf32>
    %186 = arith.addf %184, %185 : vector<2x64xf32>
    %187 = math.tanh %186 : vector<2x64xf32>
    %188 = arith.mulf %181, %187 : vector<2x64xf32>
    %189 = vector.extract_strided_slice %167 {offsets = [2, 0], sizes = [2, 256], strides = [1, 1]} : vector<16x256xf32> to vector<2x256xf32>
    %cst_36 = arith.constant dense<0.000000e+00> : vector<2x256xf32>
    %190 = tpu.matmul %188, %163, %cst_36 {dimension_numbers = #tpu.dot_dimension_numbers<[1], [0], [0], [1], [0, 0, 1, 1], [], []>} : vector<2x64xf32>, vector<64x256xf32>, vector<2x256xf32> -> vector<2x256xf32>
    %191 = arith.addf %189, %190 : vector<2x256xf32>
    %192 = vector.extract_strided_slice %191 {offsets = [0, 0], sizes = [2, 192], strides = [1, 1]} : vector<2x256xf32> to vector<2x192xf32>
    %193 = arith.negf %192 : vector<2x192xf32>
    %194 = math.exp %193 : vector<2x192xf32>
    %cst_37 = arith.constant 1.000000e+00 : f32
    %195 = vector.broadcast %cst_37 : f32 to vector<2x192xf32>
    %196 = arith.addf %195, %194 : vector<2x192xf32>
    %197 = arith.divf %195, %196 : vector<2x192xf32>
    %198 = vector.extract_strided_slice %197 {offsets = [0, 0], sizes = [2, 64], strides = [1, 1]} : vector<2x192xf32> to vector<2x64xf32>
    %199 = vector.extract_strided_slice %197 {offsets = [0, 64], sizes = [2, 64], strides = [1, 1]} : vector<2x192xf32> to vector<2x64xf32>
    %200 = vector.extract_strided_slice %197 {offsets = [0, 128], sizes = [2, 64], strides = [1, 1]} : vector<2x192xf32> to vector<2x64xf32>
    %201 = vector.extract_strided_slice %191 {offsets = [0, 192], sizes = [2, 64], strides = [1, 1]} : vector<2x256xf32> to vector<2x64xf32>
    %202 = math.tanh %201 : vector<2x64xf32>
    %203 = arith.mulf %199, %186 : vector<2x64xf32>
    %204 = arith.mulf %198, %202 : vector<2x64xf32>
    %205 = arith.addf %203, %204 : vector<2x64xf32>
    %206 = math.tanh %205 : vector<2x64xf32>
    %207 = arith.mulf %200, %206 : vector<2x64xf32>
    %208 = vector.extract_strided_slice %167 {offsets = [4, 0], sizes = [2, 256], strides = [1, 1]} : vector<16x256xf32> to vector<2x256xf32>
    %cst_38 = arith.constant dense<0.000000e+00> : vector<2x256xf32>
    %209 = tpu.matmul %207, %163, %cst_38 {dimension_numbers = #tpu.dot_dimension_numbers<[1], [0], [0], [1], [0, 0, 1, 1], [], []>} : vector<2x64xf32>, vector<64x256xf32>, vector<2x256xf32> -> vector<2x256xf32>
    %210 = arith.addf %208, %209 : vector<2x256xf32>
    %211 = vector.extract_strided_slice %210 {offsets = [0, 0], sizes = [2, 192], strides = [1, 1]} : vector<2x256xf32> to vector<2x192xf32>
    %212 = arith.negf %211 : vector<2x192xf32>
    %213 = math.exp %212 : vector<2x192xf32>
    %cst_39 = arith.constant 1.000000e+00 : f32
    %214 = vector.broadcast %cst_39 : f32 to vector<2x192xf32>
    %215 = arith.addf %214, %213 : vector<2x192xf32>
    %216 = arith.divf %214, %215 : vector<2x192xf32>
    %217 = vector.extract_strided_slice %216 {offsets = [0, 0], sizes = [2, 64], strides = [1, 1]} : vector<2x192xf32> to vector<2x64xf32>
    %218 = vector.extract_strided_slice %216 {offsets = [0, 64], sizes = [2, 64], strides = [1, 1]} : vector<2x192xf32> to vector<2x64xf32>
    %219 = vector.extract_strided_slice %216 {offsets = [0, 128], sizes = [2, 64], strides = [1, 1]} : vector<2x192xf32> to vector<2x64xf32>
    %220 = vector.extract_strided_slice %210 {offsets = [0, 192], sizes = [2, 64], strides = [1, 1]} : vector<2x256xf32> to vector<2x64xf32>
    %221 = math.tanh %220 : vector<2x64xf32>
    %222 = arith.mulf %218, %205 : vector<2x64xf32>
    %223 = arith.mulf %217, %221 : vector<2x64xf32>
    %224 = arith.addf %222, %223 : vector<2x64xf32>
    %225 = math.tanh %224 : vector<2x64xf32>
    %226 = arith.mulf %219, %225 : vector<2x64xf32>
    %227 = vector.extract_strided_slice %167 {offsets = [6, 0], sizes = [2, 256], strides = [1, 1]} : vector<16x256xf32> to vector<2x256xf32>
    %cst_40 = arith.constant dense<0.000000e+00> : vector<2x256xf32>
    %228 = tpu.matmul %226, %163, %cst_40 {dimension_numbers = #tpu.dot_dimension_numbers<[1], [0], [0], [1], [0, 0, 1, 1], [], []>} : vector<2x64xf32>, vector<64x256xf32>, vector<2x256xf32> -> vector<2x256xf32>
    %229 = arith.addf %227, %228 : vector<2x256xf32>
    %230 = vector.extract_strided_slice %229 {offsets = [0, 0], sizes = [2, 192], strides = [1, 1]} : vector<2x256xf32> to vector<2x192xf32>
    %231 = arith.negf %230 : vector<2x192xf32>
    %232 = math.exp %231 : vector<2x192xf32>
    %cst_41 = arith.constant 1.000000e+00 : f32
    %233 = vector.broadcast %cst_41 : f32 to vector<2x192xf32>
    %234 = arith.addf %233, %232 : vector<2x192xf32>
    %235 = arith.divf %233, %234 : vector<2x192xf32>
    %236 = vector.extract_strided_slice %235 {offsets = [0, 0], sizes = [2, 64], strides = [1, 1]} : vector<2x192xf32> to vector<2x64xf32>
    %237 = vector.extract_strided_slice %235 {offsets = [0, 64], sizes = [2, 64], strides = [1, 1]} : vector<2x192xf32> to vector<2x64xf32>
    %238 = vector.extract_strided_slice %235 {offsets = [0, 128], sizes = [2, 64], strides = [1, 1]} : vector<2x192xf32> to vector<2x64xf32>
    %239 = vector.extract_strided_slice %229 {offsets = [0, 192], sizes = [2, 64], strides = [1, 1]} : vector<2x256xf32> to vector<2x64xf32>
    %240 = math.tanh %239 : vector<2x64xf32>
    %241 = arith.mulf %237, %224 : vector<2x64xf32>
    %242 = arith.mulf %236, %240 : vector<2x64xf32>
    %243 = arith.addf %241, %242 : vector<2x64xf32>
    %244 = math.tanh %243 : vector<2x64xf32>
    %245 = arith.mulf %238, %244 : vector<2x64xf32>
    %246 = vector.extract_strided_slice %167 {offsets = [8, 0], sizes = [2, 256], strides = [1, 1]} : vector<16x256xf32> to vector<2x256xf32>
    %cst_42 = arith.constant dense<0.000000e+00> : vector<2x256xf32>
    %247 = tpu.matmul %245, %163, %cst_42 {dimension_numbers = #tpu.dot_dimension_numbers<[1], [0], [0], [1], [0, 0, 1, 1], [], []>} : vector<2x64xf32>, vector<64x256xf32>, vector<2x256xf32> -> vector<2x256xf32>
    %248 = arith.addf %246, %247 : vector<2x256xf32>
    %249 = vector.extract_strided_slice %248 {offsets = [0, 0], sizes = [2, 192], strides = [1, 1]} : vector<2x256xf32> to vector<2x192xf32>
    %250 = arith.negf %249 : vector<2x192xf32>
    %251 = math.exp %250 : vector<2x192xf32>
    %cst_43 = arith.constant 1.000000e+00 : f32
    %252 = vector.broadcast %cst_43 : f32 to vector<2x192xf32>
    %253 = arith.addf %252, %251 : vector<2x192xf32>
    %254 = arith.divf %252, %253 : vector<2x192xf32>
    %255 = vector.extract_strided_slice %254 {offsets = [0, 0], sizes = [2, 64], strides = [1, 1]} : vector<2x192xf32> to vector<2x64xf32>
    %256 = vector.extract_strided_slice %254 {offsets = [0, 64], sizes = [2, 64], strides = [1, 1]} : vector<2x192xf32> to vector<2x64xf32>
    %257 = vector.extract_strided_slice %254 {offsets = [0, 128], sizes = [2, 64], strides = [1, 1]} : vector<2x192xf32> to vector<2x64xf32>
    %258 = vector.extract_strided_slice %248 {offsets = [0, 192], sizes = [2, 64], strides = [1, 1]} : vector<2x256xf32> to vector<2x64xf32>
    %259 = math.tanh %258 : vector<2x64xf32>
    %260 = arith.mulf %256, %243 : vector<2x64xf32>
    %261 = arith.mulf %255, %259 : vector<2x64xf32>
    %262 = arith.addf %260, %261 : vector<2x64xf32>
    %263 = math.tanh %262 : vector<2x64xf32>
    %264 = arith.mulf %257, %263 : vector<2x64xf32>
    %265 = vector.extract_strided_slice %167 {offsets = [10, 0], sizes = [2, 256], strides = [1, 1]} : vector<16x256xf32> to vector<2x256xf32>
    %cst_44 = arith.constant dense<0.000000e+00> : vector<2x256xf32>
    %266 = tpu.matmul %264, %163, %cst_44 {dimension_numbers = #tpu.dot_dimension_numbers<[1], [0], [0], [1], [0, 0, 1, 1], [], []>} : vector<2x64xf32>, vector<64x256xf32>, vector<2x256xf32> -> vector<2x256xf32>
    %267 = arith.addf %265, %266 : vector<2x256xf32>
    %268 = vector.extract_strided_slice %267 {offsets = [0, 0], sizes = [2, 192], strides = [1, 1]} : vector<2x256xf32> to vector<2x192xf32>
    %269 = arith.negf %268 : vector<2x192xf32>
    %270 = math.exp %269 : vector<2x192xf32>
    %cst_45 = arith.constant 1.000000e+00 : f32
    %271 = vector.broadcast %cst_45 : f32 to vector<2x192xf32>
    %272 = arith.addf %271, %270 : vector<2x192xf32>
    %273 = arith.divf %271, %272 : vector<2x192xf32>
    %274 = vector.extract_strided_slice %273 {offsets = [0, 0], sizes = [2, 64], strides = [1, 1]} : vector<2x192xf32> to vector<2x64xf32>
    %275 = vector.extract_strided_slice %273 {offsets = [0, 64], sizes = [2, 64], strides = [1, 1]} : vector<2x192xf32> to vector<2x64xf32>
    %276 = vector.extract_strided_slice %273 {offsets = [0, 128], sizes = [2, 64], strides = [1, 1]} : vector<2x192xf32> to vector<2x64xf32>
    %277 = vector.extract_strided_slice %267 {offsets = [0, 192], sizes = [2, 64], strides = [1, 1]} : vector<2x256xf32> to vector<2x64xf32>
    %278 = math.tanh %277 : vector<2x64xf32>
    %279 = arith.mulf %275, %262 : vector<2x64xf32>
    %280 = arith.mulf %274, %278 : vector<2x64xf32>
    %281 = arith.addf %279, %280 : vector<2x64xf32>
    %282 = math.tanh %281 : vector<2x64xf32>
    %283 = arith.mulf %276, %282 : vector<2x64xf32>
    %284 = vector.extract_strided_slice %167 {offsets = [12, 0], sizes = [2, 256], strides = [1, 1]} : vector<16x256xf32> to vector<2x256xf32>
    %cst_46 = arith.constant dense<0.000000e+00> : vector<2x256xf32>
    %285 = tpu.matmul %283, %163, %cst_46 {dimension_numbers = #tpu.dot_dimension_numbers<[1], [0], [0], [1], [0, 0, 1, 1], [], []>} : vector<2x64xf32>, vector<64x256xf32>, vector<2x256xf32> -> vector<2x256xf32>
    %286 = arith.addf %284, %285 : vector<2x256xf32>
    %287 = vector.extract_strided_slice %286 {offsets = [0, 0], sizes = [2, 192], strides = [1, 1]} : vector<2x256xf32> to vector<2x192xf32>
    %288 = arith.negf %287 : vector<2x192xf32>
    %289 = math.exp %288 : vector<2x192xf32>
    %cst_47 = arith.constant 1.000000e+00 : f32
    %290 = vector.broadcast %cst_47 : f32 to vector<2x192xf32>
    %291 = arith.addf %290, %289 : vector<2x192xf32>
    %292 = arith.divf %290, %291 : vector<2x192xf32>
    %293 = vector.extract_strided_slice %292 {offsets = [0, 0], sizes = [2, 64], strides = [1, 1]} : vector<2x192xf32> to vector<2x64xf32>
    %294 = vector.extract_strided_slice %292 {offsets = [0, 64], sizes = [2, 64], strides = [1, 1]} : vector<2x192xf32> to vector<2x64xf32>
    %295 = vector.extract_strided_slice %292 {offsets = [0, 128], sizes = [2, 64], strides = [1, 1]} : vector<2x192xf32> to vector<2x64xf32>
    %296 = vector.extract_strided_slice %286 {offsets = [0, 192], sizes = [2, 64], strides = [1, 1]} : vector<2x256xf32> to vector<2x64xf32>
    %297 = math.tanh %296 : vector<2x64xf32>
    %298 = arith.mulf %294, %281 : vector<2x64xf32>
    %299 = arith.mulf %293, %297 : vector<2x64xf32>
    %300 = arith.addf %298, %299 : vector<2x64xf32>
    %301 = math.tanh %300 : vector<2x64xf32>
    %302 = arith.mulf %295, %301 : vector<2x64xf32>
    %303 = vector.extract_strided_slice %167 {offsets = [14, 0], sizes = [2, 256], strides = [1, 1]} : vector<16x256xf32> to vector<2x256xf32>
    %cst_48 = arith.constant dense<0.000000e+00> : vector<2x256xf32>
    %304 = tpu.matmul %302, %163, %cst_48 {dimension_numbers = #tpu.dot_dimension_numbers<[1], [0], [0], [1], [0, 0, 1, 1], [], []>} : vector<2x64xf32>, vector<64x256xf32>, vector<2x256xf32> -> vector<2x256xf32>
    %305 = arith.addf %303, %304 : vector<2x256xf32>
    %306 = vector.extract_strided_slice %305 {offsets = [0, 0], sizes = [2, 192], strides = [1, 1]} : vector<2x256xf32> to vector<2x192xf32>
    %307 = arith.negf %306 : vector<2x192xf32>
    %308 = math.exp %307 : vector<2x192xf32>
    %cst_49 = arith.constant 1.000000e+00 : f32
    %309 = vector.broadcast %cst_49 : f32 to vector<2x192xf32>
    %310 = arith.addf %309, %308 : vector<2x192xf32>
    %311 = arith.divf %309, %310 : vector<2x192xf32>
    %312 = vector.extract_strided_slice %311 {offsets = [0, 0], sizes = [2, 64], strides = [1, 1]} : vector<2x192xf32> to vector<2x64xf32>
    %313 = vector.extract_strided_slice %311 {offsets = [0, 64], sizes = [2, 64], strides = [1, 1]} : vector<2x192xf32> to vector<2x64xf32>
    %314 = vector.extract_strided_slice %311 {offsets = [0, 128], sizes = [2, 64], strides = [1, 1]} : vector<2x192xf32> to vector<2x64xf32>
    %315 = vector.extract_strided_slice %305 {offsets = [0, 192], sizes = [2, 64], strides = [1, 1]} : vector<2x256xf32> to vector<2x64xf32>
    %316 = math.tanh %315 : vector<2x64xf32>
    %317 = arith.mulf %313, %300 : vector<2x64xf32>
    %318 = arith.mulf %312, %316 : vector<2x64xf32>
    %319 = arith.addf %317, %318 : vector<2x64xf32>
    %320 = math.tanh %319 : vector<2x64xf32>
    %321 = arith.mulf %314, %320 : vector<2x64xf32>
    %322 = tpu.concatenate %188, %207, %226, %245, %264, %283, %302, %321 in 0 : vector<2x64xf32>, vector<2x64xf32>, vector<2x64xf32>, vector<2x64xf32>, vector<2x64xf32>, vector<2x64xf32>, vector<2x64xf32>, vector<2x64xf32> -> vector<16x64xf32>
    %c0_50 = arith.constant 0 : index
    %c0_51 = arith.constant 0 : index
    %323 = vector.load %arg7[%c0_50, %c0_51] : memref<64x256xf32, #tpu.memory_space<vmem>>, vector<64x256xf32>
    %c0_52 = arith.constant 0 : index
    %c0_53 = arith.constant 0 : index
    %324 = vector.load %arg8[%c0_52, %c0_53] : memref<64x256xf32, #tpu.memory_space<vmem>>, vector<64x256xf32>
    %c0_54 = arith.constant 0 : index
    %c0_55 = arith.constant 0 : index
    %325 = vector.load %arg9[%c0_54, %c0_55] : memref<1x256xf32, #tpu.memory_space<vmem>>, vector<1x256xf32>
    %cst_56 = arith.constant dense<0.000000e+00> : vector<16x256xf32>
    %326 = tpu.matmul %322, %323, %cst_56 {dimension_numbers = #tpu.dot_dimension_numbers<[1], [0], [0], [1], [0, 0, 1, 1], [], []>} : vector<16x64xf32>, vector<64x256xf32>, vector<16x256xf32> -> vector<16x256xf32>
    %327 = vector.broadcast %325 : vector<1x256xf32> to vector<16x256xf32>
    %328 = arith.addf %326, %327 : vector<16x256xf32>
    %cst_57 = arith.constant 0.000000e+00 : f32
    %329 = vector.broadcast %cst_57 : f32 to vector<2x64xf32>
    %cst_58 = arith.constant 0.000000e+00 : f32
    %330 = vector.broadcast %cst_58 : f32 to vector<2x64xf32>
    %331 = vector.extract_strided_slice %328 {offsets = [0, 0], sizes = [2, 256], strides = [1, 1]} : vector<16x256xf32> to vector<2x256xf32>
    %cst_59 = arith.constant dense<0.000000e+00> : vector<2x256xf32>
    %332 = tpu.matmul %329, %324, %cst_59 {dimension_numbers = #tpu.dot_dimension_numbers<[1], [0], [0], [1], [0, 0, 1, 1], [], []>} : vector<2x64xf32>, vector<64x256xf32>, vector<2x256xf32> -> vector<2x256xf32>
    %333 = arith.addf %331, %332 : vector<2x256xf32>
    %334 = vector.extract_strided_slice %333 {offsets = [0, 0], sizes = [2, 192], strides = [1, 1]} : vector<2x256xf32> to vector<2x192xf32>
    %335 = arith.negf %334 : vector<2x192xf32>
    %336 = math.exp %335 : vector<2x192xf32>
    %cst_60 = arith.constant 1.000000e+00 : f32
    %337 = vector.broadcast %cst_60 : f32 to vector<2x192xf32>
    %338 = arith.addf %337, %336 : vector<2x192xf32>
    %339 = arith.divf %337, %338 : vector<2x192xf32>
    %340 = vector.extract_strided_slice %339 {offsets = [0, 0], sizes = [2, 64], strides = [1, 1]} : vector<2x192xf32> to vector<2x64xf32>
    %341 = vector.extract_strided_slice %339 {offsets = [0, 64], sizes = [2, 64], strides = [1, 1]} : vector<2x192xf32> to vector<2x64xf32>
    %342 = vector.extract_strided_slice %339 {offsets = [0, 128], sizes = [2, 64], strides = [1, 1]} : vector<2x192xf32> to vector<2x64xf32>
    %343 = vector.extract_strided_slice %333 {offsets = [0, 192], sizes = [2, 64], strides = [1, 1]} : vector<2x256xf32> to vector<2x64xf32>
    %344 = math.tanh %343 : vector<2x64xf32>
    %345 = arith.mulf %341, %330 : vector<2x64xf32>
    %346 = arith.mulf %340, %344 : vector<2x64xf32>
    %347 = arith.addf %345, %346 : vector<2x64xf32>
    %348 = math.tanh %347 : vector<2x64xf32>
    %349 = arith.mulf %342, %348 : vector<2x64xf32>
    %350 = vector.extract_strided_slice %328 {offsets = [2, 0], sizes = [2, 256], strides = [1, 1]} : vector<16x256xf32> to vector<2x256xf32>
    %cst_61 = arith.constant dense<0.000000e+00> : vector<2x256xf32>
    %351 = tpu.matmul %349, %324, %cst_61 {dimension_numbers = #tpu.dot_dimension_numbers<[1], [0], [0], [1], [0, 0, 1, 1], [], []>} : vector<2x64xf32>, vector<64x256xf32>, vector<2x256xf32> -> vector<2x256xf32>
    %352 = arith.addf %350, %351 : vector<2x256xf32>
    %353 = vector.extract_strided_slice %352 {offsets = [0, 0], sizes = [2, 192], strides = [1, 1]} : vector<2x256xf32> to vector<2x192xf32>
    %354 = arith.negf %353 : vector<2x192xf32>
    %355 = math.exp %354 : vector<2x192xf32>
    %cst_62 = arith.constant 1.000000e+00 : f32
    %356 = vector.broadcast %cst_62 : f32 to vector<2x192xf32>
    %357 = arith.addf %356, %355 : vector<2x192xf32>
    %358 = arith.divf %356, %357 : vector<2x192xf32>
    %359 = vector.extract_strided_slice %358 {offsets = [0, 0], sizes = [2, 64], strides = [1, 1]} : vector<2x192xf32> to vector<2x64xf32>
    %360 = vector.extract_strided_slice %358 {offsets = [0, 64], sizes = [2, 64], strides = [1, 1]} : vector<2x192xf32> to vector<2x64xf32>
    %361 = vector.extract_strided_slice %358 {offsets = [0, 128], sizes = [2, 64], strides = [1, 1]} : vector<2x192xf32> to vector<2x64xf32>
    %362 = vector.extract_strided_slice %352 {offsets = [0, 192], sizes = [2, 64], strides = [1, 1]} : vector<2x256xf32> to vector<2x64xf32>
    %363 = math.tanh %362 : vector<2x64xf32>
    %364 = arith.mulf %360, %347 : vector<2x64xf32>
    %365 = arith.mulf %359, %363 : vector<2x64xf32>
    %366 = arith.addf %364, %365 : vector<2x64xf32>
    %367 = math.tanh %366 : vector<2x64xf32>
    %368 = arith.mulf %361, %367 : vector<2x64xf32>
    %369 = vector.extract_strided_slice %328 {offsets = [4, 0], sizes = [2, 256], strides = [1, 1]} : vector<16x256xf32> to vector<2x256xf32>
    %cst_63 = arith.constant dense<0.000000e+00> : vector<2x256xf32>
    %370 = tpu.matmul %368, %324, %cst_63 {dimension_numbers = #tpu.dot_dimension_numbers<[1], [0], [0], [1], [0, 0, 1, 1], [], []>} : vector<2x64xf32>, vector<64x256xf32>, vector<2x256xf32> -> vector<2x256xf32>
    %371 = arith.addf %369, %370 : vector<2x256xf32>
    %372 = vector.extract_strided_slice %371 {offsets = [0, 0], sizes = [2, 192], strides = [1, 1]} : vector<2x256xf32> to vector<2x192xf32>
    %373 = arith.negf %372 : vector<2x192xf32>
    %374 = math.exp %373 : vector<2x192xf32>
    %cst_64 = arith.constant 1.000000e+00 : f32
    %375 = vector.broadcast %cst_64 : f32 to vector<2x192xf32>
    %376 = arith.addf %375, %374 : vector<2x192xf32>
    %377 = arith.divf %375, %376 : vector<2x192xf32>
    %378 = vector.extract_strided_slice %377 {offsets = [0, 0], sizes = [2, 64], strides = [1, 1]} : vector<2x192xf32> to vector<2x64xf32>
    %379 = vector.extract_strided_slice %377 {offsets = [0, 64], sizes = [2, 64], strides = [1, 1]} : vector<2x192xf32> to vector<2x64xf32>
    %380 = vector.extract_strided_slice %377 {offsets = [0, 128], sizes = [2, 64], strides = [1, 1]} : vector<2x192xf32> to vector<2x64xf32>
    %381 = vector.extract_strided_slice %371 {offsets = [0, 192], sizes = [2, 64], strides = [1, 1]} : vector<2x256xf32> to vector<2x64xf32>
    %382 = math.tanh %381 : vector<2x64xf32>
    %383 = arith.mulf %379, %366 : vector<2x64xf32>
    %384 = arith.mulf %378, %382 : vector<2x64xf32>
    %385 = arith.addf %383, %384 : vector<2x64xf32>
    %386 = math.tanh %385 : vector<2x64xf32>
    %387 = arith.mulf %380, %386 : vector<2x64xf32>
    %388 = vector.extract_strided_slice %328 {offsets = [6, 0], sizes = [2, 256], strides = [1, 1]} : vector<16x256xf32> to vector<2x256xf32>
    %cst_65 = arith.constant dense<0.000000e+00> : vector<2x256xf32>
    %389 = tpu.matmul %387, %324, %cst_65 {dimension_numbers = #tpu.dot_dimension_numbers<[1], [0], [0], [1], [0, 0, 1, 1], [], []>} : vector<2x64xf32>, vector<64x256xf32>, vector<2x256xf32> -> vector<2x256xf32>
    %390 = arith.addf %388, %389 : vector<2x256xf32>
    %391 = vector.extract_strided_slice %390 {offsets = [0, 0], sizes = [2, 192], strides = [1, 1]} : vector<2x256xf32> to vector<2x192xf32>
    %392 = arith.negf %391 : vector<2x192xf32>
    %393 = math.exp %392 : vector<2x192xf32>
    %cst_66 = arith.constant 1.000000e+00 : f32
    %394 = vector.broadcast %cst_66 : f32 to vector<2x192xf32>
    %395 = arith.addf %394, %393 : vector<2x192xf32>
    %396 = arith.divf %394, %395 : vector<2x192xf32>
    %397 = vector.extract_strided_slice %396 {offsets = [0, 0], sizes = [2, 64], strides = [1, 1]} : vector<2x192xf32> to vector<2x64xf32>
    %398 = vector.extract_strided_slice %396 {offsets = [0, 64], sizes = [2, 64], strides = [1, 1]} : vector<2x192xf32> to vector<2x64xf32>
    %399 = vector.extract_strided_slice %396 {offsets = [0, 128], sizes = [2, 64], strides = [1, 1]} : vector<2x192xf32> to vector<2x64xf32>
    %400 = vector.extract_strided_slice %390 {offsets = [0, 192], sizes = [2, 64], strides = [1, 1]} : vector<2x256xf32> to vector<2x64xf32>
    %401 = math.tanh %400 : vector<2x64xf32>
    %402 = arith.mulf %398, %385 : vector<2x64xf32>
    %403 = arith.mulf %397, %401 : vector<2x64xf32>
    %404 = arith.addf %402, %403 : vector<2x64xf32>
    %405 = math.tanh %404 : vector<2x64xf32>
    %406 = arith.mulf %399, %405 : vector<2x64xf32>
    %407 = vector.extract_strided_slice %328 {offsets = [8, 0], sizes = [2, 256], strides = [1, 1]} : vector<16x256xf32> to vector<2x256xf32>
    %cst_67 = arith.constant dense<0.000000e+00> : vector<2x256xf32>
    %408 = tpu.matmul %406, %324, %cst_67 {dimension_numbers = #tpu.dot_dimension_numbers<[1], [0], [0], [1], [0, 0, 1, 1], [], []>} : vector<2x64xf32>, vector<64x256xf32>, vector<2x256xf32> -> vector<2x256xf32>
    %409 = arith.addf %407, %408 : vector<2x256xf32>
    %410 = vector.extract_strided_slice %409 {offsets = [0, 0], sizes = [2, 192], strides = [1, 1]} : vector<2x256xf32> to vector<2x192xf32>
    %411 = arith.negf %410 : vector<2x192xf32>
    %412 = math.exp %411 : vector<2x192xf32>
    %cst_68 = arith.constant 1.000000e+00 : f32
    %413 = vector.broadcast %cst_68 : f32 to vector<2x192xf32>
    %414 = arith.addf %413, %412 : vector<2x192xf32>
    %415 = arith.divf %413, %414 : vector<2x192xf32>
    %416 = vector.extract_strided_slice %415 {offsets = [0, 0], sizes = [2, 64], strides = [1, 1]} : vector<2x192xf32> to vector<2x64xf32>
    %417 = vector.extract_strided_slice %415 {offsets = [0, 64], sizes = [2, 64], strides = [1, 1]} : vector<2x192xf32> to vector<2x64xf32>
    %418 = vector.extract_strided_slice %415 {offsets = [0, 128], sizes = [2, 64], strides = [1, 1]} : vector<2x192xf32> to vector<2x64xf32>
    %419 = vector.extract_strided_slice %409 {offsets = [0, 192], sizes = [2, 64], strides = [1, 1]} : vector<2x256xf32> to vector<2x64xf32>
    %420 = math.tanh %419 : vector<2x64xf32>
    %421 = arith.mulf %417, %404 : vector<2x64xf32>
    %422 = arith.mulf %416, %420 : vector<2x64xf32>
    %423 = arith.addf %421, %422 : vector<2x64xf32>
    %424 = math.tanh %423 : vector<2x64xf32>
    %425 = arith.mulf %418, %424 : vector<2x64xf32>
    %426 = vector.extract_strided_slice %328 {offsets = [10, 0], sizes = [2, 256], strides = [1, 1]} : vector<16x256xf32> to vector<2x256xf32>
    %cst_69 = arith.constant dense<0.000000e+00> : vector<2x256xf32>
    %427 = tpu.matmul %425, %324, %cst_69 {dimension_numbers = #tpu.dot_dimension_numbers<[1], [0], [0], [1], [0, 0, 1, 1], [], []>} : vector<2x64xf32>, vector<64x256xf32>, vector<2x256xf32> -> vector<2x256xf32>
    %428 = arith.addf %426, %427 : vector<2x256xf32>
    %429 = vector.extract_strided_slice %428 {offsets = [0, 0], sizes = [2, 192], strides = [1, 1]} : vector<2x256xf32> to vector<2x192xf32>
    %430 = arith.negf %429 : vector<2x192xf32>
    %431 = math.exp %430 : vector<2x192xf32>
    %cst_70 = arith.constant 1.000000e+00 : f32
    %432 = vector.broadcast %cst_70 : f32 to vector<2x192xf32>
    %433 = arith.addf %432, %431 : vector<2x192xf32>
    %434 = arith.divf %432, %433 : vector<2x192xf32>
    %435 = vector.extract_strided_slice %434 {offsets = [0, 0], sizes = [2, 64], strides = [1, 1]} : vector<2x192xf32> to vector<2x64xf32>
    %436 = vector.extract_strided_slice %434 {offsets = [0, 64], sizes = [2, 64], strides = [1, 1]} : vector<2x192xf32> to vector<2x64xf32>
    %437 = vector.extract_strided_slice %434 {offsets = [0, 128], sizes = [2, 64], strides = [1, 1]} : vector<2x192xf32> to vector<2x64xf32>
    %438 = vector.extract_strided_slice %428 {offsets = [0, 192], sizes = [2, 64], strides = [1, 1]} : vector<2x256xf32> to vector<2x64xf32>
    %439 = math.tanh %438 : vector<2x64xf32>
    %440 = arith.mulf %436, %423 : vector<2x64xf32>
    %441 = arith.mulf %435, %439 : vector<2x64xf32>
    %442 = arith.addf %440, %441 : vector<2x64xf32>
    %443 = math.tanh %442 : vector<2x64xf32>
    %444 = arith.mulf %437, %443 : vector<2x64xf32>
    %445 = vector.extract_strided_slice %328 {offsets = [12, 0], sizes = [2, 256], strides = [1, 1]} : vector<16x256xf32> to vector<2x256xf32>
    %cst_71 = arith.constant dense<0.000000e+00> : vector<2x256xf32>
    %446 = tpu.matmul %444, %324, %cst_71 {dimension_numbers = #tpu.dot_dimension_numbers<[1], [0], [0], [1], [0, 0, 1, 1], [], []>} : vector<2x64xf32>, vector<64x256xf32>, vector<2x256xf32> -> vector<2x256xf32>
    %447 = arith.addf %445, %446 : vector<2x256xf32>
    %448 = vector.extract_strided_slice %447 {offsets = [0, 0], sizes = [2, 192], strides = [1, 1]} : vector<2x256xf32> to vector<2x192xf32>
    %449 = arith.negf %448 : vector<2x192xf32>
    %450 = math.exp %449 : vector<2x192xf32>
    %cst_72 = arith.constant 1.000000e+00 : f32
    %451 = vector.broadcast %cst_72 : f32 to vector<2x192xf32>
    %452 = arith.addf %451, %450 : vector<2x192xf32>
    %453 = arith.divf %451, %452 : vector<2x192xf32>
    %454 = vector.extract_strided_slice %453 {offsets = [0, 0], sizes = [2, 64], strides = [1, 1]} : vector<2x192xf32> to vector<2x64xf32>
    %455 = vector.extract_strided_slice %453 {offsets = [0, 64], sizes = [2, 64], strides = [1, 1]} : vector<2x192xf32> to vector<2x64xf32>
    %456 = vector.extract_strided_slice %453 {offsets = [0, 128], sizes = [2, 64], strides = [1, 1]} : vector<2x192xf32> to vector<2x64xf32>
    %457 = vector.extract_strided_slice %447 {offsets = [0, 192], sizes = [2, 64], strides = [1, 1]} : vector<2x256xf32> to vector<2x64xf32>
    %458 = math.tanh %457 : vector<2x64xf32>
    %459 = arith.mulf %455, %442 : vector<2x64xf32>
    %460 = arith.mulf %454, %458 : vector<2x64xf32>
    %461 = arith.addf %459, %460 : vector<2x64xf32>
    %462 = math.tanh %461 : vector<2x64xf32>
    %463 = arith.mulf %456, %462 : vector<2x64xf32>
    %464 = vector.extract_strided_slice %328 {offsets = [14, 0], sizes = [2, 256], strides = [1, 1]} : vector<16x256xf32> to vector<2x256xf32>
    %cst_73 = arith.constant dense<0.000000e+00> : vector<2x256xf32>
    %465 = tpu.matmul %463, %324, %cst_73 {dimension_numbers = #tpu.dot_dimension_numbers<[1], [0], [0], [1], [0, 0, 1, 1], [], []>} : vector<2x64xf32>, vector<64x256xf32>, vector<2x256xf32> -> vector<2x256xf32>
    %466 = arith.addf %464, %465 : vector<2x256xf32>
    %467 = vector.extract_strided_slice %466 {offsets = [0, 0], sizes = [2, 192], strides = [1, 1]} : vector<2x256xf32> to vector<2x192xf32>
    %468 = arith.negf %467 : vector<2x192xf32>
    %469 = math.exp %468 : vector<2x192xf32>
    %cst_74 = arith.constant 1.000000e+00 : f32
    %470 = vector.broadcast %cst_74 : f32 to vector<2x192xf32>
    %471 = arith.addf %470, %469 : vector<2x192xf32>
    %472 = arith.divf %470, %471 : vector<2x192xf32>
    %473 = vector.extract_strided_slice %472 {offsets = [0, 0], sizes = [2, 64], strides = [1, 1]} : vector<2x192xf32> to vector<2x64xf32>
    %474 = vector.extract_strided_slice %472 {offsets = [0, 64], sizes = [2, 64], strides = [1, 1]} : vector<2x192xf32> to vector<2x64xf32>
    %475 = vector.extract_strided_slice %472 {offsets = [0, 128], sizes = [2, 64], strides = [1, 1]} : vector<2x192xf32> to vector<2x64xf32>
    %476 = vector.extract_strided_slice %466 {offsets = [0, 192], sizes = [2, 64], strides = [1, 1]} : vector<2x256xf32> to vector<2x64xf32>
    %477 = math.tanh %476 : vector<2x64xf32>
    %478 = arith.mulf %474, %461 : vector<2x64xf32>
    %479 = arith.mulf %473, %477 : vector<2x64xf32>
    %480 = arith.addf %478, %479 : vector<2x64xf32>
    %481 = math.tanh %480 : vector<2x64xf32>
    %482 = arith.mulf %475, %481 : vector<2x64xf32>
    %483 = tpu.concatenate %349, %368, %387, %406, %425, %444, %463, %482 in 0 : vector<2x64xf32>, vector<2x64xf32>, vector<2x64xf32>, vector<2x64xf32>, vector<2x64xf32>, vector<2x64xf32>, vector<2x64xf32>, vector<2x64xf32> -> vector<16x64xf32>
    %c0_75 = arith.constant 0 : index
    %c0_76 = arith.constant 0 : index
    %484 = vector.load %arg10[%c0_75, %c0_76] : memref<64x256xf32, #tpu.memory_space<vmem>>, vector<64x256xf32>
    %c0_77 = arith.constant 0 : index
    %c0_78 = arith.constant 0 : index
    %485 = vector.load %arg11[%c0_77, %c0_78] : memref<64x256xf32, #tpu.memory_space<vmem>>, vector<64x256xf32>
    %c0_79 = arith.constant 0 : index
    %c0_80 = arith.constant 0 : index
    %486 = vector.load %arg12[%c0_79, %c0_80] : memref<1x256xf32, #tpu.memory_space<vmem>>, vector<1x256xf32>
    %cst_81 = arith.constant dense<0.000000e+00> : vector<16x256xf32>
    %487 = tpu.matmul %483, %484, %cst_81 {dimension_numbers = #tpu.dot_dimension_numbers<[1], [0], [0], [1], [0, 0, 1, 1], [], []>} : vector<16x64xf32>, vector<64x256xf32>, vector<16x256xf32> -> vector<16x256xf32>
    %488 = vector.broadcast %486 : vector<1x256xf32> to vector<16x256xf32>
    %489 = arith.addf %487, %488 : vector<16x256xf32>
    %cst_82 = arith.constant 0.000000e+00 : f32
    %490 = vector.broadcast %cst_82 : f32 to vector<2x64xf32>
    %cst_83 = arith.constant 0.000000e+00 : f32
    %491 = vector.broadcast %cst_83 : f32 to vector<2x64xf32>
    %492 = vector.extract_strided_slice %489 {offsets = [0, 0], sizes = [2, 256], strides = [1, 1]} : vector<16x256xf32> to vector<2x256xf32>
    %cst_84 = arith.constant dense<0.000000e+00> : vector<2x256xf32>
    %493 = tpu.matmul %490, %485, %cst_84 {dimension_numbers = #tpu.dot_dimension_numbers<[1], [0], [0], [1], [0, 0, 1, 1], [], []>} : vector<2x64xf32>, vector<64x256xf32>, vector<2x256xf32> -> vector<2x256xf32>
    %494 = arith.addf %492, %493 : vector<2x256xf32>
    %495 = vector.extract_strided_slice %494 {offsets = [0, 0], sizes = [2, 192], strides = [1, 1]} : vector<2x256xf32> to vector<2x192xf32>
    %496 = arith.negf %495 : vector<2x192xf32>
    %497 = math.exp %496 : vector<2x192xf32>
    %cst_85 = arith.constant 1.000000e+00 : f32
    %498 = vector.broadcast %cst_85 : f32 to vector<2x192xf32>
    %499 = arith.addf %498, %497 : vector<2x192xf32>
    %500 = arith.divf %498, %499 : vector<2x192xf32>
    %501 = vector.extract_strided_slice %500 {offsets = [0, 0], sizes = [2, 64], strides = [1, 1]} : vector<2x192xf32> to vector<2x64xf32>
    %502 = vector.extract_strided_slice %500 {offsets = [0, 64], sizes = [2, 64], strides = [1, 1]} : vector<2x192xf32> to vector<2x64xf32>
    %503 = vector.extract_strided_slice %500 {offsets = [0, 128], sizes = [2, 64], strides = [1, 1]} : vector<2x192xf32> to vector<2x64xf32>
    %504 = vector.extract_strided_slice %494 {offsets = [0, 192], sizes = [2, 64], strides = [1, 1]} : vector<2x256xf32> to vector<2x64xf32>
    %505 = math.tanh %504 : vector<2x64xf32>
    %506 = arith.mulf %502, %491 : vector<2x64xf32>
    %507 = arith.mulf %501, %505 : vector<2x64xf32>
    %508 = arith.addf %506, %507 : vector<2x64xf32>
    %509 = math.tanh %508 : vector<2x64xf32>
    %510 = arith.mulf %503, %509 : vector<2x64xf32>
    %511 = vector.extract_strided_slice %489 {offsets = [2, 0], sizes = [2, 256], strides = [1, 1]} : vector<16x256xf32> to vector<2x256xf32>
    %cst_86 = arith.constant dense<0.000000e+00> : vector<2x256xf32>
    %512 = tpu.matmul %510, %485, %cst_86 {dimension_numbers = #tpu.dot_dimension_numbers<[1], [0], [0], [1], [0, 0, 1, 1], [], []>} : vector<2x64xf32>, vector<64x256xf32>, vector<2x256xf32> -> vector<2x256xf32>
    %513 = arith.addf %511, %512 : vector<2x256xf32>
    %514 = vector.extract_strided_slice %513 {offsets = [0, 0], sizes = [2, 192], strides = [1, 1]} : vector<2x256xf32> to vector<2x192xf32>
    %515 = arith.negf %514 : vector<2x192xf32>
    %516 = math.exp %515 : vector<2x192xf32>
    %cst_87 = arith.constant 1.000000e+00 : f32
    %517 = vector.broadcast %cst_87 : f32 to vector<2x192xf32>
    %518 = arith.addf %517, %516 : vector<2x192xf32>
    %519 = arith.divf %517, %518 : vector<2x192xf32>
    %520 = vector.extract_strided_slice %519 {offsets = [0, 0], sizes = [2, 64], strides = [1, 1]} : vector<2x192xf32> to vector<2x64xf32>
    %521 = vector.extract_strided_slice %519 {offsets = [0, 64], sizes = [2, 64], strides = [1, 1]} : vector<2x192xf32> to vector<2x64xf32>
    %522 = vector.extract_strided_slice %519 {offsets = [0, 128], sizes = [2, 64], strides = [1, 1]} : vector<2x192xf32> to vector<2x64xf32>
    %523 = vector.extract_strided_slice %513 {offsets = [0, 192], sizes = [2, 64], strides = [1, 1]} : vector<2x256xf32> to vector<2x64xf32>
    %524 = math.tanh %523 : vector<2x64xf32>
    %525 = arith.mulf %521, %508 : vector<2x64xf32>
    %526 = arith.mulf %520, %524 : vector<2x64xf32>
    %527 = arith.addf %525, %526 : vector<2x64xf32>
    %528 = math.tanh %527 : vector<2x64xf32>
    %529 = arith.mulf %522, %528 : vector<2x64xf32>
    %530 = vector.extract_strided_slice %489 {offsets = [4, 0], sizes = [2, 256], strides = [1, 1]} : vector<16x256xf32> to vector<2x256xf32>
    %cst_88 = arith.constant dense<0.000000e+00> : vector<2x256xf32>
    %531 = tpu.matmul %529, %485, %cst_88 {dimension_numbers = #tpu.dot_dimension_numbers<[1], [0], [0], [1], [0, 0, 1, 1], [], []>} : vector<2x64xf32>, vector<64x256xf32>, vector<2x256xf32> -> vector<2x256xf32>
    %532 = arith.addf %530, %531 : vector<2x256xf32>
    %533 = vector.extract_strided_slice %532 {offsets = [0, 0], sizes = [2, 192], strides = [1, 1]} : vector<2x256xf32> to vector<2x192xf32>
    %534 = arith.negf %533 : vector<2x192xf32>
    %535 = math.exp %534 : vector<2x192xf32>
    %cst_89 = arith.constant 1.000000e+00 : f32
    %536 = vector.broadcast %cst_89 : f32 to vector<2x192xf32>
    %537 = arith.addf %536, %535 : vector<2x192xf32>
    %538 = arith.divf %536, %537 : vector<2x192xf32>
    %539 = vector.extract_strided_slice %538 {offsets = [0, 0], sizes = [2, 64], strides = [1, 1]} : vector<2x192xf32> to vector<2x64xf32>
    %540 = vector.extract_strided_slice %538 {offsets = [0, 64], sizes = [2, 64], strides = [1, 1]} : vector<2x192xf32> to vector<2x64xf32>
    %541 = vector.extract_strided_slice %538 {offsets = [0, 128], sizes = [2, 64], strides = [1, 1]} : vector<2x192xf32> to vector<2x64xf32>
    %542 = vector.extract_strided_slice %532 {offsets = [0, 192], sizes = [2, 64], strides = [1, 1]} : vector<2x256xf32> to vector<2x64xf32>
    %543 = math.tanh %542 : vector<2x64xf32>
    %544 = arith.mulf %540, %527 : vector<2x64xf32>
    %545 = arith.mulf %539, %543 : vector<2x64xf32>
    %546 = arith.addf %544, %545 : vector<2x64xf32>
    %547 = math.tanh %546 : vector<2x64xf32>
    %548 = arith.mulf %541, %547 : vector<2x64xf32>
    %549 = vector.extract_strided_slice %489 {offsets = [6, 0], sizes = [2, 256], strides = [1, 1]} : vector<16x256xf32> to vector<2x256xf32>
    %cst_90 = arith.constant dense<0.000000e+00> : vector<2x256xf32>
    %550 = tpu.matmul %548, %485, %cst_90 {dimension_numbers = #tpu.dot_dimension_numbers<[1], [0], [0], [1], [0, 0, 1, 1], [], []>} : vector<2x64xf32>, vector<64x256xf32>, vector<2x256xf32> -> vector<2x256xf32>
    %551 = arith.addf %549, %550 : vector<2x256xf32>
    %552 = vector.extract_strided_slice %551 {offsets = [0, 0], sizes = [2, 192], strides = [1, 1]} : vector<2x256xf32> to vector<2x192xf32>
    %553 = arith.negf %552 : vector<2x192xf32>
    %554 = math.exp %553 : vector<2x192xf32>
    %cst_91 = arith.constant 1.000000e+00 : f32
    %555 = vector.broadcast %cst_91 : f32 to vector<2x192xf32>
    %556 = arith.addf %555, %554 : vector<2x192xf32>
    %557 = arith.divf %555, %556 : vector<2x192xf32>
    %558 = vector.extract_strided_slice %557 {offsets = [0, 0], sizes = [2, 64], strides = [1, 1]} : vector<2x192xf32> to vector<2x64xf32>
    %559 = vector.extract_strided_slice %557 {offsets = [0, 64], sizes = [2, 64], strides = [1, 1]} : vector<2x192xf32> to vector<2x64xf32>
    %560 = vector.extract_strided_slice %557 {offsets = [0, 128], sizes = [2, 64], strides = [1, 1]} : vector<2x192xf32> to vector<2x64xf32>
    %561 = vector.extract_strided_slice %551 {offsets = [0, 192], sizes = [2, 64], strides = [1, 1]} : vector<2x256xf32> to vector<2x64xf32>
    %562 = math.tanh %561 : vector<2x64xf32>
    %563 = arith.mulf %559, %546 : vector<2x64xf32>
    %564 = arith.mulf %558, %562 : vector<2x64xf32>
    %565 = arith.addf %563, %564 : vector<2x64xf32>
    %566 = math.tanh %565 : vector<2x64xf32>
    %567 = arith.mulf %560, %566 : vector<2x64xf32>
    %568 = vector.extract_strided_slice %489 {offsets = [8, 0], sizes = [2, 256], strides = [1, 1]} : vector<16x256xf32> to vector<2x256xf32>
    %cst_92 = arith.constant dense<0.000000e+00> : vector<2x256xf32>
    %569 = tpu.matmul %567, %485, %cst_92 {dimension_numbers = #tpu.dot_dimension_numbers<[1], [0], [0], [1], [0, 0, 1, 1], [], []>} : vector<2x64xf32>, vector<64x256xf32>, vector<2x256xf32> -> vector<2x256xf32>
    %570 = arith.addf %568, %569 : vector<2x256xf32>
    %571 = vector.extract_strided_slice %570 {offsets = [0, 0], sizes = [2, 192], strides = [1, 1]} : vector<2x256xf32> to vector<2x192xf32>
    %572 = arith.negf %571 : vector<2x192xf32>
    %573 = math.exp %572 : vector<2x192xf32>
    %cst_93 = arith.constant 1.000000e+00 : f32
    %574 = vector.broadcast %cst_93 : f32 to vector<2x192xf32>
    %575 = arith.addf %574, %573 : vector<2x192xf32>
    %576 = arith.divf %574, %575 : vector<2x192xf32>
    %577 = vector.extract_strided_slice %576 {offsets = [0, 0], sizes = [2, 64], strides = [1, 1]} : vector<2x192xf32> to vector<2x64xf32>
    %578 = vector.extract_strided_slice %576 {offsets = [0, 64], sizes = [2, 64], strides = [1, 1]} : vector<2x192xf32> to vector<2x64xf32>
    %579 = vector.extract_strided_slice %576 {offsets = [0, 128], sizes = [2, 64], strides = [1, 1]} : vector<2x192xf32> to vector<2x64xf32>
    %580 = vector.extract_strided_slice %570 {offsets = [0, 192], sizes = [2, 64], strides = [1, 1]} : vector<2x256xf32> to vector<2x64xf32>
    %581 = math.tanh %580 : vector<2x64xf32>
    %582 = arith.mulf %578, %565 : vector<2x64xf32>
    %583 = arith.mulf %577, %581 : vector<2x64xf32>
    %584 = arith.addf %582, %583 : vector<2x64xf32>
    %585 = math.tanh %584 : vector<2x64xf32>
    %586 = arith.mulf %579, %585 : vector<2x64xf32>
    %587 = vector.extract_strided_slice %489 {offsets = [10, 0], sizes = [2, 256], strides = [1, 1]} : vector<16x256xf32> to vector<2x256xf32>
    %cst_94 = arith.constant dense<0.000000e+00> : vector<2x256xf32>
    %588 = tpu.matmul %586, %485, %cst_94 {dimension_numbers = #tpu.dot_dimension_numbers<[1], [0], [0], [1], [0, 0, 1, 1], [], []>} : vector<2x64xf32>, vector<64x256xf32>, vector<2x256xf32> -> vector<2x256xf32>
    %589 = arith.addf %587, %588 : vector<2x256xf32>
    %590 = vector.extract_strided_slice %589 {offsets = [0, 0], sizes = [2, 192], strides = [1, 1]} : vector<2x256xf32> to vector<2x192xf32>
    %591 = arith.negf %590 : vector<2x192xf32>
    %592 = math.exp %591 : vector<2x192xf32>
    %cst_95 = arith.constant 1.000000e+00 : f32
    %593 = vector.broadcast %cst_95 : f32 to vector<2x192xf32>
    %594 = arith.addf %593, %592 : vector<2x192xf32>
    %595 = arith.divf %593, %594 : vector<2x192xf32>
    %596 = vector.extract_strided_slice %595 {offsets = [0, 0], sizes = [2, 64], strides = [1, 1]} : vector<2x192xf32> to vector<2x64xf32>
    %597 = vector.extract_strided_slice %595 {offsets = [0, 64], sizes = [2, 64], strides = [1, 1]} : vector<2x192xf32> to vector<2x64xf32>
    %598 = vector.extract_strided_slice %595 {offsets = [0, 128], sizes = [2, 64], strides = [1, 1]} : vector<2x192xf32> to vector<2x64xf32>
    %599 = vector.extract_strided_slice %589 {offsets = [0, 192], sizes = [2, 64], strides = [1, 1]} : vector<2x256xf32> to vector<2x64xf32>
    %600 = math.tanh %599 : vector<2x64xf32>
    %601 = arith.mulf %597, %584 : vector<2x64xf32>
    %602 = arith.mulf %596, %600 : vector<2x64xf32>
    %603 = arith.addf %601, %602 : vector<2x64xf32>
    %604 = math.tanh %603 : vector<2x64xf32>
    %605 = arith.mulf %598, %604 : vector<2x64xf32>
    %606 = vector.extract_strided_slice %489 {offsets = [12, 0], sizes = [2, 256], strides = [1, 1]} : vector<16x256xf32> to vector<2x256xf32>
    %cst_96 = arith.constant dense<0.000000e+00> : vector<2x256xf32>
    %607 = tpu.matmul %605, %485, %cst_96 {dimension_numbers = #tpu.dot_dimension_numbers<[1], [0], [0], [1], [0, 0, 1, 1], [], []>} : vector<2x64xf32>, vector<64x256xf32>, vector<2x256xf32> -> vector<2x256xf32>
    %608 = arith.addf %606, %607 : vector<2x256xf32>
    %609 = vector.extract_strided_slice %608 {offsets = [0, 0], sizes = [2, 192], strides = [1, 1]} : vector<2x256xf32> to vector<2x192xf32>
    %610 = arith.negf %609 : vector<2x192xf32>
    %611 = math.exp %610 : vector<2x192xf32>
    %cst_97 = arith.constant 1.000000e+00 : f32
    %612 = vector.broadcast %cst_97 : f32 to vector<2x192xf32>
    %613 = arith.addf %612, %611 : vector<2x192xf32>
    %614 = arith.divf %612, %613 : vector<2x192xf32>
    %615 = vector.extract_strided_slice %614 {offsets = [0, 0], sizes = [2, 64], strides = [1, 1]} : vector<2x192xf32> to vector<2x64xf32>
    %616 = vector.extract_strided_slice %614 {offsets = [0, 64], sizes = [2, 64], strides = [1, 1]} : vector<2x192xf32> to vector<2x64xf32>
    %617 = vector.extract_strided_slice %614 {offsets = [0, 128], sizes = [2, 64], strides = [1, 1]} : vector<2x192xf32> to vector<2x64xf32>
    %618 = vector.extract_strided_slice %608 {offsets = [0, 192], sizes = [2, 64], strides = [1, 1]} : vector<2x256xf32> to vector<2x64xf32>
    %619 = math.tanh %618 : vector<2x64xf32>
    %620 = arith.mulf %616, %603 : vector<2x64xf32>
    %621 = arith.mulf %615, %619 : vector<2x64xf32>
    %622 = arith.addf %620, %621 : vector<2x64xf32>
    %623 = math.tanh %622 : vector<2x64xf32>
    %624 = arith.mulf %617, %623 : vector<2x64xf32>
    %625 = vector.extract_strided_slice %489 {offsets = [14, 0], sizes = [2, 256], strides = [1, 1]} : vector<16x256xf32> to vector<2x256xf32>
    %cst_98 = arith.constant dense<0.000000e+00> : vector<2x256xf32>
    %626 = tpu.matmul %624, %485, %cst_98 {dimension_numbers = #tpu.dot_dimension_numbers<[1], [0], [0], [1], [0, 0, 1, 1], [], []>} : vector<2x64xf32>, vector<64x256xf32>, vector<2x256xf32> -> vector<2x256xf32>
    %627 = arith.addf %625, %626 : vector<2x256xf32>
    %628 = vector.extract_strided_slice %627 {offsets = [0, 0], sizes = [2, 192], strides = [1, 1]} : vector<2x256xf32> to vector<2x192xf32>
    %629 = arith.negf %628 : vector<2x192xf32>
    %630 = math.exp %629 : vector<2x192xf32>
    %cst_99 = arith.constant 1.000000e+00 : f32
    %631 = vector.broadcast %cst_99 : f32 to vector<2x192xf32>
    %632 = arith.addf %631, %630 : vector<2x192xf32>
    %633 = arith.divf %631, %632 : vector<2x192xf32>
    %634 = vector.extract_strided_slice %633 {offsets = [0, 0], sizes = [2, 64], strides = [1, 1]} : vector<2x192xf32> to vector<2x64xf32>
    %635 = vector.extract_strided_slice %633 {offsets = [0, 64], sizes = [2, 64], strides = [1, 1]} : vector<2x192xf32> to vector<2x64xf32>
    %636 = vector.extract_strided_slice %633 {offsets = [0, 128], sizes = [2, 64], strides = [1, 1]} : vector<2x192xf32> to vector<2x64xf32>
    %637 = vector.extract_strided_slice %627 {offsets = [0, 192], sizes = [2, 64], strides = [1, 1]} : vector<2x256xf32> to vector<2x64xf32>
    %638 = math.tanh %637 : vector<2x64xf32>
    %639 = arith.mulf %635, %622 : vector<2x64xf32>
    %640 = arith.mulf %634, %638 : vector<2x64xf32>
    %641 = arith.addf %639, %640 : vector<2x64xf32>
    %642 = math.tanh %641 : vector<2x64xf32>
    %643 = arith.mulf %636, %642 : vector<2x64xf32>
    %c0_100 = arith.constant 0 : index
    %c0_101 = arith.constant 0 : index
    %644 = vector.load %arg13[%c0_100, %c0_101] : memref<64x5xf32, #tpu.memory_space<vmem>>, vector<64x5xf32>
    %cst_102 = arith.constant dense<0.000000e+00> : vector<2x5xf32>
    %645 = tpu.matmul %643, %644, %cst_102 {dimension_numbers = #tpu.dot_dimension_numbers<[1], [0], [0], [1], [0, 0, 1, 1], [], []>} : vector<2x64xf32>, vector<64x5xf32>, vector<2x5xf32> -> vector<2x5xf32>
    %c0_103 = arith.constant 0 : index
    %c0_104 = arith.constant 0 : index
    %646 = vector.load %arg14[%c0_103, %c0_104] : memref<1x5xf32, #tpu.memory_space<vmem>>, vector<1x5xf32>
    %647 = vector.broadcast %646 : vector<1x5xf32> to vector<2x5xf32>
    %648 = arith.addf %645, %647 : vector<2x5xf32>
    %649 = math.tanh %648 : vector<2x5xf32>
    %c0_105 = arith.constant 0 : index
    %c0_106 = arith.constant 0 : index
    %650 = vector.load %arg15[%c0_105, %c0_106] : memref<2x5xf32, #tpu.memory_space<vmem>>, vector<2x5xf32>
    tpu.vector_store %arg15[%c0_105, %c0_106], %649 {strides = array<i32>} : memref<2x5xf32, #tpu.memory_space<vmem>>, vector<2x5xf32>,
    return
  }
}

</mosaic_0001>

<bundles_post_ra>
// kernel: basic_lstm_net_forward.1
= control target key start
LH: loop header
LB: loop body
LE: loop exit
PB: predicated region body
PF: predicated region fallthrough
CT: control target
= control target key end

     0   :  { %20 = vsyncpa [#allocation3], 0  ;;  %s6870_s0 = inlined_call_operand.vmem [shape: f32[16,9], index: 0, kind: input, shape index: {}]   ;;  %s6871_s1 = inlined_call_operand.hbm [shape: f32[9,256], index: 1, kind: input, shape index: {}]   ;;  %s6872_s2 = inlined_call_operand.hbm [shape: f32[64,256], index: 2, kind: input, shape index: {}]   ;;  %s6873_s3 = inlined_call_operand.vmem [shape: f32[1,256], index: 3, kind: input, shape index: {}]   ;;  %s6874_s4 = inlined_call_operand.vmem [shape: f32[64,256], index: 4, kind: input, shape index: {}]   ;;  %s6875_s5 = inlined_call_operand.hbm [shape: f32[64,256], index: 5, kind: input, shape index: {}]   ;;  %s6876_s6 = inlined_call_operand.vmem [shape: f32[1,256], index: 6, kind: input, shape index: {}]   ;;  %s6877_s7 = inlined_call_operand.hbm [shape: f32[64,256], index: 7, kind: input, shape index: {}]   ;;  %s6878_s8 = inlined_call_operand.hbm [shape: f32[64,256], index: 8, kind: input, shape index: {}]   ;;  %s6879_s9 = inlined_call_operand.vmem [shape: f32[1,256], index: 9, kind: input, shape index: {}]   ;;  %s6880_s10 = inlined_call_operand.hbm [shape: f32[64,256], index: 10, kind: input, shape index: {}]   ;;  %s6881_s11 = inlined_call_operand.hbm [shape: f32[64,256], index: 11, kind: input, shape index: {}]   ;;  %s6882_s12 = inlined_call_operand.vmem [shape: f32[1,256], index: 12, kind: input, shape index: {}]   ;;  %s6883_s13 = inlined_call_operand.vmem [shape: f32[64,5], index: 13, kind: input, shape index: {}]   ;;  %s6884_s14 = inlined_call_operand.hbm [shape: f32[1,5], index: 14, kind: input, shape index: {}]   ;;  %s6885_s15 = inlined_call_operand.hbm [shape: f32[2,5], index: 15, kind: output, shape index: {}]  }
   0x1   :  { %21 = vsyncpa [#allocation6], 0 }
   0x2   :  { %22 = vsyncpa [#allocation9], 0 }
   0x3   :  { %23 = vsyncpa [#allocation12], 0 }
   0x4   :  { %24 = vsyncpa [#allocation15], 0 }
   0x5   :  { %25 = vsyncpa [#allocation4], 0  ;;  %s5750_s18 = smov [#allocation5]   ;;  %s5751_s20 = smov [#allocation8]  }
   0x6   :  { %s45_s19 = sshll.u32 %s5750_s18, 4  ;;  %s75_s21 = sshll.u32 %s5751_s20, 4  ;;  %s46_s19 = int_to_ptr.vmem [resolvable:$true] %s45_s19  ;;  %s5846_s21 = int_to_ptr.vmem [resolvable:$true] %s75_s21 }
   0x7   :  { %s5540_s24 = scalar_lea.hbm %s6872_s2, 2048 }
   0x8   :  { %p5541_p0 = scmp.ne.s32.totalorder %s6872_s2, %s5540_s24  ;;  %p5544_p1 = scmp.lt.u32.totalorder %s5540_s24, %s6872_s2 }
   0xa   :  { %p5546_p2 = pnand %p5544_p1, %p5541_p0 }
   0xc   :  { %5549 = shalt.err (!%p5546_p2)
}
   0xd   :  { %s5550_s29 = scalar_lea.vmem %s46_s19, 2048  ;;  %p5555_p4 = scmp.lt.s32.totalorder %s46_s19, %s46_s19 }
   0xe   :  { %p5551_p3 = scmp.ne.s32.totalorder %s46_s19, %s5550_s29  ;;  %p5556_p5 = scmp.lt.s32.totalorder %s5550_s29, %s5550_s29 }
  0x10   :  { %p5557_p6 = por %p5556_p5, %p5555_p4 }
  0x12   :  { %p5558_p7 = pnand %p5557_p6, %p5551_p3 }
  0x14   :  { %5561 = shalt.err (!%p5558_p7)
}
  0x15   :  { %s5752_s30 = smov 256   ;;  %s5753_s16 = smov 16  }
  0x16   :  { %51 = dma.hbm_to_vmem [thread:$0]  %s6872_s2, 2048, %s46_s19, [#allocation6], %s5752_s30, %s5752_s30, %s5753_s16  }
  0x17   :  { %s5562_s23 = scalar_lea.hbm %s6877_s7, 2048 }
  0x18   :  { %p5563_p8 = scmp.ne.s32.totalorder %s6877_s7, %s5562_s23  ;;  %p5566_p9 = scmp.lt.u32.totalorder %s5562_s23, %s6877_s7 }
  0x1a   :  { %p5568_p10 = pnand %p5566_p9, %p5563_p8 }
  0x1c   :  { %5571 = shalt.err (!%p5568_p10)
}
  0x1d   :  { %s5572_s28 = scalar_lea.vmem %s5846_s21, 2048  ;;  %p5577_p12 = scmp.lt.s32.totalorder %s5846_s21, %s5846_s21 }
  0x1e   :  { %p5573_p11 = scmp.ne.s32.totalorder %s5846_s21, %s5572_s28  ;;  %p5578_p13 = scmp.lt.s32.totalorder %s5572_s28, %s5572_s28 }
  0x20   :  { %p5579_p0 = por %p5578_p13, %p5577_p12 }
  0x22   :  { %p5580_p1 = pnand %p5579_p0, %p5573_p11 }
  0x24   :  { %5583 = shalt.err (!%p5580_p1)
}
  0x25   :  { %81 = dma.hbm_to_vmem [thread:$0]  %s6877_s7, 2048, %s5846_s21, [#allocation9], %s5752_s30, %s5752_s30, %s5753_s16  }
  0x26   :  { %s5754_s29 = smov [#allocation11]   ;;  %s5755_s18 = smov [#allocation2]  }
  0x27   :  { %s101_s17 = sshll.u32 %s5754_s29, 4  ;;  %s33_s20 = sshll.u32 %s5755_s18, 4  ;;  %s102_s17 = int_to_ptr.vmem [resolvable:$true] %s101_s17  ;;  %s5883_s20 = int_to_ptr.vmem [resolvable:$true] %s33_s20 }
  0x28   :  { %s5584_s24 = scalar_lea.hbm %s6880_s10, 2048 }
  0x29   :  { %p5585_p2 = scmp.ne.s32.totalorder %s6880_s10, %s5584_s24  ;;  %p5588_p3 = scmp.lt.u32.totalorder %s5584_s24, %s6880_s10 }
  0x2b   :  { %p5590_p4 = pnand %p5588_p3, %p5585_p2 }
  0x2d   :  { %5593 = shalt.err (!%p5590_p4)
}
  0x2e   :  { %s5594_s7 = scalar_lea.vmem %s102_s17, 2048  ;;  %p5599_p6 = scmp.lt.s32.totalorder %s102_s17, %s102_s17 }
  0x2f   :  { %p5595_p5 = scmp.ne.s32.totalorder %s102_s17, %s5594_s7  ;;  %p5600_p7 = scmp.lt.s32.totalorder %s5594_s7, %s5594_s7 }
  0x31   :  { %p5601_p8 = por %p5600_p7, %p5599_p6 }
  0x33   :  { %p5602_p9 = pnand %p5601_p8, %p5595_p5 }
  0x35   :  { %5605 = shalt.err (!%p5602_p9)
}
  0x36   :  { %107 = dma.hbm_to_vmem [thread:$0]  %s6880_s10, 2048, %s102_s17, [#allocation12], %s5752_s30, %s5752_s30, %s5753_s16  }
  0x37   :  { %s5606_s18 = scalar_lea.hbm %s6871_s1, 512 }
  0x38   :  { %p5607_p10 = scmp.ne.s32.totalorder %s6871_s1, %s5606_s18  ;;  %p5610_p11 = scmp.lt.u32.totalorder %s5606_s18, %s6871_s1 }
  0x3a   :  { %p5612_p12 = pnand %p5610_p11, %p5607_p10 }
  0x3c   :  { %5615 = shalt.err (!%p5612_p12)
}
  0x3d   :  { %s5616_s26 = scalar_lea.vmem %s5883_s20, 512  ;;  %p5621_p0 = scmp.lt.s32.totalorder %s5883_s20, %s5883_s20 }
  0x3e   :  { %p5617_p13 = scmp.ne.s32.totalorder %s5883_s20, %s5616_s26  ;;  %p5622_p1 = scmp.lt.s32.totalorder %s5616_s26, %s5616_s26 }
  0x40   :  { %p5623_p2 = por %p5622_p1, %p5621_p0 }
  0x42   :  { %p5624_p3 = pnand %p5623_p2, %p5617_p13 }
  0x44   :  { %5627 = shalt.err (!%p5624_p3)
}
  0x45   :  { %39 = dma.hbm_to_vmem [thread:$0]  %s6871_s1, 512, %s5883_s20, [#allocation3], %s5752_s30, %s5752_s30, %s5753_s16  }
  0x46   :  { %s5756_s27 = smov [#allocation7]   ;;  %s5757_s7 = smov [#allocation10]  }
  0x47   :  { %s61_s28 = sshll.u32 %s5756_s27, 4  ;;  %s87_s21 = sshll.u32 %s5757_s7, 4  ;;  %s62_s28 = int_to_ptr.vmem [resolvable:$true] %s61_s28  ;;  %s5920_s21 = int_to_ptr.vmem [resolvable:$true] %s87_s21 }
  0x48   :  { %s5628_s29 = scalar_lea.hbm %s6875_s5, 2048 }
  0x49   :  { %p5629_p4 = scmp.ne.s32.totalorder %s6875_s5, %s5628_s29  ;;  %p5632_p5 = scmp.lt.u32.totalorder %s5628_s29, %s6875_s5 }
  0x4b   :  { %p5634_p6 = pnand %p5632_p5, %p5629_p4 }
  0x4d   :  { %5637 = shalt.err (!%p5634_p6)
}
  0x4e   :  { %s5638_s1 = scalar_lea.vmem %s62_s28, 2048  ;;  %p5643_p8 = scmp.lt.s32.totalorder %s62_s28, %s62_s28 }
  0x4f   :  { %p5639_p7 = scmp.ne.s32.totalorder %s62_s28, %s5638_s1  ;;  %p5644_p9 = scmp.lt.s32.totalorder %s5638_s1, %s5638_s1 }
  0x51   :  { %p5645_p10 = por %p5644_p9, %p5643_p8 }
  0x53   :  { %p5646_p11 = pnand %p5645_p10, %p5639_p7 }
  0x55   :  { %5649 = shalt.err (!%p5646_p11)
}
  0x56   :  { %67 = dma.hbm_to_vmem [thread:$0]  %s6875_s5, 2048, %s62_s28, [#allocation6], %s5752_s30, %s5752_s30, %s5753_s16  }
  0x57   :  { %s5650_s17 = scalar_lea.hbm %s6878_s8, 2048 }
  0x58   :  { %p5651_p12 = scmp.ne.s32.totalorder %s6878_s8, %s5650_s17  ;;  %p5654_p13 = scmp.lt.u32.totalorder %s5650_s17, %s6878_s8 }
  0x5a   :  { %p5656_p0 = pnand %p5654_p13, %p5651_p12 }
  0x5c   :  { %5659 = shalt.err (!%p5656_p0)
}
  0x5d   :  { %s5660_s29 = scalar_lea.vmem %s5920_s21, 2048  ;;  %p5665_p2 = scmp.lt.s32.totalorder %s5920_s21, %s5920_s21 }
  0x5e   :  { %p5661_p1 = scmp.ne.s32.totalorder %s5920_s21, %s5660_s29  ;;  %p5666_p3 = scmp.lt.s32.totalorder %s5660_s29, %s5660_s29 }
  0x60   :  { %p5667_p4 = por %p5666_p3, %p5665_p2 }
  0x62   :  { %p5668_p5 = pnand %p5667_p4, %p5661_p1 }
  0x64   :  { %5671 = shalt.err (!%p5668_p5)
}
  0x65   :  { %93 = dma.hbm_to_vmem [thread:$0]  %s6878_s8, 2048, %s5920_s21, [#allocation9], %s5752_s30, %s5752_s30, %s5753_s16  }
  0x66   :  { %s5758_s18 = smov [#allocation13]   ;;  %s5759_s23 = smov [#allocation14]  }
  0x67   :  { %s113_s22 = sshll.u32 %s5758_s18, 4  ;;  %s130_s24 = sshll.u32 %s5759_s23, 4  ;;  %s114_s22 = int_to_ptr.vmem [resolvable:$true] %s113_s22  ;;  %s131_s24 = int_to_ptr.vmem [resolvable:$true] %s130_s24 }
  0x68   :  { %s5672_s25 = scalar_lea.hbm %s6881_s11, 2048 }
  0x69   :  { %p5673_p6 = scmp.ne.s32.totalorder %s6881_s11, %s5672_s25  ;;  %p5676_p7 = scmp.lt.u32.totalorder %s5672_s25, %s6881_s11 }
  0x6b   :  { %p5678_p8 = pnand %p5676_p7, %p5673_p6 }
  0x6d   :  { %5681 = shalt.err (!%p5678_p8)
}
  0x6e   :  { %s5682_s8 = scalar_lea.vmem %s114_s22, 2048  ;;  %p5687_p10 = scmp.lt.s32.totalorder %s114_s22, %s114_s22 }
  0x6f   :  { %p5683_p9 = scmp.ne.s32.totalorder %s114_s22, %s5682_s8  ;;  %p5688_p11 = scmp.lt.s32.totalorder %s5682_s8, %s5682_s8 }
  0x71   :  { %p5689_p12 = por %p5688_p11, %p5687_p10 }
  0x73   :  { %p5690_p13 = pnand %p5689_p12, %p5683_p9 }
  0x75   :  { %5693 = shalt.err (!%p5690_p13)
}
  0x76   :  { %119 = dma.hbm_to_vmem [thread:$0]  %s6881_s11, 2048, %s114_s22, [#allocation12], %s5752_s30, %s5752_s30, %s5753_s16  }
  0x77   :  { %s5694_s29 = scalar_lea.hbm %s6884_s14, 16 }
  0x78   :  { %p5695_p0 = scmp.ne.s32.totalorder %s6884_s14, %s5694_s29  ;;  %p5698_p1 = scmp.lt.u32.totalorder %s5694_s29, %s6884_s14 }
  0x7a   :  { %p5700_p2 = pnand %p5698_p1, %p5695_p0 }
  0x7c   :  { %5703 = shalt.err (!%p5700_p2)
}
  0x7d   :  { %s5704_s1 = scalar_lea.vmem %s131_s24, 16  ;;  %s5708_s20 = scalar_lea.vmem %s131_s24, 32 }
  0x7e   :  { %p5705_p3 = scmp.ne.s32.totalorder %s131_s24, %s5704_s1  ;;  %p5709_p4 = scmp.lt.s32.totalorder %s131_s24, %s131_s24 }
  0x7f   :  { %p5710_p5 = scmp.lt.s32.totalorder %s5708_s20, %s5704_s1 }
  0x81   :  { %p5711_p6 = por %p5710_p5, %p5709_p4 }
  0x83   :  { %p5712_p7 = pnand %p5711_p6, %p5705_p3 }
  0x85   :  { %5715 = shalt.err (!%p5712_p7)
}
  0x86   :  { %133 = dma.hbm_to_vmem [thread:$0]  %s6884_s14, 16, %s131_s24, [#allocation15]  }
  0x87   :  { %5738 = dma.done.wait [#allocation3], 512  }
  0x88   :  { %5739 = vsyncadd [#allocation3], 4294966784 }
  0x89   :  { %5740 = dma.done.wait [#allocation6], 4096  }
  0x8a   :  { %5741 = vsyncadd [#allocation6], 4294963200 }
  0x8b   :  { %5742 = dma.done.wait [#allocation9], 4096  }
  0x8c   :  { %5743 = vsyncadd [#allocation9], 4294963200 }
  0x8d   :  { %5744 = dma.done.wait [#allocation12], 4096  }
  0x8e   :  { %5745 = vsyncadd [#allocation12], 4294963200 }
  0x8f   :  { %5746 = dma.done.wait [#allocation15], 16  }
  0x90   :  { %5747 = vsyncadd [#allocation15], 4294967280  ;;  %v5760_v0 = vmov 0.0   ;;  %vm199_vm0 = vcmask 1040384   ;;  %vm5761_vm1 = vmmov 1   ;;  %v165_v2 = vld [vmem:[#allocation5 + $0x8] sm:$0xff]  ;;  %v182_v33 = vlaneseq }
  0x91   :  { %270 = vmatprep.mubr.f32.mxu0 %v5760_v0  ;;  %351 = vmatprep.mubr.f32.mxu1 %v5760_v0  ;;  %vm5986_vm2 = vmpackc.low %vm199_vm0, %vm5761_vm1  ;;  %v167_v3 = vld [vmem:[#allocation5 + $0x18] sm:$0xff]  ;;  %v164_v4 = vld [vmem:[#allocation5] sm:$0xff]  ;;  %vm192_vm3 = vcmask 72704   ;;  %s5762_s25 = smov 64   ;;  %vm283_vm4 = vcmask 523264   ;;  %vm1194_vm5 = vcmask 1041408  }
  0x92   :  { %v5990_v5 = vpack.c.bf16 %v167_v3, %v165_v2  ;;  %v166_v6 = vld [vmem:[#allocation5 + $0x10] sm:$0xff]  ;;  %v169_v7 = vld [vmem:[#allocation5 + $0x28] sm:$0xff]  ;;  %v171_v8 = vld [vmem:[#allocation5 + $0x38] sm:$0xff]  ;;  %v183_v34 = vshrl.u32 %v182_v33, 7  ;;  %vm1196_vm6 = vcmask 1043456   ;;  %vm1198_vm7 = vcmask 1045504  }
  0x93   :  { %v5992_v9 = vpack.c.bf16 %v166_v6, %v164_v4  ;;  %v5994_v10 = vpack.c.bf16 %v171_v8, %v169_v7  ;;  %v168_v11 = vld [vmem:[#allocation5 + $0x20] sm:$0xff]  ;;  %v170_v12 = vld [vmem:[#allocation5 + $0x30] sm:$0xff]  ;;  %v173_v13 = vld [vmem:[#allocation5 + $0x48] sm:$0xff]  ;;  %vm5764_vm8 = vmmov 0   ;;  %vm4407_vm9 = vcmask 33792  }
  0x94   :  { %4567 = vmatprep.subr.bf16.mxu1 %v5990_v5  ;;  %v175_v14 = vld [vmem:[#allocation5 + $0x58] sm:$0xff]  ;;  %v161_v15 = vld [vmem:[#allocation2 + $0x8] sm:$0xff]  ;;  %v5998_v17 = vpack.c.bf16 %v170_v12, %v168_v11  ;;  %v160_v19 = vld [vmem:[#allocation2] sm:$0xff]  ;;  %v6043_v35 = vsub.s32 1, %v183_v34  ;;  %v6056_v45 = vsub.s32 0, %v183_v34 }
  0x95   :  { %v163_v16 = vld [vmem:[#allocation2 + $0x18] sm:$0x1]  ;;  %4569 = vmatpush1.bf16.msra.mxu1 %v5992_v9  ;;  %v6001_v20 = vpack.c.bf16 %v175_v14, %v173_v13  ;;  %v172_v21 = vld [vmem:[#allocation5 + $0x40] sm:$0xff]  ;;  %v174_v22 = vld [vmem:[#allocation5 + $0x50] sm:$0xff] }
  0x96   :  { %v4560_v18 = vpack.c.bf16 %v163_v16, %v161_v15  ;;  %4571 = vmatprep.subr.bf16.mxu1 %v5994_v10  ;;  %v162_v23 = vld [vmem:[#allocation2 + $0x10] sm:$0x1]  ;;  %v177_v25 = vld [vmem:[#allocation5 + $0x68] sm:$0xff]  ;;  %v179_v26 = vld [vmem:[#allocation5 + $0x78] sm:$0xff]  ;;  %v6006_v27 = vpack.c.bf16 %v174_v22, %v172_v21 }
  0x97   :  { %v4563_v24 = vpack.c.bf16 %v162_v23, %v160_v19  ;;  %v158_v28 = vld [vmem:[%s6870_s0] sm:$0xff]  ;;  %v6014_v29 = vpack.c.bf16 %v179_v26, %v177_v25  ;;  %v178_v31 = vld [vmem:[#allocation5 + $0x70] sm:$0xff]  ;;  %v159_v55 = vld [vmem:[%s6870_s0 + $0x8] sm:$0xff] }
  0x98   :  { %4562 = vmatprep.subr.msk.bf16.mxu0 %vm5986_vm2, %v4560_v18  ;;  %v176_v30 = vld [vmem:[#allocation5 + $0x60] sm:$0xff] }
  0x99   :  { %4573 = vmatpush1.bf16.msra.mxu1 %v5998_v17  ;;  %4565 = vmatpush1.bf16.msk.msra.mxu0 %vm5986_vm2, %v4563_v24  ;;  %v6019_v32 = vpack.c.bf16 %v178_v31, %v176_v30  ;;  %v180_v36 = vld [vmem:[%s6873_s3] sm:$0x3] }
  0x9a   :  { %4575 = vmatprep.subr.bf16.mxu1 %v6001_v20  ;;  %4583 = vmatprep.subr.bf16.mxu0 %v5990_v5  ;;  %v6049_v39 = vrot.slane %v180_v36, %v6043_v35  ;;  %v6059_v46 = vrot.slane %v180_v36, %v6056_v45 }
  0x9c   :  { %4430 = vmatmul.mubr.msk.f32.vlgmr.msra.gmra.mrb[0].mxu0 %vm192_vm3, %v158_v28 }
  0x9d   :  { %4577 = vmatpush1.bf16.msra.mxu1 %v6006_v27  ;;  %4585 = vmatpush1.bf16.msra.mxu0 %v5992_v9 }
  0x9e   :  { %4579 = vmatprep.subr.bf16.mxu1 %v6014_v29  ;;  %4587 = vmatprep.subr.bf16.mxu0 %v5994_v10 }
  0x9f   :  { %276 = vmatprep.mubr.f32.mxu0 %v5760_v0 }
  0xa0   :  { %4431 = vmatmul.mubr.msk.f32.gmra.mrb[2].mxu0 %vm192_vm3, %v159_v55 }
  0xa1   :  { %4581 = vmatpush1.bf16.msra.mxu1 %v6019_v32  ;;  %4589 = vmatpush1.bf16.msra.mxu0 %v5998_v17 }
  0xa2   :  { %4591 = vmatprep.subr.bf16.mxu0 %v6001_v20  ;;  %4599 = vmatprep.subr.bf16.mxu1 %v5990_v5 }
  0xa3   :  { %457 = vmatprep.mubr.f32.mxu0 %v5760_v0 }
  0xa4   :  { %352 = vmatmul.mubr.f32.vlgmr.msra.gmra.mrb[0].mxu1 %v5760_v0 }
  0xa5   :  { %4593 = vmatpush1.bf16.msra.mxu0 %v6006_v27  ;;  %4601 = vmatpush1.bf16.msra.mxu1 %v5992_v9 }
  0xa6   :  { %4595 = vmatprep.subr.bf16.mxu0 %v6014_v29  ;;  %4603 = vmatprep.subr.bf16.mxu1 %v5994_v10 }
  0xa7   :  { %573 = vmatprep.mubr.f32.mxu1 %v5760_v0 }
  0xa9   :  { %4597 = vmatpush1.bf16.msra.mxu0 %v6019_v32  ;;  %4605 = vmatpush1.bf16.msra.mxu1 %v5998_v17 }
  0xaa   :  { %4607 = vmatprep.subr.bf16.mxu1 %v6001_v20  ;;  %4615 = vmatprep.subr.bf16.mxu0 %v5990_v5 }
  0xad   :  { %4609 = vmatpush1.bf16.msra.mxu1 %v6006_v27 }
  0xae   :  { %4611 = vmatprep.subr.bf16.mxu1 %v6014_v29 }
  0xb1   :  { %4613 = vmatpush1.bf16.msra.mxu1 %v6019_v32 }
  0xb2   :  { %4631 = vmatprep.subr.bf16.mxu1 %v5990_v5 }
 0x16f   :  { %v272_v37 = vpop.f32.mrb[0].mxu0 }
 0x170   :  { %v274_v38 = vpop.f32.mrb[1].mxu0  ;;  %v6062_v47 = vadd.f32 %v272_v37, %v6059_v46 }
 0x171   :  { %v6052_v40 = vadd.f32 %v274_v38, %v6049_v39 }
 0x173   :  { %v6072_v61 = vpop.f32.mrb[2].mxu0 }
 0x174   :  { %v6074_v62 = vpop.f32.mrb[3].mxu0 }
 0x177   :  { %v353_v41 = vpop.f32.mrb[0].mxu1 }
 0x178   :  { %v355_v42 = vpop.f32.mrb[1].mxu1  ;;  %v358_v48 = vadd.f32 %v353_v41, %v6062_v47 }
 0x179   :  { %v359_v43 = vadd.f32 %v355_v42, %v6052_v40 }
 0x17a   :  { %v4432_v49 = vmul.f32 -1.442695, %v358_v48 }
 0x17b   :  { %5154 = vtanh.f32 %v359_v43  ;;  %v4433_v60 = vmul.f32 -1.442695, %v359_v43 }
 0x17c   :  { %5156 = vpow2.f32 %v4432_v49 }
 0x185   :  { %v5155_v44 = vpop.eup %5154 }
 0x186   :  { %375 = vrot.lane.b32.xlu0 %v5155_v44, %s5762_s25  ;;  %v5157_v50 = vpop.eup %5156 }
 0x187   :  { %v366_v51 = vadd.f32 1.0, %v5157_v50 }
 0x189   :  { %5158 = vrcp.f32 %v366_v51 }
 0x193   :  { %v5159_v52 = vpop.eup %5158 }
 0x194   :  { %v373_v56 = vmul.f32 0.0, %v5159_v52 }
 0x1f8   :  { %v376_v53 = vpop.permute.xlu0 %375 }
 0x1f9   :  { %v378_v54 = vmul.f32 %v5159_v52, %v376_v53 }
 0x1fb   :  { %380 = vrot.lane.b32.xlu0 %v378_v54, %s5762_s25 }
 0x26d   :  { %v381_v57 = vpop.permute.xlu0 %380 }
 0x26e   :  { %v383_v58 = vadd.f32 %v381_v57, %v373_v56 }
 0x270   :  { %5160 = vtanh.f32 %v383_v58  ;;  %v486_v23 = vrot.slane %v383_v58, 6 }
 0x271   :  { %5162 = vpow2.f32 %v4433_v60 }
 0x27a   :  { %v5161_v59 = vpop.eup %5160 }
 0x27b   :  { %386 = vrot.lane.b32.xlu1 %v5161_v59, %s5762_s25  ;;  %v5163_v63 = vpop.eup %5162 }
 0x27c   :  { %v367_v1 = vadd.f32 1.0, %v5163_v63 }
 0x27e   :  { %5164 = vrcp.f32 %v367_v1 }
 0x288   :  { %v5165_v2 = vpop.eup %5164 }
 0x2ed   :  { %v387_v3 = vpop.permute.xlu1 %386 }
 0x2ee   :  { %v6076_v4 = vmul.f32 %v5165_v2, %v387_v3 }
 0x2f0   :  { %4434 = vmatmul.mubr.msk.f32.vlgmr.msra.gmra.mrb[4].mxu0 %vm283_vm4, %v6076_v4 }
 0x2f1   :  { %4617 = vmatpush1.bf16.msra.mxu0 %v5992_v9  ;;  %689 = vmatprep.mubr.f32.mxu0 %v5760_v0 }
 0x2f2   :  { %4619 = vmatprep.subr.bf16.mxu0 %v5994_v10 }
 0x2f5   :  { %4621 = vmatpush1.bf16.msra.mxu0 %v5998_v17 }
 0x2f6   :  { %4623 = vmatprep.subr.bf16.mxu0 %v6001_v20 }
 0x2f9   :  { %4625 = vmatpush1.bf16.msra.mxu0 %v6006_v27 }
 0x2fa   :  { %4627 = vmatprep.subr.bf16.mxu0 %v6014_v29 }
 0x2fd   :  { %4629 = vmatpush1.bf16.msra.mxu0 %v6019_v32 }
 0x2fe   :  { %4647 = vmatprep.subr.bf16.mxu0 %v5990_v5 }
 0x3c3   :  { %v459_v6 = vpop.f32.mrb[4].mxu0 }
 0x3c4   :  { %v461_v7 = vpop.f32.mrb[5].mxu0  ;;  %v466_v13 = vrot.slane %v459_v6, 6 }
 0x3c5   :  { %v467_v8 = vrot.slane %v461_v7, 6 }
 0x3c6   :  { %v470_v14 = vadd.f32 %v466_v13, %v6062_v47 }
 0x3c7   :  { %v471_v11 = vadd.f32 %v467_v8, %v6052_v40 }
 0x3c8   :  { %v4435_v15 = vmul.f32 -1.442695, %v470_v14 }
 0x3c9   :  { %5166 = vtanh.f32 %v471_v11  ;;  %v4436_v30 = vmul.f32 -1.442695, %v471_v11 }
 0x3ca   :  { %5168 = vpow2.f32 %v4435_v15 }
 0x3d3   :  { %v5167_v12 = vpop.eup %5166 }
 0x3d4   :  { %490 = vrot.lane.b32.xlu1 %v5167_v12, %s5762_s25  ;;  %v5169_v16 = vpop.eup %5168 }
 0x3d5   :  { %v478_v18 = vadd.f32 1.0, %v5169_v16 }
 0x3d7   :  { %5170 = vrcp.f32 %v478_v18 }
 0x3e1   :  { %v5171_v19 = vpop.eup %5170 }
 0x3e2   :  { %v488_v24 = vmul.f32 %v5171_v19, %v486_v23 }
 0x446   :  { %v491_v21 = vpop.permute.xlu1 %490 }
 0x447   :  { %v493_v22 = vmul.f32 %v5171_v19, %v491_v21 }
 0x449   :  { %495 = vrot.lane.b32.xlu0 %v493_v22, %s5762_s25 }
 0x4bb   :  { %v496_v25 = vpop.permute.xlu0 %495 }
 0x4bc   :  { %v498_v26 = vadd.f32 %v496_v25, %v488_v24 }
 0x4be   :  { %5172 = vtanh.f32 %v498_v26  ;;  %v602_v57 = vrot.slane %v498_v26, 6 }
 0x4bf   :  { %5174 = vpow2.f32 %v4436_v30 }
 0x4c8   :  { %v5173_v28 = vpop.eup %5172 }
 0x4c9   :  { %501 = vrot.lane.b32.xlu1 %v5173_v28, %s5762_s25  ;;  %v5175_v31 = vpop.eup %5174 }
 0x4ca   :  { %v479_v33 = vadd.f32 1.0, %v5175_v31 }
 0x4cc   :  { %5176 = vrcp.f32 %v479_v33 }
 0x4d6   :  { %v5177_v34 = vpop.eup %5176 }
 0x53b   :  { %v502_v36 = vpop.permute.xlu1 %501 }
 0x53c   :  { %v504_v37 = vmul.f32 %v5177_v34, %v502_v36 }
 0x53e   :  { %v506_v38 = vrot.slane %v504_v37, 2  ;;  %v1195_v11 = vsel %vm1194_vm5, %v6076_v4, %v504_v37 }
 0x540   :  { %4437 = vmatmul.mubr.msk.f32.vlgmr.msra.gmra.mrb[2].mxu1 %vm283_vm4, %v506_v38 }
 0x541   :  { %4633 = vmatpush1.bf16.msra.mxu1 %v5992_v9  ;;  %805 = vmatprep.mubr.f32.mxu1 %v5760_v0 }
 0x542   :  { %4635 = vmatprep.subr.bf16.mxu1 %v5994_v10 }
 0x545   :  { %4637 = vmatpush1.bf16.msra.mxu1 %v5998_v17 }
 0x546   :  { %4639 = vmatprep.subr.bf16.mxu1 %v6001_v20 }
 0x549   :  { %4641 = vmatpush1.bf16.msra.mxu1 %v6006_v27 }
 0x54a   :  { %4643 = vmatprep.subr.bf16.mxu1 %v6014_v29 }
 0x54d   :  { %4645 = vmatpush1.bf16.msra.mxu1 %v6019_v32 }
 0x54e   :  { %4663 = vmatprep.subr.bf16.mxu1 %v5990_v5 }
 0x613   :  { %v575_v41 = vpop.f32.mrb[2].mxu1 }
 0x614   :  { %v577_v42 = vpop.f32.mrb[3].mxu1  ;;  %v582_v49 = vrot.slane %v575_v41, 4 }
 0x615   :  { %v583_v43 = vrot.slane %v577_v42, 4 }
 0x616   :  { %v586_v50 = vadd.f32 %v582_v49, %v6062_v47 }
 0x617   :  { %v587_v44 = vadd.f32 %v583_v43, %v6052_v40 }
 0x618   :  { %v4438_v51 = vmul.f32 -1.442695, %v586_v50 }
 0x619   :  { %5178 = vtanh.f32 %v587_v44  ;;  %v4439_v1 = vmul.f32 -1.442695, %v587_v44  ;;  %v6141_v44 = vadd.f32 %v6074_v62, %v6049_v39 }
 0x61a   :  { %5180 = vpow2.f32 %v4438_v51 }
 0x623   :  { %v5179_v48 = vpop.eup %5178 }
 0x624   :  { %606 = vrot.lane.b32.xlu0 %v5179_v48, %s5762_s25  ;;  %v5181_v52 = vpop.eup %5180 }
 0x625   :  { %v594_v53 = vadd.f32 1.0, %v5181_v52  ;;  %v6147_v52 = vadd.f32 %v6072_v61, %v6059_v46 }
 0x627   :  { %5182 = vrcp.f32 %v594_v53 }
 0x631   :  { %v5183_v54 = vpop.eup %5182 }
 0x632   :  { %v604_v58 = vmul.f32 %v5183_v54, %v602_v57 }
 0x696   :  { %v607_v55 = vpop.permute.xlu0 %606 }
 0x697   :  { %v609_v56 = vmul.f32 %v5183_v54, %v607_v55 }
 0x699   :  { %611 = vrot.lane.b32.xlu1 %v609_v56, %s5762_s25 }
 0x70b   :  { %v612_v59 = vpop.permute.xlu1 %611 }
 0x70c   :  { %v614_v60 = vadd.f32 %v612_v59, %v604_v58 }
 0x70e   :  { %5184 = vtanh.f32 %v614_v60  ;;  %v718_v28 = vrot.slane %v614_v60, 6 }
 0x70f   :  { %5186 = vpow2.f32 %v4439_v1 }
 0x718   :  { %v5185_v63 = vpop.eup %5184 }
 0x719   :  { %617 = vrot.lane.b32.xlu0 %v5185_v63, %s5762_s25  ;;  %v5187_v2 = vpop.eup %5186 }
 0x71a   :  { %v595_v3 = vadd.f32 1.0, %v5187_v2 }
 0x71c   :  { %5188 = vrcp.f32 %v595_v3 }
 0x726   :  { %v5189_v6 = vpop.eup %5188 }
 0x78b   :  { %v618_v7 = vpop.permute.xlu0 %617 }
 0x78c   :  { %v620_v8 = vmul.f32 %v5189_v6, %v618_v7 }
 0x78e   :  { %v622_v12 = vrot.slane %v620_v8, 4  ;;  %v1197_v13 = vsel %vm1196_vm6, %v1195_v11, %v620_v8 }
 0x790   :  { %4440 = vmatmul.mubr.msk.f32.vlgmr.msra.gmra.mrb[6].mxu0 %vm283_vm4, %v622_v12 }
 0x791   :  { %4649 = vmatpush1.bf16.msra.mxu0 %v5992_v9  ;;  %914 = vmatprep.mubr.f32.mxu0 %v5760_v0 }
 0x792   :  { %4651 = vmatprep.subr.bf16.mxu0 %v5994_v10 }
 0x795   :  { %4653 = vmatpush1.bf16.msra.mxu0 %v5998_v17 }
 0x796   :  { %4655 = vmatprep.subr.bf16.mxu0 %v6001_v20 }
 0x799   :  { %4657 = vmatpush1.bf16.msra.mxu0 %v6006_v27 }
 0x79a   :  { %4659 = vmatprep.subr.bf16.mxu0 %v6014_v29 }
 0x79d   :  { %4661 = vmatpush1.bf16.msra.mxu0 %v6019_v32 }
 0x79e   :  { %4679 = vmatprep.subr.bf16.mxu0 %v5990_v5 }
 0x863   :  { %v691_v4 = vpop.f32.mrb[6].mxu0 }
 0x864   :  { %v693_v14 = vpop.f32.mrb[7].mxu0  ;;  %v698_v19 = vrot.slane %v691_v4, 2 }
 0x865   :  { %v699_v15 = vrot.slane %v693_v14, 2 }
 0x866   :  { %v702_v21 = vadd.f32 %v698_v19, %v6062_v47 }
 0x867   :  { %v703_v16 = vadd.f32 %v699_v15, %v6052_v40 }
 0x868   :  { %v4441_v22 = vmul.f32 -1.442695, %v702_v21  ;;  %v1204_v21 = vld [vmem:[%s6874_s4 + $0x8] sm:$0xff] }
 0x869   :  { %5190 = vtanh.f32 %v703_v16  ;;  %v4442_v34 = vmul.f32 -1.442695, %v703_v16 }
 0x86a   :  { %5192 = vpow2.f32 %v4441_v22  ;;  %v1206_v22 = vld [vmem:[%s6874_s4 + $0x18] sm:$0xff] }
 0x873   :  { %v5191_v18 = vpop.eup %5190 }
 0x874   :  { %722 = vrot.lane.b32.xlu1 %v5191_v18, %s5762_s25  ;;  %v5193_v23 = vpop.eup %5192 }
 0x875   :  { %v710_v24 = vadd.f32 1.0, %v5193_v23  ;;  %v4694_v23 = vpack.c.bf16 %v1206_v22, %v1204_v21  ;;  %v1224_v21 = vld [vmem:[#allocation7 + $0x28] sm:$0xff] }
 0x877   :  { %5194 = vrcp.f32 %v710_v24 }
 0x881   :  { %v5195_v25 = vpop.eup %5194 }
 0x882   :  { %v720_v30 = vmul.f32 %v5195_v25, %v718_v28  ;;  %v1203_v28 = vld [vmem:[%s6874_s4] sm:$0xff] }
 0x8e6   :  { %v723_v26 = vpop.permute.xlu1 %722 }
 0x8e7   :  { %v725_v5 = vmul.f32 %v5195_v25, %v723_v26 }
 0x8e9   :  { %727 = vrot.lane.b32.xlu0 %v725_v5, %s5762_s25 }
 0x95b   :  { %v728_v40 = vpop.permute.xlu0 %727 }
 0x95c   :  { %v730_v31 = vadd.f32 %v728_v40, %v720_v30  ;;  %v1205_v30 = vld [vmem:[%s6874_s4 + $0x10] sm:$0xff] }
 0x95e   :  { %5196 = vtanh.f32 %v730_v31  ;;  %v828_v58 = vrot.slane %v730_v31, 6 }
 0x95f   :  { %5198 = vpow2.f32 %v4442_v34  ;;  %v1210_v34 = vld [vmem:[%s6874_s4 + $0x38] sm:$0xff] }
 0x968   :  { %v5197_v33 = vpop.eup %5196 }
 0x969   :  { %733 = vrot.lane.b32.xlu1 %v5197_v33, %s5762_s25  ;;  %v5199_v47 = vpop.eup %5198  ;;  %v1208_v33 = vld [vmem:[%s6874_s4 + $0x28] sm:$0xff] }
 0x96a   :  { %v711_v36 = vadd.f32 1.0, %v5199_v47 }
 0x96c   :  { %5200 = vrcp.f32 %v711_v36  ;;  %v4696_v36 = vpack.c.bf16 %v1205_v30, %v1203_v28  ;;  %v1227_v30 = vld [vmem:[#allocation7 + $0x40] sm:$0xff] }
 0x976   :  { %v5201_v37 = vpop.eup %5200 }
 0x9db   :  { %v734_v38 = vpop.permute.xlu1 %733 }
 0x9dc   :  { %v736_v41 = vmul.f32 %v5201_v37, %v734_v38  ;;  %v4698_v38 = vpack.c.bf16 %v1210_v34, %v1208_v33  ;;  %v1232_v34 = vld [vmem:[#allocation7 + $0x68] sm:$0xff] }
 0x9de   :  { %v738_v42 = vrot.slane %v736_v41, 6  ;;  %v6128_v43 = vsel %vm1198_vm7, %v1197_v13, %v736_v41  ;;  %v1207_v41 = vld [vmem:[%s6874_s4 + $0x20] sm:$0xff] }
 0x9e0   :  { %4443 = vmatmul.mubr.msk.f32.vlgmr.msra.gmra.mrb[4].mxu1 %vm283_vm4, %v738_v42  ;;  %v1209_v42 = vld [vmem:[%s6874_s4 + $0x30] sm:$0xff] }
 0x9e1   :  { %4665 = vmatpush1.bf16.msra.mxu1 %v5992_v9  ;;  %1030 = vmatprep.mubr.f32.mxu1 %v5760_v0 }
 0x9e2   :  { %4667 = vmatprep.subr.bf16.mxu1 %v5994_v10 }
 0x9e5   :  { %4669 = vmatpush1.bf16.msra.mxu1 %v5998_v17 }
 0x9e6   :  { %4671 = vmatprep.subr.bf16.mxu1 %v6001_v20 }
 0x9e9   :  { %4673 = vmatpush1.bf16.msra.mxu1 %v6006_v27 }
 0x9ea   :  { %4675 = vmatprep.subr.bf16.mxu1 %v6014_v29 }
 0x9ed   :  { %4677 = vmatpush1.bf16.msra.mxu1 %v6019_v32 }
 0x9ee   :  { %4695 = vmatprep.subr.bf16.mxu1 %v4694_v23  ;;  %v1223_v23 = vld [vmem:[#allocation7 + $0x20] sm:$0xff] }
 0xab3   :  { %v807_v48 = vpop.f32.mrb[4].mxu1 }
 0xab4   :  { %v809_v49 = vpop.f32.mrb[5].mxu1  ;;  %v812_v53 = vadd.f32 %v807_v48, %v6147_v52  ;;  %v1212_v48 = vld [vmem:[%s6874_s4 + $0x48] sm:$0xff] }
 0xab5   :  { %v813_v50 = vadd.f32 %v809_v49, %v6141_v44  ;;  %v1214_v49 = vld [vmem:[%s6874_s4 + $0x58] sm:$0xff] }
 0xab6   :  { %v4444_v54 = vmul.f32 -1.442695, %v812_v53  ;;  %v1211_v53 = vld [vmem:[%s6874_s4 + $0x40] sm:$0xff] }
 0xab7   :  { %5202 = vtanh.f32 %v813_v50  ;;  %v4445_v46 = vmul.f32 -1.442695, %v813_v50  ;;  %v4700_v50 = vpack.c.bf16 %v1209_v42, %v1207_v41  ;;  %v1233_v41 = vld [vmem:[#allocation7 + $0x70] sm:$0xff] }
 0xab8   :  { %5204 = vpow2.f32 %v4444_v54  ;;  %v1213_v54 = vld [vmem:[%s6874_s4 + $0x50] sm:$0xff] }
 0xac1   :  { %v5203_v51 = vpop.eup %5202 }
 0xac2   :  { %832 = vrot.lane.b32.xlu0 %v5203_v51, %s5762_s25  ;;  %v5205_v55 = vpop.eup %5204  ;;  %v4702_v51 = vpack.c.bf16 %v1214_v49, %v1212_v48 }
 0xac3   :  { %v820_v56 = vadd.f32 1.0, %v5205_v55  ;;  %v1216_v55 = vld [vmem:[%s6874_s4 + $0x68] sm:$0xff] }
 0xac5   :  { %5206 = vrcp.f32 %v820_v56  ;;  %v1218_v56 = vld [vmem:[%s6874_s4 + $0x78] sm:$0xff] }
 0xacf   :  { %v5207_v39 = vpop.eup %5206 }
 0xad0   :  { %v830_v59 = vmul.f32 %v5207_v39, %v828_v58  ;;  %v1217_v58 = vld [vmem:[%s6874_s4 + $0x70] sm:$0xff] }
 0xb34   :  { %v833_v62 = vpop.permute.xlu0 %832 }
 0xb35   :  { %v835_v57 = vmul.f32 %v5207_v39, %v833_v62  ;;  %v4704_v39 = vpack.c.bf16 %v1213_v54, %v1211_v53  ;;  %v4706_v62 = vpack.c.bf16 %v1218_v56, %v1216_v55 }
 0xb37   :  { %837 = vrot.lane.b32.xlu1 %v835_v57, %s5762_s25  ;;  %v1215_v57 = vld [vmem:[%s6874_s4 + $0x60] sm:$0xff] }
 0xba9   :  { %v838_v60 = vpop.permute.xlu1 %837 }
 0xbaa   :  { %v840_v63 = vadd.f32 %v838_v60, %v830_v59  ;;  %v4708_v59 = vpack.c.bf16 %v1217_v58, %v1215_v57  ;;  %v1235_v58 = vld [vmem:[%s6876_s6] sm:$0x3] }
 0xbac   :  { %5208 = vtanh.f32 %v840_v63  ;;  %v943_v15 = vrot.slane %v840_v63, 6 }
 0xbad   :  { %5210 = vpow2.f32 %v4445_v46 }
 0xbb6   :  { %v5209_v1 = vpop.eup %5208 }
 0xbb7   :  { %843 = vrot.lane.b32.xlu0 %v5209_v1, %s5762_s25  ;;  %v5211_v61 = vpop.eup %5210 }
 0xbb8   :  { %v821_v2 = vadd.f32 1.0, %v5211_v61 }
 0xbba   :  { %5212 = vrcp.f32 %v821_v2 }
 0xbc4   :  { %v5213_v3 = vpop.eup %5212 }
 0xc29   :  { %v844_v6 = vpop.permute.xlu0 %843 }
 0xc2a   :  { %v6152_v7 = vmul.f32 %v5213_v3, %v844_v6 }
 0xc2c   :  { %4446 = vmatmul.mubr.msk.f32.vlgmr.msra.gmra.mrb[8].mxu0 %vm283_vm4, %v6152_v7 }
 0xc2d   :  { %4681 = vmatpush1.bf16.msra.mxu0 %v5992_v9  ;;  %1146 = vmatprep.mubr.f32.mxu0 %v5760_v0 }
 0xc2e   :  { %4683 = vmatprep.subr.bf16.mxu0 %v5994_v10 }
 0xc31   :  { %4685 = vmatpush1.bf16.msra.mxu0 %v5998_v17 }
 0xc32   :  { %4687 = vmatprep.subr.bf16.mxu0 %v6001_v20 }
 0xc35   :  { %4689 = vmatpush1.bf16.msra.mxu0 %v6006_v27 }
 0xc36   :  { %4691 = vmatprep.subr.bf16.mxu0 %v6014_v29 }
 0xc39   :  { %4693 = vmatpush1.bf16.msra.mxu0 %v6019_v32 }
 0xcff   :  { %v916_v8 = vpop.f32.mrb[8].mxu0 }
 0xd00   :  { %v918_v11 = vpop.f32.mrb[9].mxu0  ;;  %v923_v10 = vrot.slane %v916_v8, 6 }
 0xd01   :  { %v924_v12 = vrot.slane %v918_v11, 6 }
 0xd02   :  { %v927_v17 = vadd.f32 %v923_v10, %v6147_v52 }
 0xd03   :  { %v928_v13 = vadd.f32 %v924_v12, %v6141_v44 }
 0xd04   :  { %v4447_v4 = vmul.f32 -1.442695, %v927_v17 }
 0xd05   :  { %5214 = vtanh.f32 %v928_v13  ;;  %v4448_v25 = vmul.f32 -1.442695, %v928_v13 }
 0xd06   :  { %5216 = vpow2.f32 %v4447_v4 }
 0xd0f   :  { %v5215_v9 = vpop.eup %5214 }
 0xd10   :  { %947 = vrot.lane.b32.xlu1 %v5215_v9, %s5762_s25  ;;  %v5217_v20 = vpop.eup %5216 }
 0xd11   :  { %v935_v27 = vadd.f32 1.0, %v5217_v20 }
 0xd13   :  { %5218 = vrcp.f32 %v935_v27 }
 0xd1d   :  { %v5219_v29 = vpop.eup %5218 }
 0xd1e   :  { %v945_v16 = vmul.f32 %v5219_v29, %v943_v15  ;;  %v1219_v15 = vld [vmem:[#allocation7] sm:$0xff] }
 0xd82   :  { %v948_v14 = vpop.permute.xlu1 %947 }
 0xd83   :  { %v950_v32 = vmul.f32 %v5219_v29, %v948_v14  ;;  %v1220_v29 = vld [vmem:[#allocation7 + $0x8] sm:$0xff]  ;;  %v1222_v14 = vld [vmem:[#allocation7 + $0x18] sm:$0xff] }
 0xd85   :  { %952 = vrot.lane.b32.xlu0 %v950_v32, %s5762_s25  ;;  %v6240_v32 = vpack.c.bf16 %v1222_v14, %v1220_v29 }
 0xd87   :  { %4711 = vmatprep.subr.bf16.mxu0 %v6240_v32 }
 0xdf7   :  { %v953_v18 = vpop.permute.xlu0 %952 }
 0xdf8   :  { %v6168_v19 = vadd.f32 %v953_v18, %v945_v16  ;;  %v1221_v16 = vld [vmem:[#allocation7 + $0x10] sm:$0xff] }
 0xdf9   :  { %v6242_v18 = vpack.c.bf16 %v1221_v16, %v1219_v15 }
 0xdfa   :  { %5220 = vtanh.f32 %v6168_v19  ;;  %v1059_v17 = vrot.slane %v6168_v19, 6  ;;  %v1226_v19 = vld [vmem:[#allocation7 + $0x38] sm:$0xff] }
 0xdfb   :  { %5222 = vpow2.f32 %v4448_v25  ;;  %v6247_v22 = vpack.c.bf16 %v1226_v19, %v1224_v21 }
 0xe04   :  { %v5221_v24 = vpop.eup %5220 }
 0xe05   :  { %958 = vrot.lane.b32.xlu1 %v5221_v24, %s5762_s25  ;;  %v5223_v26 = vpop.eup %5222  ;;  %v1225_v24 = vld [vmem:[#allocation7 + $0x30] sm:$0xff] }
 0xe06   :  { %v936_v5 = vadd.f32 1.0, %v5223_v26  ;;  %v6249_v25 = vpack.c.bf16 %v1225_v24, %v1223_v23  ;;  %v1228_v26 = vld [vmem:[#allocation7 + $0x48] sm:$0xff] }
 0xe08   :  { %5224 = vrcp.f32 %v936_v5  ;;  %v1230_v5 = vld [vmem:[#allocation7 + $0x58] sm:$0xff] }
 0xe09   :  { %v6253_v28 = vpack.c.bf16 %v1230_v5, %v1228_v26 }
 0xe12   :  { %v5225_v40 = vpop.eup %5224 }
 0xe77   :  { %v959_v31 = vpop.permute.xlu1 %958 }
 0xe78   :  { %v6190_v47 = vmul.f32 %v5225_v40, %v959_v31  ;;  %v1229_v40 = vld [vmem:[#allocation7 + $0x50] sm:$0xff] }
 0xe79   :  { %v6255_v31 = vpack.c.bf16 %v1229_v40, %v1227_v30 }
 0xe7a   :  { %v963_v37 = vrot.slane %v6190_v47, 2  ;;  %v1200_v55 = vsel %vm1194_vm5, %v6152_v7, %v6190_v47 }
 0xe7c   :  { %4449 = vmatmul.mubr.msk.f32.vlgmr.msra.gmra.mrb[6].mxu1 %vm283_vm4, %v963_v37 }
 0xe7d   :  { %4697 = vmatpush1.bf16.msra.mxu1 %v4696_v36  ;;  %1317 = vmatprep.mubr.f32.mxu1 %v5760_v0  ;;  %v1234_v36 = vld [vmem:[#allocation7 + $0x78] sm:$0xff] }
 0xe7e   :  { %4699 = vmatprep.subr.bf16.mxu1 %v4698_v38  ;;  %v6260_v37 = vpack.c.bf16 %v1234_v36, %v1232_v34  ;;  %v1231_v38 = vld [vmem:[#allocation7 + $0x60] sm:$0xff] }
 0xe7f   :  { %v6262_v42 = vpack.c.bf16 %v1233_v41, %v1231_v38 }
 0xe81   :  { %4701 = vmatpush1.bf16.msra.mxu1 %v4700_v50 }
 0xe82   :  { %4703 = vmatprep.subr.bf16.mxu1 %v4702_v51 }
 0xe85   :  { %4705 = vmatpush1.bf16.msra.mxu1 %v4704_v39 }
 0xe86   :  { %4707 = vmatprep.subr.bf16.mxu1 %v4706_v62 }
 0xe89   :  { %4709 = vmatpush1.bf16.msra.mxu1 %v4708_v59  ;;  %v6298_v59 = vrot.slane %v1235_v58, %v6043_v35 }
 0xe8a   :  { %4727 = vmatprep.subr.bf16.mxu1 %v6240_v32 }
 0xe8c   :  { %4455 = vmatmul.mubr.msk.f32.vlgmr.msra.gmra.mrb[8].mxu1 %vm283_vm4, %v6128_v43 }
 0xe8d   :  { %1323 = vmatprep.mubr.f32.mxu1 %v5760_v0  ;;  %4729 = vmatpush1.bf16.msra.mxu1 %v6242_v18 }
 0xe8e   :  { %4731 = vmatprep.subr.bf16.mxu1 %v6247_v22 }
 0xe91   :  { %4733 = vmatpush1.bf16.msra.mxu1 %v6249_v25 }
 0xe92   :  { %4735 = vmatprep.subr.bf16.mxu1 %v6253_v28 }
 0xe95   :  { %4737 = vmatpush1.bf16.msra.mxu1 %v6255_v31 }
 0xe96   :  { %4739 = vmatprep.subr.bf16.mxu1 %v6260_v37 }
 0xe99   :  { %4741 = vmatpush1.bf16.msra.mxu1 %v6262_v42 }
 0xe9a   :  { %4759 = vmatprep.subr.bf16.mxu1 %v6240_v32 }
 0xf4f   :  { %v1032_v60 = vpop.f32.mrb[6].mxu1 }
 0xf50   :  { %v1034_v63 = vpop.f32.mrb[7].mxu1  ;;  %v1039_v6 = vrot.slane %v1032_v60, 4 }
 0xf51   :  { %v1040_v1 = vrot.slane %v1034_v63, 4 }
 0xf52   :  { %v1043_v8 = vadd.f32 %v1039_v6, %v6147_v52 }
 0xf53   :  { %v1044_v46 = vadd.f32 %v1040_v1, %v6141_v44 }
 0xf54   :  { %v4450_v11 = vmul.f32 -1.442695, %v1043_v8 }
 0xf55   :  { %5226 = vtanh.f32 %v1044_v46  ;;  %v4451_v48 = vmul.f32 -1.442695, %v1044_v46 }
 0xf56   :  { %5228 = vpow2.f32 %v4450_v11 }
 0xf5f   :  { %v5227_v61 = vpop.eup %5226  ;;  %v6229_v2 = vpop.f32.mrb[8].mxu1 }
 0xf60   :  { %v6231_v3 = vpop.f32.mrb[9].mxu1  ;;  %1063 = vrot.lane.b32.xlu0 %v5227_v61, %s5762_s25  ;;  %v5229_v43 = vpop.eup %5228 }
 0xf61   :  { %v1051_v12 = vadd.f32 1.0, %v5229_v43  ;;  %v6303_v46 = vadd.f32 %v6231_v3, %v6298_v59  ;;  %v6309_v43 = vrot.slane %v1235_v58, %v6056_v45 }
 0xf63   :  { %5230 = vrcp.f32 %v1051_v12  ;;  %v6313_v12 = vadd.f32 %v6229_v2, %v6309_v43 }
 0xf6d   :  { %v5231_v13 = vpop.eup %5230 }
 0xf6e   :  { %v1061_v4 = vmul.f32 %v5231_v13, %v1059_v17 }
 0xfd2   :  { %v1064_v9 = vpop.permute.xlu0 %1063 }
 0xfd3   :  { %v1066_v10 = vmul.f32 %v5231_v13, %v1064_v9 }
 0xfd5   :  { %1068 = vrot.lane.b32.xlu1 %v1066_v10, %s5762_s25 }
0x1047   :  { %v1069_v20 = vpop.permute.xlu1 %1068 }
0x1048   :  { %v6237_v27 = vadd.f32 %v1069_v20, %v1061_v4 }
0x104a   :  { %5232 = vtanh.f32 %v6237_v27  ;;  %v1175_v2 = vrot.slane %v6237_v27, 6 }
0x104b   :  { %5234 = vpow2.f32 %v4451_v48 }
0x1054   :  { %v5233_v33 = vpop.eup %5232 }
0x1055   :  { %1074 = vrot.lane.b32.xlu0 %v5233_v33, %s5762_s25  ;;  %v5235_v49 = vpop.eup %5234 }
0x1056   :  { %v1052_v50 = vadd.f32 1.0, %v5235_v49 }
0x1058   :  { %5236 = vrcp.f32 %v1052_v50 }
0x1062   :  { %v5237_v51 = vpop.eup %5236 }
0x10c7   :  { %v1075_v53 = vpop.permute.xlu0 %1074 }
0x10c8   :  { %v1077_v54 = vmul.f32 %v5237_v51, %v1075_v53 }
0x10ca   :  { %v1079_v56 = vrot.slane %v1077_v54, 4  ;;  %v6271_v39 = vsel %vm1196_vm6, %v1200_v55, %v1077_v54 }
0x10cc   :  { %4452 = vmatmul.mubr.msk.f32.vlgmr.msra.gmra.mrb[10].mxu0 %vm283_vm4, %v1079_v56 }
0x10cd   :  { %4713 = vmatpush1.bf16.msra.mxu0 %v6242_v18  ;;  %1394 = vmatprep.mubr.f32.mxu0 %v5760_v0 }
0x10ce   :  { %4715 = vmatprep.subr.bf16.mxu0 %v6247_v22 }
0x10d1   :  { %4717 = vmatpush1.bf16.msra.mxu0 %v6249_v25 }
0x10d2   :  { %4719 = vmatprep.subr.bf16.mxu0 %v6253_v28 }
0x10d5   :  { %4721 = vmatpush1.bf16.msra.mxu0 %v6255_v31 }
0x10d6   :  { %4723 = vmatprep.subr.bf16.mxu0 %v6260_v37 }
0x10d9   :  { %4725 = vmatpush1.bf16.msra.mxu0 %v6262_v42 }
0x10da   :  { %4743 = vmatprep.subr.bf16.mxu0 %v6240_v32 }
0x10dc   :  { %1395 = vmatmul.mubr.f32.vlgmr.msra.gmra.mrb[12].mxu0 %v5760_v0 }
0x10dd   :  { %4745 = vmatpush1.bf16.msra.mxu0 %v6242_v18  ;;  %1616 = vmatprep.mubr.f32.mxu0 %v5760_v0 }
0x10de   :  { %4747 = vmatprep.subr.bf16.mxu0 %v6247_v22 }
0x10e1   :  { %4749 = vmatpush1.bf16.msra.mxu0 %v6249_v25 }
0x10e2   :  { %4751 = vmatprep.subr.bf16.mxu0 %v6253_v28 }
0x10e5   :  { %4753 = vmatpush1.bf16.msra.mxu0 %v6255_v31 }
0x10e6   :  { %4755 = vmatprep.subr.bf16.mxu0 %v6260_v37 }
0x10e9   :  { %4757 = vmatpush1.bf16.msra.mxu0 %v6262_v42 }
0x10ea   :  { %4775 = vmatprep.subr.bf16.mxu0 %v6240_v32 }
0x119f   :  { %v1148_v7 = vpop.f32.mrb[10].mxu0 }
0x11a0   :  { %v1150_v47 = vpop.f32.mrb[11].mxu0  ;;  %v1155_v6 = vrot.slane %v1148_v7, 2 }
0x11a1   :  { %v1156_v62 = vrot.slane %v1150_v47, 2 }
0x11a2   :  { %v1159_v8 = vadd.f32 %v1155_v6, %v6147_v52 }
0x11a3   :  { %v1160_v57 = vadd.f32 %v1156_v62, %v6141_v44 }
0x11a4   :  { %v4453_v11 = vmul.f32 -1.442695, %v1159_v8 }
0x11a5   :  { %5238 = vtanh.f32 %v1160_v57  ;;  %v4454_v33 = vmul.f32 -1.442695, %v1160_v57 }
0x11af   :  { %v5239_v60 = vpop.eup %5238  ;;  %v1396_v63 = vpop.f32.mrb[12].mxu0 }
0x11b0   :  { %v1398_v1 = vpop.f32.mrb[13].mxu0  ;;  %1179 = vrot.lane.b32.xlu1 %v5239_v60, %s5762_s25  ;;  %v1401_v13 = vadd.f32 %v1396_v63, %v6313_v12 }
0x11b1   :  { %v1402_v61 = vadd.f32 %v1398_v1, %v6303_v46 }
0x11b2   :  { %v4457_v10 = vmul.f32 -1.442695, %v1401_v13 }
0x11b3   :  { %5240 = vtanh.f32 %v1402_v61  ;;  %v4458_v38 = vmul.f32 -1.442695, %v1402_v61 }
0x11b4   :  { %5242 = vpow2.f32 %v4453_v11 }
0x11bd   :  { %v5241_v44 = vpop.eup %5240 }
0x11be   :  { %1418 = vrot.lane.b32.xlu0 %v5241_v44, %s5762_s25  ;;  %v5243_v3 = vpop.eup %5242 }
0x11bf   :  { %v1167_v9 = vadd.f32 1.0, %v5243_v3 }
0x11c1   :  { %5244 = vrcp.f32 %v1167_v9 }
0x11c2   :  { %5246 = vpow2.f32 %v4457_v10 }
0x11cb   :  { %v5245_v17 = vpop.eup %5244 }
0x11cc   :  { %v5247_v20 = vpop.eup %5246  ;;  %v1177_v21 = vmul.f32 %v5245_v17, %v1175_v2 }
0x11cd   :  { %v1409_v29 = vadd.f32 1.0, %v5247_v20 }
0x11cf   :  { %5248 = vrcp.f32 %v1409_v29 }
0x11d9   :  { %v5249_v14 = vpop.eup %5248 }
0x11da   :  { %v1416_v26 = vmul.f32 0.0, %v5249_v14 }
0x1222   :  { %v1180_v4 = vpop.permute.xlu1 %1179 }
0x1223   :  { %v1182_v52 = vmul.f32 %v5245_v17, %v1180_v4 }
0x1225   :  { %1184 = vrot.lane.b32.xlu1 %v1182_v52, %s5762_s25 }
0x1230   :  { %v1419_v15 = vpop.permute.xlu0 %1418 }
0x1231   :  { %v1421_v16 = vmul.f32 %v5249_v14, %v1419_v15 }
0x1233   :  { %1423 = vrot.lane.b32.xlu0 %v1421_v16, %s5762_s25 }
0x1297   :  { %v1185_v19 = vpop.permute.xlu1 %1184 }
0x1298   :  { %v1187_v23 = vadd.f32 %v1185_v19, %v1177_v21 }
0x129a   :  { %5250 = vtanh.f32 %v1187_v23 }
0x12a4   :  { %v5251_v24 = vpop.eup %5250 }
0x12a5   :  { %1190 = vrot.lane.b32.xlu1 %v5251_v24, %s5762_s25  ;;  %v1424_v5 = vpop.permute.xlu0 %1423 }
0x12a6   :  { %v1426_v30 = vadd.f32 %v1424_v5, %v1416_v26 }
0x12a8   :  { %5252 = vtanh.f32 %v1426_v30  ;;  %v1529_v3 = vrot.slane %v1426_v30, 6 }
0x12a9   :  { %5254 = vpow2.f32 %v4454_v33 }
0x12b2   :  { %v5253_v40 = vpop.eup %5252 }
0x12b3   :  { %1429 = vrot.lane.b32.xlu0 %v5253_v40, %s5762_s25  ;;  %v5255_v34 = vpop.eup %5254 }
0x12b4   :  { %v1168_v36 = vadd.f32 1.0, %v5255_v34 }
0x12b6   :  { %5256 = vrcp.f32 %v1168_v36 }
0x12b7   :  { %5258 = vpow2.f32 %v4458_v38 }
0x12c0   :  { %v5257_v27 = vpop.eup %5256 }
0x12c1   :  { %v5259_v48 = vpop.eup %5258 }
0x12c2   :  { %v1410_v51 = vadd.f32 1.0, %v5259_v48 }
0x12c4   :  { %5260 = vrcp.f32 %v1410_v51 }
0x12ce   :  { %v5261_v53 = vpop.eup %5260 }
0x1317   :  { %v1191_v41 = vpop.permute.xlu1 %1190 }
0x1318   :  { %v1193_v49 = vmul.f32 %v5257_v27, %v1191_v41 }
0x131a   :  { %v1202_v50 = vsel %vm1198_vm7, %v6271_v39, %v1193_v49 }
0x131b   :  { %4456 = vmatmul.mubr.msk.f32.gmra.mrb[10].mxu1 %vm283_vm4, %v1202_v50 }
0x131c   :  { %1500 = vmatprep.mubr.f32.mxu1 %v5760_v0 }
0x1325   :  { %v1430_v54 = vpop.permute.xlu0 %1429 }
0x1326   :  { %v6325_v55 = vmul.f32 %v5261_v53, %v1430_v54 }
0x1328   :  { %4459 = vmatmul.mubr.msk.f32.vlgmr.msra.gmra.mrb[12].mxu1 %vm283_vm4, %v6325_v55 }
0x1329   :  { %4761 = vmatpush1.bf16.msra.mxu1 %v6242_v18  ;;  %1732 = vmatprep.mubr.f32.mxu1 %v5760_v0 }
0x132a   :  { %4763 = vmatprep.subr.bf16.mxu1 %v6247_v22 }
0x132d   :  { %4765 = vmatpush1.bf16.msra.mxu1 %v6249_v25 }
0x132e   :  { %4767 = vmatprep.subr.bf16.mxu1 %v6253_v28 }
0x1331   :  { %4769 = vmatpush1.bf16.msra.mxu1 %v6255_v31 }
0x1332   :  { %4771 = vmatprep.subr.bf16.mxu1 %v6260_v37 }
0x1335   :  { %4773 = vmatpush1.bf16.msra.mxu1 %v6262_v42 }
0x1336   :  { %4791 = vmatprep.subr.bf16.mxu1 %v6240_v32 }
0x13ee   :  { %v6338_v56 = vpop.f32.mrb[10].mxu1 }
0x13ef   :  { %v6340_v39 = vpop.f32.mrb[11].mxu1 }
0x13fb   :  { %v1502_v7 = vpop.f32.mrb[12].mxu1 }
0x13fc   :  { %v1504_v47 = vpop.f32.mrb[13].mxu1  ;;  %v1509_v60 = vrot.slane %v1502_v7, 6 }
0x13fd   :  { %v1510_v62 = vrot.slane %v1504_v47, 6 }
0x13fe   :  { %v1513_v63 = vadd.f32 %v1509_v60, %v6313_v12 }
0x13ff   :  { %v1514_v57 = vadd.f32 %v1510_v62, %v6303_v46 }
0x1400   :  { %v4460_v1 = vmul.f32 -1.442695, %v1513_v63 }
0x1401   :  { %5262 = vtanh.f32 %v1514_v57  ;;  %v4461_v4 = vmul.f32 -1.442695, %v1514_v57 }
0x1402   :  { %5264 = vpow2.f32 %v4460_v1 }
0x140b   :  { %v5263_v58 = vpop.eup %5262 }
0x140c   :  { %1533 = vrot.lane.b32.xlu1 %v5263_v58, %s5762_s25  ;;  %v5265_v61 = vpop.eup %5264 }
0x140d   :  { %v1521_v44 = vadd.f32 1.0, %v5265_v61 }
0x140f   :  { %5266 = vrcp.f32 %v1521_v44 }
0x1419   :  { %v5267_v6 = vpop.eup %5266 }
0x141a   :  { %v1531_v13 = vmul.f32 %v5267_v6, %v1529_v3 }
0x147e   :  { %v1534_v8 = vpop.permute.xlu1 %1533 }
0x147f   :  { %v1536_v11 = vmul.f32 %v5267_v6, %v1534_v8 }
0x1481   :  { %1538 = vrot.lane.b32.xlu0 %v1536_v11, %s5762_s25 }
0x14f3   :  { %v1539_v9 = vpop.permute.xlu0 %1538 }
0x14f4   :  { %v1541_v10 = vadd.f32 %v1539_v9, %v1531_v13 }
0x14f6   :  { %5268 = vtanh.f32 %v1541_v10  ;;  %v1645_v27 = vrot.slane %v1541_v10, 6 }
0x14f7   :  { %5270 = vpow2.f32 %v4461_v4 }
0x1500   :  { %v5269_v17 = vpop.eup %5268 }
0x1501   :  { %1544 = vrot.lane.b32.xlu1 %v5269_v17, %s5762_s25  ;;  %v5271_v20 = vpop.eup %5270 }
0x1502   :  { %v1522_v52 = vadd.f32 1.0, %v5271_v20 }
0x1504   :  { %5272 = vrcp.f32 %v1522_v52 }
0x150e   :  { %v5273_v29 = vpop.eup %5272 }
0x1573   :  { %v1545_v14 = vpop.permute.xlu1 %1544 }
0x1574   :  { %v1547_v15 = vmul.f32 %v5273_v29, %v1545_v14 }
0x1576   :  { %v1549_v16 = vrot.slane %v1547_v15, 2  ;;  %v2237_v57 = vsel %vm1194_vm5, %v6325_v55, %v1547_v15 }
0x1578   :  { %4462 = vmatmul.mubr.msk.f32.vlgmr.msra.gmra.mrb[14].mxu0 %vm283_vm4, %v1549_v16 }
0x1579   :  { %4777 = vmatpush1.bf16.msra.mxu0 %v6242_v18  ;;  %1848 = vmatprep.mubr.f32.mxu0 %v5760_v0 }
0x157a   :  { %4779 = vmatprep.subr.bf16.mxu0 %v6247_v22 }
0x157d   :  { %4781 = vmatpush1.bf16.msra.mxu0 %v6249_v25 }
0x157e   :  { %4783 = vmatprep.subr.bf16.mxu0 %v6253_v28 }
0x1581   :  { %4785 = vmatpush1.bf16.msra.mxu0 %v6255_v31 }
0x1582   :  { %4787 = vmatprep.subr.bf16.mxu0 %v6260_v37 }
0x1585   :  { %4789 = vmatpush1.bf16.msra.mxu0 %v6262_v42 }
0x1586   :  { %4807 = vmatprep.subr.bf16.mxu0 %v6240_v32 }
0x164b   :  { %v1618_v2 = vpop.f32.mrb[14].mxu0 }
0x164c   :  { %v1620_v21 = vpop.f32.mrb[15].mxu0  ;;  %v1625_v26 = vrot.slane %v1618_v2, 4 }
0x164d   :  { %v1626_v19 = vrot.slane %v1620_v21, 4 }
0x164e   :  { %v1629_v5 = vadd.f32 %v1625_v26, %v6313_v12 }
0x164f   :  { %v1630_v23 = vadd.f32 %v1626_v19, %v6303_v46 }
0x1650   :  { %v4463_v30 = vmul.f32 -1.442695, %v1629_v5 }
0x1651   :  { %5274 = vtanh.f32 %v1630_v23  ;;  %v4464_v51 = vmul.f32 -1.442695, %v1630_v23  ;;  %v6394_v23 = vadd.f32 %v6340_v39, %v6298_v59 }
0x1652   :  { %5276 = vpow2.f32 %v4463_v30 }
0x165b   :  { %v5275_v24 = vpop.eup %5274 }
0x165c   :  { %1649 = vrot.lane.b32.xlu0 %v5275_v24, %s5762_s25  ;;  %v5277_v40 = vpop.eup %5276 }
0x165d   :  { %v1637_v33 = vadd.f32 1.0, %v5277_v40  ;;  %v6400_v40 = vadd.f32 %v6338_v56, %v6309_v43 }
0x165f   :  { %5278 = vrcp.f32 %v1637_v33 }
0x1669   :  { %v5279_v34 = vpop.eup %5278 }
0x166a   :  { %v1647_v41 = vmul.f32 %v5279_v34, %v1645_v27 }
0x16ce   :  { %v1650_v36 = vpop.permute.xlu0 %1649 }
0x16cf   :  { %v1652_v38 = vmul.f32 %v5279_v34, %v1650_v36 }
0x16d1   :  { %1654 = vrot.lane.b32.xlu1 %v1652_v38, %s5762_s25 }
0x1743   :  { %v1655_v48 = vpop.permute.xlu1 %1654 }
0x1744   :  { %v1657_v49 = vadd.f32 %v1655_v48, %v1647_v41 }
0x1746   :  { %5280 = vtanh.f32 %v1657_v49  ;;  %v1761_v17 = vrot.slane %v1657_v49, 6 }
0x1747   :  { %5282 = vpow2.f32 %v4464_v51 }
0x1750   :  { %v5281_v50 = vpop.eup %5280 }
0x1751   :  { %1660 = vrot.lane.b32.xlu0 %v5281_v50, %s5762_s25  ;;  %v5283_v53 = vpop.eup %5282 }
0x1752   :  { %v1638_v54 = vadd.f32 1.0, %v5283_v53 }
0x1754   :  { %5284 = vrcp.f32 %v1638_v54 }
0x175e   :  { %v5285_v7 = vpop.eup %5284 }
0x17c3   :  { %v1661_v47 = vpop.permute.xlu0 %1660 }
0x17c4   :  { %v1663_v62 = vmul.f32 %v5285_v7, %v1661_v47 }
0x17c6   :  { %v1665_v58 = vrot.slane %v1663_v62, 4  ;;  %v2238_v60 = vsel %vm1196_vm6, %v2237_v57, %v1663_v62 }
0x17c8   :  { %4465 = vmatmul.mubr.msk.f32.vlgmr.msra.gmra.mrb[14].mxu1 %vm283_vm4, %v1665_v58 }
0x17c9   :  { %4793 = vmatpush1.bf16.msra.mxu1 %v6242_v18  ;;  %1957 = vmatprep.mubr.f32.mxu1 %v5760_v0 }
0x17ca   :  { %4795 = vmatprep.subr.bf16.mxu1 %v6247_v22 }
0x17cd   :  { %4797 = vmatpush1.bf16.msra.mxu1 %v6249_v25 }
0x17ce   :  { %4799 = vmatprep.subr.bf16.mxu1 %v6253_v28 }
0x17d1   :  { %4801 = vmatpush1.bf16.msra.mxu1 %v6255_v31 }
0x17d2   :  { %4803 = vmatprep.subr.bf16.mxu1 %v6260_v37 }
0x17d5   :  { %4805 = vmatpush1.bf16.msra.mxu1 %v6262_v42 }
0x17d6   :  { %4823 = vmatprep.subr.bf16.mxu1 %v6240_v32 }
0x189b   :  { %v1734_v55 = vpop.f32.mrb[14].mxu1 }
0x189c   :  { %v1736_v63 = vpop.f32.mrb[15].mxu1  ;;  %v1741_v6 = vrot.slane %v1734_v55, 2 }
0x189d   :  { %v1742_v1 = vrot.slane %v1736_v63, 2 }
0x189e   :  { %v1745_v8 = vadd.f32 %v1741_v6, %v6313_v12 }
0x189f   :  { %v1746_v61 = vadd.f32 %v1742_v1, %v6303_v46 }
0x18a0   :  { %v4466_v11 = vmul.f32 -1.442695, %v1745_v8  ;;  %v2244_v8 = vld [vmem:[#allocation8 + $0x8] sm:$0xff] }
0x18a1   :  { %5286 = vtanh.f32 %v1746_v61  ;;  %v4467_v29 = vmul.f32 -1.442695, %v1746_v61 }
0x18a2   :  { %5288 = vpow2.f32 %v4466_v11  ;;  %v2246_v11 = vld [vmem:[#allocation8 + $0x18] sm:$0xff] }
0x18ab   :  { %v5287_v44 = vpop.eup %5286 }
0x18ac   :  { %1765 = vrot.lane.b32.xlu1 %v5287_v44, %s5762_s25  ;;  %v5289_v3 = vpop.eup %5288 }
0x18ad   :  { %v1753_v13 = vadd.f32 1.0, %v5289_v3  ;;  %v4838_v3 = vpack.c.bf16 %v2246_v11, %v2244_v8  ;;  %v2264_v8 = vld [vmem:[#allocation10 + $0x28] sm:$0xff] }
0x18af   :  { %5290 = vrcp.f32 %v1753_v13 }
0x18b9   :  { %v5291_v9 = vpop.eup %5290 }
0x18ba   :  { %v1763_v4 = vmul.f32 %v5291_v9, %v1761_v17  ;;  %v2243_v17 = vld [vmem:[#allocation8] sm:$0xff] }
0x191e   :  { %v1766_v10 = vpop.permute.xlu1 %1765 }
0x191f   :  { %v1768_v32 = vmul.f32 %v5291_v9, %v1766_v10 }
0x1921   :  { %1770 = vrot.lane.b32.xlu0 %v1768_v32, %s5762_s25 }
0x1993   :  { %v1771_v46 = vpop.permute.xlu0 %1770 }
0x1994   :  { %v1773_v20 = vadd.f32 %v1771_v46, %v1763_v4  ;;  %v2245_v4 = vld [vmem:[#allocation8 + $0x10] sm:$0xff] }
0x1996   :  { %5292 = vtanh.f32 %v1773_v20  ;;  %v1871_v41 = vrot.slane %v1773_v20, 6 }
0x1997   :  { %5294 = vpow2.f32 %v4467_v29  ;;  %v2250_v29 = vld [vmem:[#allocation8 + $0x38] sm:$0xff] }
0x19a0   :  { %v5293_v52 = vpop.eup %5292 }
0x19a1   :  { %1776 = vrot.lane.b32.xlu1 %v5293_v52, %s5762_s25  ;;  %v5295_v12 = vpop.eup %5294  ;;  %v2248_v52 = vld [vmem:[#allocation8 + $0x28] sm:$0xff] }
0x19a2   :  { %v1754_v14 = vadd.f32 1.0, %v5295_v12 }
0x19a4   :  { %5296 = vrcp.f32 %v1754_v14  ;;  %v4840_v14 = vpack.c.bf16 %v2245_v4, %v2243_v17  ;;  %v2267_v4 = vld [vmem:[#allocation10 + $0x40] sm:$0xff] }
0x19ae   :  { %v5297_v15 = vpop.eup %5296 }
0x1a13   :  { %v1777_v16 = vpop.permute.xlu1 %1776 }
0x1a14   :  { %v1779_v2 = vmul.f32 %v5297_v15, %v1777_v16  ;;  %v4842_v16 = vpack.c.bf16 %v2250_v29, %v2248_v52  ;;  %v2272_v29 = vld [vmem:[#allocation10 + $0x68] sm:$0xff] }
0x1a16   :  { %v1781_v21 = vrot.slane %v1779_v2, 6  ;;  %v6381_v19 = vsel %vm1198_vm7, %v2238_v60, %v1779_v2  ;;  %v2247_v2 = vld [vmem:[#allocation8 + $0x20] sm:$0xff] }
0x1a18   :  { %4468 = vmatmul.mubr.msk.f32.vlgmr.msra.gmra.mrb[16].mxu0 %vm283_vm4, %v1781_v21  ;;  %v2249_v21 = vld [vmem:[#allocation8 + $0x30] sm:$0xff] }
0x1a19   :  { %4809 = vmatpush1.bf16.msra.mxu0 %v6242_v18  ;;  %2073 = vmatprep.mubr.f32.mxu0 %v5760_v0 }
0x1a1a   :  { %4811 = vmatprep.subr.bf16.mxu0 %v6247_v22 }
0x1a1d   :  { %4813 = vmatpush1.bf16.msra.mxu0 %v6249_v25 }
0x1a1e   :  { %4815 = vmatprep.subr.bf16.mxu0 %v6253_v28 }
0x1a21   :  { %4817 = vmatpush1.bf16.msra.mxu0 %v6255_v31 }
0x1a22   :  { %4819 = vmatprep.subr.bf16.mxu0 %v6260_v37 }
0x1a25   :  { %4821 = vmatpush1.bf16.msra.mxu0 %v6262_v42 }
0x1a26   :  { %4839 = vmatprep.subr.bf16.mxu0 %v4838_v3  ;;  %v2263_v3 = vld [vmem:[#allocation10 + $0x20] sm:$0xff] }
0x1aeb   :  { %v1850_v24 = vpop.f32.mrb[16].mxu0 }
0x1aec   :  { %v1852_v26 = vpop.f32.mrb[17].mxu0  ;;  %v1855_v33 = vadd.f32 %v1850_v24, %v6400_v40  ;;  %v2252_v24 = vld [vmem:[#allocation8 + $0x48] sm:$0xff] }
0x1aed   :  { %v1856_v5 = vadd.f32 %v1852_v26, %v6394_v23  ;;  %v2254_v26 = vld [vmem:[#allocation8 + $0x58] sm:$0xff] }
0x1aee   :  { %v4469_v34 = vmul.f32 -1.442695, %v1855_v33  ;;  %v2251_v33 = vld [vmem:[#allocation8 + $0x40] sm:$0xff] }
0x1aef   :  { %5298 = vtanh.f32 %v1856_v5  ;;  %v4470_v43 = vmul.f32 -1.442695, %v1856_v5  ;;  %v4844_v5 = vpack.c.bf16 %v2249_v21, %v2247_v2  ;;  %v2273_v2 = vld [vmem:[#allocation10 + $0x70] sm:$0xff] }
0x1af0   :  { %5300 = vpow2.f32 %v4469_v34  ;;  %v2253_v34 = vld [vmem:[#allocation8 + $0x50] sm:$0xff] }
0x1af9   :  { %v5299_v30 = vpop.eup %5298 }
0x1afa   :  { %1875 = vrot.lane.b32.xlu0 %v5299_v30, %s5762_s25  ;;  %v5301_v36 = vpop.eup %5300  ;;  %v4846_v30 = vpack.c.bf16 %v2254_v26, %v2252_v24 }
0x1afb   :  { %v1863_v38 = vadd.f32 1.0, %v5301_v36  ;;  %v2256_v36 = vld [vmem:[#allocation8 + $0x68] sm:$0xff] }
0x1afd   :  { %5302 = vrcp.f32 %v1863_v38  ;;  %v2258_v38 = vld [vmem:[#allocation8 + $0x78] sm:$0xff] }
0x1b07   :  { %v5303_v59 = vpop.eup %5302 }
0x1b08   :  { %v1873_v48 = vmul.f32 %v5303_v59, %v1871_v41  ;;  %v2257_v41 = vld [vmem:[#allocation8 + $0x70] sm:$0xff] }
0x1b6c   :  { %v1876_v39 = vpop.permute.xlu0 %1875 }
0x1b6d   :  { %v1878_v27 = vmul.f32 %v5303_v59, %v1876_v39  ;;  %v4848_v59 = vpack.c.bf16 %v2253_v34, %v2251_v33  ;;  %v4850_v39 = vpack.c.bf16 %v2258_v38, %v2256_v36 }
0x1b6f   :  { %1880 = vrot.lane.b32.xlu1 %v1878_v27, %s5762_s25  ;;  %v2255_v27 = vld [vmem:[#allocation8 + $0x60] sm:$0xff] }
0x1be1   :  { %v1881_v49 = vpop.permute.xlu1 %1880 }
0x1be2   :  { %v1883_v50 = vadd.f32 %v1881_v49, %v1873_v48  ;;  %v4852_v48 = vpack.c.bf16 %v2257_v41, %v2255_v27  ;;  %v2275_v41 = vld [vmem:[%s6879_s9] sm:$0x3] }
0x1be4   :  { %5304 = vtanh.f32 %v1883_v50  ;;  %v1986_v1 = vrot.slane %v1883_v50, 6 }
0x1be5   :  { %5306 = vpow2.f32 %v4470_v43 }
0x1bee   :  { %v5305_v51 = vpop.eup %5304 }
0x1bef   :  { %1886 = vrot.lane.b32.xlu0 %v5305_v51, %s5762_s25  ;;  %v5307_v56 = vpop.eup %5306 }
0x1bf0   :  { %v1864_v53 = vadd.f32 1.0, %v5307_v56 }
0x1bf2   :  { %5308 = vrcp.f32 %v1864_v53 }
0x1bfc   :  { %v5309_v54 = vpop.eup %5308 }
0x1c61   :  { %v1887_v7 = vpop.permute.xlu0 %1886 }
0x1c62   :  { %v6405_v47 = vmul.f32 %v5309_v54, %v1887_v7 }
0x1c64   :  { %4471 = vmatmul.mubr.msk.f32.vlgmr.msra.gmra.mrb[16].mxu1 %vm283_vm4, %v6405_v47 }
0x1c65   :  { %4825 = vmatpush1.bf16.msra.mxu1 %v6242_v18  ;;  %2189 = vmatprep.mubr.f32.mxu1 %v5760_v0 }
0x1c66   :  { %4827 = vmatprep.subr.bf16.mxu1 %v6247_v22 }
0x1c69   :  { %4829 = vmatpush1.bf16.msra.mxu1 %v6249_v25 }
0x1c6a   :  { %4831 = vmatprep.subr.bf16.mxu1 %v6253_v28 }
0x1c6d   :  { %4833 = vmatpush1.bf16.msra.mxu1 %v6255_v31 }
0x1c6e   :  { %4835 = vmatprep.subr.bf16.mxu1 %v6260_v37 }
0x1c71   :  { %4837 = vmatpush1.bf16.msra.mxu1 %v6262_v42 }
0x1d37   :  { %v1959_v62 = vpop.f32.mrb[16].mxu1 }
0x1d38   :  { %v1961_v57 = vpop.f32.mrb[17].mxu1  ;;  %v1966_v22 = vrot.slane %v1959_v62, 6 }
0x1d39   :  { %v1967_v58 = vrot.slane %v1961_v57, 6 }
0x1d3a   :  { %v1970_v25 = vadd.f32 %v1966_v22, %v6400_v40 }
0x1d3b   :  { %v1971_v60 = vadd.f32 %v1967_v58, %v6394_v23 }
0x1d3c   :  { %v4472_v55 = vmul.f32 -1.442695, %v1970_v25 }
0x1d3d   :  { %5310 = vtanh.f32 %v1971_v60  ;;  %v4473_v9 = vmul.f32 -1.442695, %v1971_v60 }
0x1d3e   :  { %5312 = vpow2.f32 %v4472_v55 }
0x1d47   :  { %v5311_v18 = vpop.eup %5310 }
0x1d48   :  { %1990 = vrot.lane.b32.xlu1 %v5311_v18, %s5762_s25  ;;  %v5313_v28 = vpop.eup %5312 }
0x1d49   :  { %v1978_v31 = vadd.f32 1.0, %v5313_v28 }
0x1d4b   :  { %5314 = vrcp.f32 %v1978_v31 }
0x1d55   :  { %v5315_v37 = vpop.eup %5314 }
0x1d56   :  { %v1988_v61 = vmul.f32 %v5315_v37, %v1986_v1  ;;  %v2259_v1 = vld [vmem:[#allocation10] sm:$0xff] }
0x1dba   :  { %v1991_v63 = vpop.permute.xlu1 %1990 }
0x1dbb   :  { %v1993_v42 = vmul.f32 %v5315_v37, %v1991_v63  ;;  %v2260_v37 = vld [vmem:[#allocation10 + $0x8] sm:$0xff]  ;;  %v2262_v63 = vld [vmem:[#allocation10 + $0x18] sm:$0xff] }
0x1dbd   :  { %1995 = vrot.lane.b32.xlu0 %v1993_v42, %s5762_s25  ;;  %v6445_v42 = vpack.c.bf16 %v2262_v63, %v2260_v37 }
0x1dbf   :  { %4855 = vmatprep.subr.bf16.mxu1 %v6445_v42 }
0x1e2f   :  { %v1996_v44 = vpop.permute.xlu0 %1995 }
0x1e30   :  { %v6421_v6 = vadd.f32 %v1996_v44, %v1988_v61  ;;  %v2261_v61 = vld [vmem:[#allocation10 + $0x10] sm:$0xff] }
0x1e31   :  { %v6447_v44 = vpack.c.bf16 %v2261_v61, %v2259_v1 }
0x1e32   :  { %5316 = vtanh.f32 %v6421_v6  ;;  %v2102_v25 = vrot.slane %v6421_v6, 6  ;;  %v2266_v6 = vld [vmem:[#allocation10 + $0x38] sm:$0xff] }
0x1e33   :  { %5318 = vpow2.f32 %v4473_v9  ;;  %v6452_v11 = vpack.c.bf16 %v2266_v6, %v2264_v8 }
0x1e3c   :  { %v5317_v13 = vpop.eup %5316 }
0x1e3d   :  { %2001 = vrot.lane.b32.xlu1 %v5317_v13, %s5762_s25  ;;  %v5319_v10 = vpop.eup %5318  ;;  %v2265_v13 = vld [vmem:[#allocation10 + $0x30] sm:$0xff] }
0x1e3e   :  { %v1979_v32 = vadd.f32 1.0, %v5319_v10  ;;  %v6454_v9 = vpack.c.bf16 %v2265_v13, %v2263_v3  ;;  %v2268_v10 = vld [vmem:[#allocation10 + $0x48] sm:$0xff] }
0x1e40   :  { %5320 = vrcp.f32 %v1979_v32  ;;  %v2270_v32 = vld [vmem:[#allocation10 + $0x58] sm:$0xff] }
0x1e41   :  { %v6458_v17 = vpack.c.bf16 %v2270_v32, %v2268_v10 }
0x1e4a   :  { %v5321_v46 = vpop.eup %5320 }
0x1eaf   :  { %v2002_v20 = vpop.permute.xlu1 %2001 }
0x1eb0   :  { %v6425_v12 = vmul.f32 %v5321_v46, %v2002_v20  ;;  %v2269_v46 = vld [vmem:[#allocation10 + $0x50] sm:$0xff] }
0x1eb1   :  { %v6460_v20 = vpack.c.bf16 %v2269_v46, %v2267_v4 }
0x1eb2   :  { %v2006_v15 = vrot.slane %v6425_v12, 2  ;;  %v2240_v36 = vsel %vm1194_vm5, %v6405_v47, %v6425_v12 }
0x1eb4   :  { %4474 = vmatmul.mubr.msk.f32.vlgmr.msra.gmra.mrb[18].mxu0 %vm283_vm4, %v2006_v15 }
0x1eb5   :  { %4841 = vmatpush1.bf16.msra.mxu0 %v4840_v14  ;;  %2357 = vmatprep.mubr.f32.mxu0 %v5760_v0  ;;  %v2274_v14 = vld [vmem:[#allocation10 + $0x78] sm:$0xff] }
0x1eb6   :  { %4843 = vmatprep.subr.bf16.mxu0 %v4842_v16  ;;  %v6465_v15 = vpack.c.bf16 %v2274_v14, %v2272_v29  ;;  %v2271_v16 = vld [vmem:[#allocation10 + $0x60] sm:$0xff] }
0x1eb7   :  { %v6467_v21 = vpack.c.bf16 %v2273_v2, %v2271_v16 }
0x1eb9   :  { %4845 = vmatpush1.bf16.msra.mxu0 %v4844_v5 }
0x1eba   :  { %4847 = vmatprep.subr.bf16.mxu0 %v4846_v30 }
0x1ebd   :  { %4849 = vmatpush1.bf16.msra.mxu0 %v4848_v59 }
0x1ebe   :  { %4851 = vmatprep.subr.bf16.mxu0 %v4850_v39 }
0x1ec1   :  { %4853 = vmatpush1.bf16.msra.mxu0 %v4852_v48  ;;  %v6503_v48 = vrot.slane %v2275_v41, %v6043_v35 }
0x1ec2   :  { %4871 = vmatprep.subr.bf16.mxu0 %v6445_v42 }
0x1ec4   :  { %4480 = vmatmul.mubr.msk.f32.vlgmr.msra.gmra.mrb[20].mxu0 %vm283_vm4, %v6381_v19 }
0x1ec5   :  { %2363 = vmatprep.mubr.f32.mxu0 %v5760_v0  ;;  %4873 = vmatpush1.bf16.msra.mxu0 %v6447_v44 }
0x1ec6   :  { %4875 = vmatprep.subr.bf16.mxu0 %v6452_v11 }
0x1ec9   :  { %4877 = vmatpush1.bf16.msra.mxu0 %v6454_v9 }
0x1eca   :  { %4879 = vmatprep.subr.bf16.mxu0 %v6458_v17 }
0x1ecd   :  { %4881 = vmatpush1.bf16.msra.mxu0 %v6460_v20 }
0x1ece   :  { %4883 = vmatprep.subr.bf16.mxu0 %v6465_v15 }
0x1ed1   :  { %4885 = vmatpush1.bf16.msra.mxu0 %v6467_v21 }
0x1ed2   :  { %4903 = vmatprep.subr.bf16.mxu0 %v6445_v42 }
0x1f87   :  { %v2075_v49 = vpop.f32.mrb[18].mxu0 }
0x1f88   :  { %v2077_v50 = vpop.f32.mrb[19].mxu0  ;;  %v2082_v7 = vrot.slane %v2075_v49, 4 }
0x1f89   :  { %v2083_v51 = vrot.slane %v2077_v50, 4 }
0x1f8a   :  { %v2086_v62 = vadd.f32 %v2082_v7, %v6400_v40 }
0x1f8b   :  { %v2087_v43 = vadd.f32 %v2083_v51, %v6394_v23 }
0x1f8c   :  { %v4475_v57 = vmul.f32 -1.442695, %v2086_v62 }
0x1f8d   :  { %5322 = vtanh.f32 %v2087_v43  ;;  %v4476_v24 = vmul.f32 -1.442695, %v2087_v43 }
0x1f8e   :  { %5324 = vpow2.f32 %v4475_v57 }
0x1f97   :  { %v5323_v56 = vpop.eup %5322  ;;  %v6434_v53 = vpop.f32.mrb[20].mxu0 }
0x1f98   :  { %v6436_v54 = vpop.f32.mrb[21].mxu0  ;;  %2106 = vrot.lane.b32.xlu0 %v5323_v56, %s5762_s25  ;;  %v5325_v19 = vpop.eup %5324 }
0x1f99   :  { %v2094_v58 = vadd.f32 1.0, %v5325_v19  ;;  %v6508_v43 = vadd.f32 %v6436_v54, %v6503_v48  ;;  %v6514_v19 = vrot.slane %v2275_v41, %v6056_v45 }
0x1f9b   :  { %5326 = vrcp.f32 %v2094_v58  ;;  %v6518_v58 = vadd.f32 %v6434_v53, %v6514_v19 }
0x1fa5   :  { %v5327_v60 = vpop.eup %5326 }
0x1fa6   :  { %v2104_v55 = vmul.f32 %v5327_v60, %v2102_v25 }
0x200a   :  { %v2107_v18 = vpop.permute.xlu0 %2106 }
0x200b   :  { %v2109_v22 = vmul.f32 %v5327_v60, %v2107_v18 }
0x200d   :  { %2111 = vrot.lane.b32.xlu1 %v2109_v22, %s5762_s25 }
0x207f   :  { %v2112_v28 = vpop.permute.xlu1 %2111 }
0x2080   :  { %v6442_v31 = vadd.f32 %v2112_v28, %v2104_v55 }
0x2082   :  { %5328 = vtanh.f32 %v6442_v31  ;;  %v2218_v53 = vrot.slane %v6442_v31, 6 }
0x2083   :  { %5330 = vpow2.f32 %v4476_v24 }
0x208c   :  { %v5329_v52 = vpop.eup %5328 }
0x208d   :  { %2117 = vrot.lane.b32.xlu0 %v5329_v52, %s5762_s25  ;;  %v5331_v26 = vpop.eup %5330 }
0x208e   :  { %v2095_v5 = vadd.f32 1.0, %v5331_v26 }
0x2090   :  { %5332 = vrcp.f32 %v2095_v5 }
0x209a   :  { %v5333_v30 = vpop.eup %5332 }
0x20ff   :  { %v2118_v33 = vpop.permute.xlu0 %2117 }
0x2100   :  { %v2120_v34 = vmul.f32 %v5333_v30, %v2118_v33 }
0x2102   :  { %v2122_v38 = vrot.slane %v2120_v34, 4  ;;  %v6476_v59 = vsel %vm1196_vm6, %v2240_v36, %v2120_v34 }
0x2104   :  { %4477 = vmatmul.mubr.msk.f32.vlgmr.msra.gmra.mrb[18].mxu1 %vm283_vm4, %v2122_v38 }
0x2105   :  { %4857 = vmatpush1.bf16.msra.mxu1 %v6447_v44  ;;  %2434 = vmatprep.mubr.f32.mxu1 %v5760_v0 }
0x2106   :  { %4859 = vmatprep.subr.bf16.mxu1 %v6452_v11 }
0x2109   :  { %4861 = vmatpush1.bf16.msra.mxu1 %v6454_v9 }
0x210a   :  { %4863 = vmatprep.subr.bf16.mxu1 %v6458_v17 }
0x210d   :  { %4865 = vmatpush1.bf16.msra.mxu1 %v6460_v20 }
0x210e   :  { %4867 = vmatprep.subr.bf16.mxu1 %v6465_v15 }
0x2111   :  { %4869 = vmatpush1.bf16.msra.mxu1 %v6467_v21 }
0x2112   :  { %4887 = vmatprep.subr.bf16.mxu1 %v6445_v42 }
0x2114   :  { %2435 = vmatmul.mubr.f32.vlgmr.msra.gmra.mrb[20].mxu1 %v5760_v0 }
0x2115   :  { %4889 = vmatpush1.bf16.msra.mxu1 %v6447_v44  ;;  %2656 = vmatprep.mubr.f32.mxu1 %v5760_v0 }
0x2116   :  { %4891 = vmatprep.subr.bf16.mxu1 %v6452_v11 }
0x2119   :  { %4893 = vmatpush1.bf16.msra.mxu1 %v6454_v9 }
0x211a   :  { %4895 = vmatprep.subr.bf16.mxu1 %v6458_v17 }
0x211d   :  { %4897 = vmatpush1.bf16.msra.mxu1 %v6460_v20 }
0x211e   :  { %4899 = vmatprep.subr.bf16.mxu1 %v6465_v15 }
0x2121   :  { %4901 = vmatpush1.bf16.msra.mxu1 %v6467_v21 }
0x2122   :  { %4919 = vmatprep.subr.bf16.mxu1 %v6445_v42 }
0x21d7   :  { %v2191_v47 = vpop.f32.mrb[18].mxu1 }
0x21d8   :  { %v2193_v12 = vpop.f32.mrb[19].mxu1  ;;  %v2198_v7 = vrot.slane %v2191_v47, 2 }
0x21d9   :  { %v2199_v39 = vrot.slane %v2193_v12, 2 }
0x21da   :  { %v2202_v62 = vadd.f32 %v2198_v7, %v6400_v40 }
0x21db   :  { %v2203_v27 = vadd.f32 %v2199_v39, %v6394_v23 }
0x21dc   :  { %v4478_v57 = vmul.f32 -1.442695, %v2202_v62 }
0x21dd   :  { %5334 = vtanh.f32 %v2203_v27  ;;  %v4479_v52 = vmul.f32 -1.442695, %v2203_v27 }
0x21e7   :  { %v5335_v49 = vpop.eup %5334  ;;  %v2436_v50 = vpop.f32.mrb[20].mxu1 }
0x21e8   :  { %v2438_v51 = vpop.f32.mrb[21].mxu1  ;;  %2222 = vrot.lane.b32.xlu1 %v5335_v49, %s5762_s25  ;;  %v2441_v60 = vadd.f32 %v2436_v50, %v6518_v58 }
0x21e9   :  { %v2442_v56 = vadd.f32 %v2438_v51, %v6508_v43 }
0x21ea   :  { %v4482_v22 = vmul.f32 -1.442695, %v2441_v60 }
0x21eb   :  { %5336 = vtanh.f32 %v2442_v56  ;;  %v4483_v16 = vmul.f32 -1.442695, %v2442_v56 }
0x21ec   :  { %5338 = vpow2.f32 %v4478_v57 }
0x21f5   :  { %v5337_v23 = vpop.eup %5336 }
0x21f6   :  { %2458 = vrot.lane.b32.xlu0 %v5337_v23, %s5762_s25  ;;  %v5339_v54 = vpop.eup %5338 }
0x21f7   :  { %v2210_v18 = vadd.f32 1.0, %v5339_v54 }
0x21f9   :  { %5340 = vrcp.f32 %v2210_v18 }
0x21fa   :  { %5342 = vpow2.f32 %v4482_v22 }
0x2203   :  { %v5341_v25 = vpop.eup %5340 }
0x2204   :  { %v5343_v28 = vpop.eup %5342  ;;  %v2220_v8 = vmul.f32 %v5341_v25, %v2218_v53 }
0x2205   :  { %v2449_v37 = vadd.f32 1.0, %v5343_v28 }
0x2207   :  { %5344 = vrcp.f32 %v2449_v37 }
0x2211   :  { %v5345_v63 = vpop.eup %5344 }
0x2212   :  { %v2456_v10 = vmul.f32 0.0, %v5345_v63 }
0x225a   :  { %v2223_v55 = vpop.permute.xlu1 %2222 }
0x225b   :  { %v2225_v40 = vmul.f32 %v5341_v25, %v2223_v55 }
0x225d   :  { %2227 = vrot.lane.b32.xlu1 %v2225_v40, %s5762_s25 }
0x2268   :  { %v2459_v1 = vpop.permute.xlu0 %2458 }
0x2269   :  { %v2461_v61 = vmul.f32 %v5345_v63, %v2459_v1 }
0x226b   :  { %2463 = vrot.lane.b32.xlu0 %v2461_v61, %s5762_s25 }
0x22cf   :  { %v2228_v6 = vpop.permute.xlu1 %2227 }
0x22d0   :  { %v2230_v3 = vadd.f32 %v2228_v6, %v2220_v8 }
0x22d2   :  { %5346 = vtanh.f32 %v2230_v3 }
0x22dc   :  { %v5347_v13 = vpop.eup %5346 }
0x22dd   :  { %2233 = vrot.lane.b32.xlu1 %v5347_v13, %s5762_s25  ;;  %v2464_v32 = vpop.permute.xlu0 %2463 }
0x22de   :  { %v2466_v4 = vadd.f32 %v2464_v32, %v2456_v10 }
0x22e0   :  { %5348 = vtanh.f32 %v2466_v4  ;;  %v2569_v54 = vrot.slane %v2466_v4, 6 }
0x22e1   :  { %5350 = vpow2.f32 %v4479_v52 }
0x22ea   :  { %v5349_v46 = vpop.eup %5348 }
0x22eb   :  { %2469 = vrot.lane.b32.xlu0 %v5349_v46, %s5762_s25  ;;  %v5351_v29 = vpop.eup %5350 }
0x22ec   :  { %v2211_v14 = vadd.f32 1.0, %v5351_v29 }
0x22ee   :  { %5352 = vrcp.f32 %v2211_v14 }
0x22ef   :  { %5354 = vpow2.f32 %v4483_v16 }
0x22f8   :  { %v5353_v31 = vpop.eup %5352 }
0x22f9   :  { %v5355_v24 = vpop.eup %5354 }
0x22fa   :  { %v2450_v30 = vadd.f32 1.0, %v5355_v24 }
0x22fc   :  { %5356 = vrcp.f32 %v2450_v30 }
0x2306   :  { %v5357_v33 = vpop.eup %5356 }
0x234f   :  { %v2234_v2 = vpop.permute.xlu1 %2233 }
0x2350   :  { %v2236_v26 = vmul.f32 %v5353_v31, %v2234_v2 }
0x2352   :  { %v2242_v5 = vsel %vm1198_vm7, %v6476_v59, %v2236_v26 }
0x2353   :  { %4481 = vmatmul.mubr.msk.f32.gmra.mrb[22].mxu0 %vm283_vm4, %v2242_v5 }
0x2354   :  { %2540 = vmatprep.mubr.f32.mxu0 %v5760_v0 }
0x235d   :  { %v2470_v34 = vpop.permute.xlu0 %2469 }
0x235e   :  { %v6530_v36 = vmul.f32 %v5357_v33, %v2470_v34 }
0x2360   :  { %4484 = vmatmul.mubr.msk.f32.vlgmr.msra.gmra.mrb[24].mxu0 %vm283_vm4, %v6530_v36 }
0x2361   :  { %4905 = vmatpush1.bf16.msra.mxu0 %v6447_v44  ;;  %2772 = vmatprep.mubr.f32.mxu0 %v5760_v0 }
0x2362   :  { %4907 = vmatprep.subr.bf16.mxu0 %v6452_v11 }
0x2365   :  { %4909 = vmatpush1.bf16.msra.mxu0 %v6454_v9 }
0x2366   :  { %4911 = vmatprep.subr.bf16.mxu0 %v6458_v17 }
0x2369   :  { %4913 = vmatpush1.bf16.msra.mxu0 %v6460_v20 }
0x236a   :  { %4915 = vmatprep.subr.bf16.mxu0 %v6465_v15 }
0x236d   :  { %4917 = vmatpush1.bf16.msra.mxu0 %v6467_v21 }
0x236e   :  { %4935 = vmatprep.subr.bf16.mxu0 %v6445_v42 }
0x2426   :  { %v6543_v38 = vpop.f32.mrb[22].mxu0 }
0x2427   :  { %v6545_v59 = vpop.f32.mrb[23].mxu0 }
0x2433   :  { %v2542_v47 = vpop.f32.mrb[24].mxu0 }
0x2434   :  { %v2544_v12 = vpop.f32.mrb[25].mxu0  ;;  %v2549_v49 = vrot.slane %v2542_v47, 6 }
0x2435   :  { %v2550_v39 = vrot.slane %v2544_v12, 6 }
0x2436   :  { %v2553_v50 = vadd.f32 %v2549_v49, %v6518_v58 }
0x2437   :  { %v2554_v27 = vadd.f32 %v2550_v39, %v6508_v43 }
0x2438   :  { %v4485_v51 = vmul.f32 -1.442695, %v2553_v50 }
0x2439   :  { %5358 = vtanh.f32 %v2554_v27  ;;  %v4486_v55 = vmul.f32 -1.442695, %v2554_v27 }
0x243a   :  { %5360 = vpow2.f32 %v4485_v51 }
0x2443   :  { %v5359_v41 = vpop.eup %5358 }
0x2444   :  { %2573 = vrot.lane.b32.xlu1 %v5359_v41, %s5762_s25  ;;  %v5361_v56 = vpop.eup %5360 }
0x2445   :  { %v2561_v23 = vadd.f32 1.0, %v5361_v56 }
0x2447   :  { %5362 = vrcp.f32 %v2561_v23 }
0x2451   :  { %v5363_v7 = vpop.eup %5362 }
0x2452   :  { %v2571_v60 = vmul.f32 %v5363_v7, %v2569_v54 }
0x24b6   :  { %v2574_v62 = vpop.permute.xlu1 %2573 }
0x24b7   :  { %v2576_v57 = vmul.f32 %v5363_v7, %v2574_v62 }
0x24b9   :  { %2578 = vrot.lane.b32.xlu0 %v2576_v57, %s5762_s25 }
0x252b   :  { %v2579_v18 = vpop.permute.xlu0 %2578 }
0x252c   :  { %v2581_v22 = vadd.f32 %v2579_v18, %v2571_v60 }
0x252e   :  { %5364 = vtanh.f32 %v2581_v22  ;;  %v2685_v31 = vrot.slane %v2581_v22, 6 }
0x252f   :  { %5366 = vpow2.f32 %v4486_v55 }
0x2538   :  { %v5365_v25 = vpop.eup %5364 }
0x2539   :  { %2584 = vrot.lane.b32.xlu1 %v5365_v25, %s5762_s25  ;;  %v5367_v28 = vpop.eup %5366 }
0x253a   :  { %v2562_v40 = vadd.f32 1.0, %v5367_v28 }
0x253c   :  { %5368 = vrcp.f32 %v2562_v40 }
0x2546   :  { %v5369_v37 = vpop.eup %5368 }
0x25ab   :  { %v2585_v63 = vpop.permute.xlu1 %2584 }
0x25ac   :  { %v2587_v1 = vmul.f32 %v5369_v37, %v2585_v63 }
0x25ae   :  { %v2589_v61 = vrot.slane %v2587_v1, 2  ;;  %v3277_v27 = vsel %vm1194_vm5, %v6530_v36, %v2587_v1 }
0x25b0   :  { %4487 = vmatmul.mubr.msk.f32.vlgmr.msra.gmra.mrb[22].mxu1 %vm283_vm4, %v2589_v61 }
0x25b1   :  { %4921 = vmatpush1.bf16.msra.mxu1 %v6447_v44  ;;  %2888 = vmatprep.mubr.f32.mxu1 %v5760_v0 }
0x25b2   :  { %4923 = vmatprep.subr.bf16.mxu1 %v6452_v11 }
0x25b5   :  { %4925 = vmatpush1.bf16.msra.mxu1 %v6454_v9 }
0x25b6   :  { %4927 = vmatprep.subr.bf16.mxu1 %v6458_v17 }
0x25b9   :  { %4929 = vmatpush1.bf16.msra.mxu1 %v6460_v20 }
0x25ba   :  { %4931 = vmatprep.subr.bf16.mxu1 %v6465_v15 }
0x25bd   :  { %4933 = vmatpush1.bf16.msra.mxu1 %v6467_v21 }
0x25be   :  { %4951 = vmatprep.subr.bf16.mxu1 %v6445_v42 }
0x2683   :  { %v2658_v53 = vpop.f32.mrb[22].mxu1 }
0x2684   :  { %v2660_v8 = vpop.f32.mrb[23].mxu1  ;;  %v2665_v10 = vrot.slane %v2658_v53, 4 }
0x2685   :  { %v2666_v6 = vrot.slane %v2660_v8, 4 }
0x2686   :  { %v2669_v32 = vadd.f32 %v2665_v10, %v6518_v58 }
0x2687   :  { %v2670_v3 = vadd.f32 %v2666_v6, %v6508_v43 }
0x2688   :  { %v4488_v4 = vmul.f32 -1.442695, %v2669_v32 }
0x2689   :  { %5370 = vtanh.f32 %v2670_v3  ;;  %v4489_v30 = vmul.f32 -1.442695, %v2670_v3  ;;  %v6599_v3 = vadd.f32 %v6545_v59, %v6503_v48 }
0x268a   :  { %5372 = vpow2.f32 %v4488_v4 }
0x2693   :  { %v5371_v13 = vpop.eup %5370 }
0x2694   :  { %2689 = vrot.lane.b32.xlu0 %v5371_v13, %s5762_s25  ;;  %v5373_v46 = vpop.eup %5372 }
0x2695   :  { %v2677_v52 = vadd.f32 1.0, %v5373_v46  ;;  %v6605_v46 = vadd.f32 %v6543_v38, %v6514_v19 }
0x2697   :  { %5374 = vrcp.f32 %v2677_v52 }
0x26a1   :  { %v5375_v29 = vpop.eup %5374 }
0x26a2   :  { %v2687_v2 = vmul.f32 %v5375_v29, %v2685_v31 }
0x2706   :  { %v2690_v14 = vpop.permute.xlu0 %2689 }
0x2707   :  { %v2692_v16 = vmul.f32 %v5375_v29, %v2690_v14 }
0x2709   :  { %2694 = vrot.lane.b32.xlu1 %v2692_v16, %s5762_s25 }
0x277b   :  { %v2695_v24 = vpop.permute.xlu1 %2694 }
0x277c   :  { %v2697_v26 = vadd.f32 %v2695_v24, %v2687_v2 }
0x277e   :  { %5376 = vtanh.f32 %v2697_v26  ;;  %v2801_v25 = vrot.slane %v2697_v26, 6 }
0x277f   :  { %5378 = vpow2.f32 %v4489_v30 }
0x2788   :  { %v5377_v5 = vpop.eup %5376 }
0x2789   :  { %2700 = vrot.lane.b32.xlu0 %v5377_v5, %s5762_s25  ;;  %v5379_v33 = vpop.eup %5378 }
0x278a   :  { %v2678_v34 = vadd.f32 1.0, %v5379_v33 }
0x278c   :  { %5380 = vrcp.f32 %v2678_v34 }
0x2796   :  { %v5381_v47 = vpop.eup %5380 }
0x27fb   :  { %v2701_v12 = vpop.permute.xlu0 %2700 }
0x27fc   :  { %v2703_v39 = vmul.f32 %v5381_v47, %v2701_v12 }
0x27fe   :  { %v2705_v41 = vrot.slane %v2703_v39, 4  ;;  %v3278_v49 = vsel %vm1196_vm6, %v3277_v27, %v2703_v39 }
0x2800   :  { %4490 = vmatmul.mubr.msk.f32.vlgmr.msra.gmra.mrb[26].mxu0 %vm283_vm4, %v2705_v41 }
0x2801   :  { %4937 = vmatpush1.bf16.msra.mxu0 %v6447_v44  ;;  %2997 = vmatprep.mubr.f32.mxu0 %v5760_v0 }
0x2802   :  { %4939 = vmatprep.subr.bf16.mxu0 %v6452_v11 }
0x2805   :  { %4941 = vmatpush1.bf16.msra.mxu0 %v6454_v9 }
0x2806   :  { %4943 = vmatprep.subr.bf16.mxu0 %v6458_v17 }
0x2809   :  { %4945 = vmatpush1.bf16.msra.mxu0 %v6460_v20 }
0x280a   :  { %4947 = vmatprep.subr.bf16.mxu0 %v6465_v15 }
0x280d   :  { %4949 = vmatpush1.bf16.msra.mxu0 %v6467_v21 }
0x280e   :  { %4967 = vmatprep.subr.bf16.mxu0 %v6445_v42 }
0x28d3   :  { %v2774_v36 = vpop.f32.mrb[26].mxu0 }
0x28d4   :  { %v2776_v50 = vpop.f32.mrb[27].mxu0  ;;  %v2781_v7 = vrot.slane %v2774_v36, 2 }
0x28d5   :  { %v2782_v51 = vrot.slane %v2776_v50, 2 }
0x28d6   :  { %v2785_v62 = vadd.f32 %v2781_v7, %v6518_v58 }
0x28d7   :  { %v2786_v56 = vadd.f32 %v2782_v51, %v6508_v43 }
0x28d8   :  { %v4491_v57 = vmul.f32 -1.442695, %v2785_v62  ;;  %v3284_v62 = vld [vmem:[#allocation11 + $0x8] sm:$0xff] }
0x28d9   :  { %5382 = vtanh.f32 %v2786_v56  ;;  %v4492_v37 = vmul.f32 -1.442695, %v2786_v56 }
0x28da   :  { %5384 = vpow2.f32 %v4491_v57  ;;  %v3286_v57 = vld [vmem:[#allocation11 + $0x18] sm:$0xff] }
0x28e3   :  { %v5383_v23 = vpop.eup %5382 }
0x28e4   :  { %2805 = vrot.lane.b32.xlu1 %v5383_v23, %s5762_s25  ;;  %v5385_v54 = vpop.eup %5384 }
0x28e5   :  { %v2793_v60 = vadd.f32 1.0, %v5385_v54  ;;  %v4982_v54 = vpack.c.bf16 %v3286_v57, %v3284_v62  ;;  %v3304_v62 = vld [vmem:[#allocation13 + $0x28] sm:$0xff] }
0x28e7   :  { %5386 = vrcp.f32 %v2793_v60 }
0x28f1   :  { %v5387_v18 = vpop.eup %5386 }
0x28f2   :  { %v2803_v55 = vmul.f32 %v5387_v18, %v2801_v25  ;;  %v3283_v25 = vld [vmem:[#allocation11] sm:$0xff] }
0x2956   :  { %v2806_v22 = vpop.permute.xlu1 %2805 }
0x2957   :  { %v2808_v42 = vmul.f32 %v5387_v18, %v2806_v22 }
0x2959   :  { %2810 = vrot.lane.b32.xlu0 %v2808_v42, %s5762_s25 }
0x29cb   :  { %v2811_v43 = vpop.permute.xlu0 %2810 }
0x29cc   :  { %v2813_v28 = vadd.f32 %v2811_v43, %v2803_v55  ;;  %v3285_v55 = vld [vmem:[#allocation11 + $0x10] sm:$0xff] }
0x29ce   :  { %5388 = vtanh.f32 %v2813_v28  ;;  %v2911_v2 = vrot.slane %v2813_v28, 6 }
0x29cf   :  { %5390 = vpow2.f32 %v4492_v37  ;;  %v3290_v37 = vld [vmem:[#allocation11 + $0x38] sm:$0xff] }
0x29d8   :  { %v5389_v40 = vpop.eup %5388 }
0x29d9   :  { %2816 = vrot.lane.b32.xlu1 %v5389_v40, %s5762_s25  ;;  %v5391_v58 = vpop.eup %5390  ;;  %v3288_v40 = vld [vmem:[#allocation11 + $0x28] sm:$0xff] }
0x29da   :  { %v2794_v63 = vadd.f32 1.0, %v5391_v58 }
0x29dc   :  { %5392 = vrcp.f32 %v2794_v63  ;;  %v4984_v63 = vpack.c.bf16 %v3285_v55, %v3283_v25  ;;  %v3307_v55 = vld [vmem:[#allocation13 + $0x40] sm:$0xff] }
0x29e6   :  { %v5393_v1 = vpop.eup %5392 }
0x2a4b   :  { %v2817_v61 = vpop.permute.xlu1 %2816 }
0x2a4c   :  { %v2819_v53 = vmul.f32 %v5393_v1, %v2817_v61  ;;  %v4986_v61 = vpack.c.bf16 %v3290_v37, %v3288_v40  ;;  %v3312_v37 = vld [vmem:[#allocation13 + $0x68] sm:$0xff] }
0x2a4e   :  { %v2821_v8 = vrot.slane %v2819_v53, 6  ;;  %v6586_v6 = vsel %vm1198_vm7, %v3278_v49, %v2819_v53  ;;  %v3287_v53 = vld [vmem:[#allocation11 + $0x20] sm:$0xff] }
0x2a50   :  { %4493 = vmatmul.mubr.msk.f32.vlgmr.msra.gmra.mrb[24].mxu1 %vm283_vm4, %v2821_v8  ;;  %v3289_v8 = vld [vmem:[#allocation11 + $0x30] sm:$0xff] }
0x2a51   :  { %4953 = vmatpush1.bf16.msra.mxu1 %v6447_v44  ;;  %3113 = vmatprep.mubr.f32.mxu1 %v5760_v0 }
0x2a52   :  { %4955 = vmatprep.subr.bf16.mxu1 %v6452_v11 }
0x2a55   :  { %4957 = vmatpush1.bf16.msra.mxu1 %v6454_v9 }
0x2a56   :  { %4959 = vmatprep.subr.bf16.mxu1 %v6458_v17 }
0x2a59   :  { %4961 = vmatpush1.bf16.msra.mxu1 %v6460_v20 }
0x2a5a   :  { %4963 = vmatprep.subr.bf16.mxu1 %v6465_v15 }
0x2a5d   :  { %4965 = vmatpush1.bf16.msra.mxu1 %v6467_v21 }
0x2a5e   :  { %4983 = vmatprep.subr.bf16.mxu1 %v4982_v54  ;;  %v3303_v54 = vld [vmem:[#allocation13 + $0x20] sm:$0xff] }
0x2b23   :  { %v2890_v13 = vpop.f32.mrb[24].mxu1 }
0x2b24   :  { %v2892_v10 = vpop.f32.mrb[25].mxu1  ;;  %v2895_v52 = vadd.f32 %v2890_v13, %v6605_v46  ;;  %v3292_v13 = vld [vmem:[#allocation11 + $0x48] sm:$0xff] }
0x2b25   :  { %v2896_v32 = vadd.f32 %v2892_v10, %v6599_v3  ;;  %v3294_v10 = vld [vmem:[#allocation11 + $0x58] sm:$0xff] }
0x2b26   :  { %v4494_v29 = vmul.f32 -1.442695, %v2895_v52  ;;  %v3291_v52 = vld [vmem:[#allocation11 + $0x40] sm:$0xff] }
0x2b27   :  { %5394 = vtanh.f32 %v2896_v32  ;;  %v4495_v19 = vmul.f32 -1.442695, %v2896_v32  ;;  %v4988_v32 = vpack.c.bf16 %v3289_v8, %v3287_v53  ;;  %v3313_v53 = vld [vmem:[#allocation13 + $0x70] sm:$0xff] }
0x2b28   :  { %5396 = vpow2.f32 %v4494_v29  ;;  %v3293_v29 = vld [vmem:[#allocation11 + $0x50] sm:$0xff] }
0x2b31   :  { %v5395_v4 = vpop.eup %5394 }
0x2b32   :  { %2915 = vrot.lane.b32.xlu0 %v5395_v4, %s5762_s25  ;;  %v5397_v14 = vpop.eup %5396  ;;  %v4990_v4 = vpack.c.bf16 %v3294_v10, %v3292_v13 }
0x2b33   :  { %v2903_v16 = vadd.f32 1.0, %v5397_v14  ;;  %v3296_v14 = vld [vmem:[#allocation11 + $0x68] sm:$0xff] }
0x2b35   :  { %5398 = vrcp.f32 %v2903_v16  ;;  %v3298_v16 = vld [vmem:[#allocation11 + $0x78] sm:$0xff] }
0x2b3f   :  { %v5399_v48 = vpop.eup %5398 }
0x2b40   :  { %v2913_v24 = vmul.f32 %v5399_v48, %v2911_v2  ;;  %v3297_v2 = vld [vmem:[#allocation11 + $0x70] sm:$0xff] }
0x2ba4   :  { %v2916_v59 = vpop.permute.xlu0 %2915 }
0x2ba5   :  { %v2918_v31 = vmul.f32 %v5399_v48, %v2916_v59  ;;  %v4992_v48 = vpack.c.bf16 %v3293_v29, %v3291_v52  ;;  %v4994_v59 = vpack.c.bf16 %v3298_v16, %v3296_v14 }
0x2ba7   :  { %2920 = vrot.lane.b32.xlu1 %v2918_v31, %s5762_s25  ;;  %v3295_v31 = vld [vmem:[#allocation11 + $0x60] sm:$0xff] }
0x2c19   :  { %v2921_v26 = vpop.permute.xlu1 %2920 }
0x2c1a   :  { %v2923_v5 = vadd.f32 %v2921_v26, %v2913_v24  ;;  %v4996_v24 = vpack.c.bf16 %v3297_v2, %v3295_v31  ;;  %v3315_v2 = vld [vmem:[%s6882_s12] sm:$0x3] }
0x2c1c   :  { %5400 = vtanh.f32 %v2923_v5  ;;  %v3026_v51 = vrot.slane %v2923_v5, 6 }
0x2c1d   :  { %5402 = vpow2.f32 %v4495_v19 }
0x2c26   :  { %v5401_v30 = vpop.eup %5400 }
0x2c27   :  { %2926 = vrot.lane.b32.xlu0 %v5401_v30, %s5762_s25  ;;  %v5403_v38 = vpop.eup %5402 }
0x2c28   :  { %v2904_v33 = vadd.f32 1.0, %v5403_v38 }
0x2c2a   :  { %5404 = vrcp.f32 %v2904_v33 }
0x2c34   :  { %v5405_v34 = vpop.eup %5404 }
0x2c99   :  { %v2927_v47 = vpop.permute.xlu0 %2926 }
0x2c9a   :  { %v6610_v12 = vmul.f32 %v5405_v34, %v2927_v47 }
0x2c9c   :  { %4496 = vmatmul.mubr.msk.f32.vlgmr.msra.gmra.mrb[28].mxu0 %vm283_vm4, %v6610_v12 }
0x2c9d   :  { %4969 = vmatpush1.bf16.msra.mxu0 %v6447_v44  ;;  %3229 = vmatprep.mubr.f32.mxu0 %v5760_v0 }
0x2c9e   :  { %4971 = vmatprep.subr.bf16.mxu0 %v6452_v11 }
0x2ca1   :  { %4973 = vmatpush1.bf16.msra.mxu0 %v6454_v9 }
0x2ca2   :  { %4975 = vmatprep.subr.bf16.mxu0 %v6458_v17 }
0x2ca5   :  { %4977 = vmatpush1.bf16.msra.mxu0 %v6460_v20 }
0x2ca6   :  { %4979 = vmatprep.subr.bf16.mxu0 %v6465_v15 }
0x2ca9   :  { %4981 = vmatpush1.bf16.msra.mxu0 %v6467_v21 }
0x2d6f   :  { %v2999_v39 = vpop.f32.mrb[28].mxu0 }
0x2d70   :  { %v3001_v27 = vpop.f32.mrb[29].mxu0  ;;  %v3006_v11 = vrot.slane %v2999_v39, 6 }
0x2d71   :  { %v3007_v41 = vrot.slane %v3001_v27, 6 }
0x2d72   :  { %v3010_v9 = vadd.f32 %v3006_v11, %v6605_v46 }
0x2d73   :  { %v3011_v49 = vadd.f32 %v3007_v41, %v6599_v3 }
0x2d74   :  { %v4497_v36 = vmul.f32 -1.442695, %v3010_v9 }
0x2d75   :  { %5406 = vtanh.f32 %v3011_v49  ;;  %v4498_v18 = vmul.f32 -1.442695, %v3011_v49 }
0x2d76   :  { %5408 = vpow2.f32 %v4497_v36 }
0x2d7f   :  { %v5407_v44 = vpop.eup %5406 }
0x2d80   :  { %3030 = vrot.lane.b32.xlu1 %v5407_v44, %s5762_s25  ;;  %v5409_v17 = vpop.eup %5408 }
0x2d81   :  { %v3018_v20 = vadd.f32 1.0, %v5409_v17 }
0x2d83   :  { %5410 = vrcp.f32 %v3018_v20 }
0x2d8d   :  { %v5411_v15 = vpop.eup %5410 }
0x2d8e   :  { %v3028_v56 = vmul.f32 %v5411_v15, %v3026_v51  ;;  %v3299_v51 = vld [vmem:[#allocation13] sm:$0xff] }
0x2df2   :  { %v3031_v50 = vpop.permute.xlu1 %3030 }
0x2df3   :  { %v3033_v21 = vmul.f32 %v5411_v15, %v3031_v50  ;;  %v3300_v15 = vld [vmem:[#allocation13 + $0x8] sm:$0xff]  ;;  %v3302_v50 = vld [vmem:[#allocation13 + $0x18] sm:$0xff] }
0x2df5   :  { %3035 = vrot.lane.b32.xlu0 %v3033_v21, %s5762_s25  ;;  %v6650_v21 = vpack.c.bf16 %v3302_v50, %v3300_v15 }
0x2df7   :  { %4999 = vmatprep.subr.bf16.mxu0 %v6650_v21 }
0x2e67   :  { %v3036_v23 = vpop.permute.xlu0 %3035 }
0x2e68   :  { %v6626_v7 = vadd.f32 %v3036_v23, %v3028_v56  ;;  %v3301_v56 = vld [vmem:[#allocation13 + $0x10] sm:$0xff] }
0x2e69   :  { %v6652_v23 = vpack.c.bf16 %v3301_v56, %v3299_v51 }
0x2e6a   :  { %5412 = vtanh.f32 %v6626_v7  ;;  %v3142_v9 = vrot.slane %v6626_v7, 6  ;;  %v3306_v7 = vld [vmem:[#allocation13 + $0x38] sm:$0xff] }
0x2e6b   :  { %5414 = vpow2.f32 %v4498_v18  ;;  %v6657_v57 = vpack.c.bf16 %v3306_v7, %v3304_v62 }
0x2e74   :  { %v5413_v60 = vpop.eup %5412 }
0x2e75   :  { %3041 = vrot.lane.b32.xlu1 %v5413_v60, %s5762_s25  ;;  %v5415_v22 = vpop.eup %5414  ;;  %v3305_v60 = vld [vmem:[#allocation13 + $0x30] sm:$0xff] }
0x2e76   :  { %v3019_v42 = vadd.f32 1.0, %v5415_v22  ;;  %v6659_v18 = vpack.c.bf16 %v3305_v60, %v3303_v54  ;;  %v3308_v22 = vld [vmem:[#allocation13 + $0x48] sm:$0xff] }
0x2e78   :  { %5416 = vrcp.f32 %v3019_v42  ;;  %v3310_v42 = vld [vmem:[#allocation13 + $0x58] sm:$0xff] }
0x2e79   :  { %v6663_v25 = vpack.c.bf16 %v3310_v42, %v3308_v22 }
0x2e82   :  { %v5417_v43 = vpop.eup %5416 }
0x2ee7   :  { %v3042_v28 = vpop.permute.xlu1 %3041 }
0x2ee8   :  { %v6630_v58 = vmul.f32 %v5417_v43, %v3042_v28  ;;  %v3309_v43 = vld [vmem:[#allocation13 + $0x50] sm:$0xff] }
0x2ee9   :  { %v6665_v28 = vpack.c.bf16 %v3309_v43, %v3307_v55 }
0x2eea   :  { %v3046_v1 = vrot.slane %v6630_v58, 2  ;;  %v3280_v14 = vsel %vm1194_vm5, %v6610_v12, %v6630_v58 }
0x2eec   :  { %4499 = vmatmul.mubr.msk.f32.vlgmr.msra.gmra.mrb[26].mxu1 %vm283_vm4, %v3046_v1 }
0x2eed   :  { %4985 = vmatpush1.bf16.msra.mxu1 %v4984_v63  ;;  %3397 = vmatprep.mubr.f32.mxu1 %v5760_v0  ;;  %v3314_v63 = vld [vmem:[#allocation13 + $0x78] sm:$0xff] }
0x2eee   :  { %4987 = vmatprep.subr.bf16.mxu1 %v4986_v61  ;;  %v6670_v1 = vpack.c.bf16 %v3314_v63, %v3312_v37  ;;  %v3311_v61 = vld [vmem:[#allocation13 + $0x60] sm:$0xff] }
0x2eef   :  { %v6672_v8 = vpack.c.bf16 %v3313_v53, %v3311_v61 }
0x2ef1   :  { %4989 = vmatpush1.bf16.msra.mxu1 %v4988_v32 }
0x2ef2   :  { %4991 = vmatprep.subr.bf16.mxu1 %v4990_v4 }
0x2ef5   :  { %4993 = vmatpush1.bf16.msra.mxu1 %v4992_v48 }
0x2ef6   :  { %4995 = vmatprep.subr.bf16.mxu1 %v4994_v59 }
0x2ef9   :  { %4997 = vmatpush1.bf16.msra.mxu1 %v4996_v24  ;;  %v6708_v24 = vrot.slane %v3315_v2, %v6043_v35 }
0x2efa   :  { %5015 = vmatprep.subr.bf16.mxu1 %v6650_v21 }
0x2efc   :  { %4505 = vmatmul.mubr.msk.f32.vlgmr.msra.gmra.mrb[28].mxu1 %vm283_vm4, %v6586_v6 }
0x2efd   :  { %3403 = vmatprep.mubr.f32.mxu1 %v5760_v0  ;;  %5017 = vmatpush1.bf16.msra.mxu1 %v6652_v23 }
0x2efe   :  { %5019 = vmatprep.subr.bf16.mxu1 %v6657_v57 }
0x2f01   :  { %5021 = vmatpush1.bf16.msra.mxu1 %v6659_v18 }
0x2f02   :  { %5023 = vmatprep.subr.bf16.mxu1 %v6663_v25 }
0x2f05   :  { %5025 = vmatpush1.bf16.msra.mxu1 %v6665_v28 }
0x2f06   :  { %5027 = vmatprep.subr.bf16.mxu1 %v6670_v1 }
0x2f09   :  { %5029 = vmatpush1.bf16.msra.mxu1 %v6672_v8 }
0x2f0a   :  { %5047 = vmatprep.subr.bf16.mxu1 %v6650_v21 }
0x2fbf   :  { %v3115_v26 = vpop.f32.mrb[26].mxu1 }
0x2fc0   :  { %v3117_v5 = vpop.f32.mrb[27].mxu1  ;;  %v3122_v47 = vrot.slane %v3115_v26, 4 }
0x2fc1   :  { %v3123_v30 = vrot.slane %v3117_v5, 4 }
0x2fc2   :  { %v3126_v39 = vadd.f32 %v3122_v47, %v6605_v46 }
0x2fc3   :  { %v3127_v19 = vadd.f32 %v3123_v30, %v6599_v3 }
0x2fc4   :  { %v4500_v27 = vmul.f32 -1.442695, %v3126_v39 }
0x2fc5   :  { %5418 = vtanh.f32 %v3127_v19  ;;  %v4501_v13 = vmul.f32 -1.442695, %v3127_v19 }
0x2fc6   :  { %5420 = vpow2.f32 %v4500_v27  ;;  %v6719_v27 = vrot.slane %v3315_v2, %v6056_v45 }
0x2fcf   :  { %v5419_v38 = vpop.eup %5418  ;;  %v6639_v33 = vpop.f32.mrb[28].mxu1 }
0x2fd0   :  { %v6641_v34 = vpop.f32.mrb[29].mxu1  ;;  %3146 = vrot.lane.b32.xlu0 %v5419_v38, %s5762_s25  ;;  %v5421_v6 = vpop.eup %5420 }
0x2fd1   :  { %v3134_v41 = vadd.f32 1.0, %v5421_v6  ;;  %v6713_v19 = vadd.f32 %v6641_v34, %v6708_v24  ;;  %v6723_v6 = vadd.f32 %v6639_v33, %v6719_v27 }
0x2fd3   :  { %5422 = vrcp.f32 %v3134_v41 }
0x2fdd   :  { %v5423_v49 = vpop.eup %5422 }
0x2fde   :  { %v3144_v36 = vmul.f32 %v5423_v49, %v3142_v9 }
0x3042   :  { %v3147_v44 = vpop.permute.xlu0 %3146 }
0x3043   :  { %v3149_v11 = vmul.f32 %v5423_v49, %v3147_v44 }
0x3045   :  { %3151 = vrot.lane.b32.xlu1 %v3149_v11, %s5762_s25 }
0x30b7   :  { %v3152_v17 = vpop.permute.xlu1 %3151 }
0x30b8   :  { %v6647_v20 = vadd.f32 %v3152_v17, %v3144_v36 }
0x30ba   :  { %5424 = vtanh.f32 %v6647_v20  ;;  %v3258_v33 = vrot.slane %v6647_v20, 6 }
0x30bb   :  { %5426 = vpow2.f32 %v4501_v13 }
0x30c4   :  { %v5425_v40 = vpop.eup %5424 }
0x30c5   :  { %3157 = vrot.lane.b32.xlu0 %v5425_v40, %s5762_s25  ;;  %v5427_v10 = vpop.eup %5426 }
0x30c6   :  { %v3135_v32 = vadd.f32 1.0, %v5427_v10 }
0x30c8   :  { %5428 = vrcp.f32 %v3135_v32 }
0x30d2   :  { %v5429_v4 = vpop.eup %5428 }
0x3137   :  { %v3158_v52 = vpop.permute.xlu0 %3157 }
0x3138   :  { %v3160_v29 = vmul.f32 %v5429_v4, %v3158_v52 }
0x313a   :  { %v3162_v16 = vrot.slane %v3160_v29, 4  ;;  %v6681_v48 = vsel %vm1196_vm6, %v3280_v14, %v3160_v29 }
0x313c   :  { %4502 = vmatmul.mubr.msk.f32.vlgmr.msra.gmra.mrb[30].mxu0 %vm283_vm4, %v3162_v16 }
0x313d   :  { %5001 = vmatpush1.bf16.msra.mxu0 %v6652_v23  ;;  %3474 = vmatprep.mubr.f32.mxu0 %v5760_v0 }
0x313e   :  { %5003 = vmatprep.subr.bf16.mxu0 %v6657_v57 }
0x3141   :  { %5005 = vmatpush1.bf16.msra.mxu0 %v6659_v18 }
0x3142   :  { %5007 = vmatprep.subr.bf16.mxu0 %v6663_v25 }
0x3145   :  { %5009 = vmatpush1.bf16.msra.mxu0 %v6665_v28 }
0x3146   :  { %5011 = vmatprep.subr.bf16.mxu0 %v6670_v1 }
0x3149   :  { %5013 = vmatpush1.bf16.msra.mxu0 %v6672_v8 }
0x314a   :  { %5031 = vmatprep.subr.bf16.mxu0 %v6650_v21 }
0x314c   :  { %3475 = vmatmul.mubr.f32.vlgmr.msra.gmra.mrb[32].mxu0 %v5760_v0 }
0x314d   :  { %5033 = vmatpush1.bf16.msra.mxu0 %v6652_v23  ;;  %3696 = vmatprep.mubr.f32.mxu0 %v5760_v0 }
0x314e   :  { %5035 = vmatprep.subr.bf16.mxu0 %v6657_v57 }
0x3151   :  { %5037 = vmatpush1.bf16.msra.mxu0 %v6659_v18 }
0x3152   :  { %5039 = vmatprep.subr.bf16.mxu0 %v6663_v25 }
0x3155   :  { %5041 = vmatpush1.bf16.msra.mxu0 %v6665_v28 }
0x3156   :  { %5043 = vmatprep.subr.bf16.mxu0 %v6670_v1 }
0x3159   :  { %5045 = vmatpush1.bf16.msra.mxu0 %v6672_v8 }
0x315a   :  { %5063 = vmatprep.subr.bf16.mxu0 %v6650_v21 }
0x320f   :  { %v3231_v12 = vpop.f32.mrb[30].mxu0 }
0x3210   :  { %v3233_v58 = vpop.f32.mrb[31].mxu0  ;;  %v3238_v47 = vrot.slane %v3231_v12, 2 }
0x3211   :  { %v3239_v59 = vrot.slane %v3233_v58, 2 }
0x3212   :  { %v3242_v39 = vadd.f32 %v3238_v47, %v6605_v46 }
0x3213   :  { %v3243_v31 = vadd.f32 %v3239_v59, %v6599_v3 }
0x3214   :  { %v4503_v35 = vmul.f32 -1.442695, %v3242_v39 }
0x3215   :  { %5430 = vtanh.f32 %v3243_v31  ;;  %v4504_v55 = vmul.f32 -1.442695, %v3243_v31 }
0x321f   :  { %v5431_v26 = vpop.eup %5430  ;;  %v3476_v5 = vpop.f32.mrb[32].mxu0 }
0x3220   :  { %v3478_v30 = vpop.f32.mrb[33].mxu0  ;;  %3262 = vrot.lane.b32.xlu1 %v5431_v26, %s5762_s25  ;;  %v3481_v41 = vadd.f32 %v3476_v5, %v6723_v6 }
0x3221   :  { %v3482_v38 = vadd.f32 %v3478_v30, %v6713_v19 }
0x3222   :  { %v4507_v44 = vmul.f32 -1.442695, %v3481_v41 }
0x3223   :  { %5432 = vtanh.f32 %v3482_v38  ;;  %v4508_v37 = vmul.f32 -1.442695, %v3482_v38 }
0x3224   :  { %5434 = vpow2.f32 %v4503_v35 }
0x322d   :  { %v5433_v3 = vpop.eup %5432 }
0x322e   :  { %3498 = vrot.lane.b32.xlu0 %v5433_v3, %s5762_s25  ;;  %v5435_v34 = vpop.eup %5434 }
0x322f   :  { %v3250_v49 = vadd.f32 1.0, %v5435_v34 }
0x3231   :  { %5436 = vrcp.f32 %v3250_v49 }
0x3232   :  { %5438 = vpow2.f32 %v4507_v44 }
0x323b   :  { %v5437_v11 = vpop.eup %5436 }
0x323c   :  { %v5439_v36 = vpop.eup %5438  ;;  %v3260_v51 = vmul.f32 %v5437_v11, %v3258_v33 }
0x323d   :  { %v3489_v17 = vadd.f32 1.0, %v5439_v36 }
0x323f   :  { %5440 = vrcp.f32 %v3489_v17 }
0x3249   :  { %v5441_v45 = vpop.eup %5440 }
0x324a   :  { %v3496_v54 = vmul.f32 0.0, %v5441_v45 }
0x3292   :  { %v3263_v9 = vpop.permute.xlu1 %3262 }
0x3293   :  { %v3265_v46 = vmul.f32 %v5437_v11, %v3263_v9 }
0x3295   :  { %3267 = vrot.lane.b32.xlu1 %v3265_v46, %s5762_s25 }
0x32a0   :  { %v3499_v15 = vpop.permute.xlu0 %3498 }
0x32a1   :  { %v3501_v50 = vmul.f32 %v5441_v45, %v3499_v15 }
0x32a3   :  { %3503 = vrot.lane.b32.xlu0 %v3501_v50, %s5762_s25 }
0x3307   :  { %v3268_v56 = vpop.permute.xlu1 %3267 }
0x3308   :  { %v3270_v62 = vadd.f32 %v3268_v56, %v3260_v51 }
0x330a   :  { %5442 = vtanh.f32 %v3270_v62 }
0x3314   :  { %v5443_v7 = vpop.eup %5442 }
0x3315   :  { %3273 = vrot.lane.b32.xlu1 %v5443_v7, %s5762_s25  ;;  %v3504_v60 = vpop.permute.xlu0 %3503 }
0x3316   :  { %v3506_v22 = vadd.f32 %v3504_v60, %v3496_v54 }
0x3318   :  { %5444 = vtanh.f32 %v3506_v22  ;;  %v3609_v39 = vrot.slane %v3506_v22, 6 }
0x3319   :  { %5446 = vpow2.f32 %v4504_v55 }
0x3322   :  { %v5445_v42 = vpop.eup %5444 }
0x3323   :  { %3509 = vrot.lane.b32.xlu0 %v5445_v42, %s5762_s25  ;;  %v5447_v43 = vpop.eup %5446 }
0x3324   :  { %v3251_v40 = vadd.f32 1.0, %v5447_v43 }
0x3326   :  { %5448 = vrcp.f32 %v3251_v40 }
0x3327   :  { %5450 = vpow2.f32 %v4508_v37 }
0x3330   :  { %v5449_v20 = vpop.eup %5448 }
0x3331   :  { %v5451_v61 = vpop.eup %5450 }
0x3332   :  { %v3490_v10 = vadd.f32 1.0, %v5451_v61 }
0x3334   :  { %5452 = vrcp.f32 %v3490_v10 }
0x333e   :  { %v5453_v32 = vpop.eup %5452 }
0x3387   :  { %v3274_v63 = vpop.permute.xlu1 %3273 }
0x3388   :  { %v3276_v53 = vmul.f32 %v5449_v20, %v3274_v63 }
0x338a   :  { %v3282_v13 = vsel %vm1198_vm7, %v6681_v48, %v3276_v53 }
0x338b   :  { %4506 = vmatmul.mubr.msk.f32.gmra.mrb[30].mxu1 %vm283_vm4, %v3282_v13 }
0x338c   :  { %3580 = vmatprep.mubr.f32.mxu1 %v5760_v0 }
0x3395   :  { %v3510_v4 = vpop.permute.xlu0 %3509 }
0x3396   :  { %v3512_v52 = vmul.f32 %v5453_v32, %v3510_v4 }
0x3398   :  { %4509 = vmatmul.mubr.msk.f32.vlgmr.msra.gmra.mrb[32].mxu1 %vm283_vm4, %v3512_v52 }
0x3399   :  { %5049 = vmatpush1.bf16.msra.mxu1 %v6652_v23  ;;  %3812 = vmatprep.mubr.f32.mxu1 %v5760_v0 }
0x339a   :  { %5051 = vmatprep.subr.bf16.mxu1 %v6657_v57 }
0x339d   :  { %5053 = vmatpush1.bf16.msra.mxu1 %v6659_v18 }
0x339e   :  { %5055 = vmatprep.subr.bf16.mxu1 %v6663_v25 }
0x33a1   :  { %5057 = vmatpush1.bf16.msra.mxu1 %v6665_v28 }
0x33a2   :  { %5059 = vmatprep.subr.bf16.mxu1 %v6670_v1 }
0x33a5   :  { %5061 = vmatpush1.bf16.msra.mxu1 %v6672_v8 }
0x33a6   :  { %5079 = vmatprep.subr.bf16.mxu1 %v6650_v21 }
0x345e   :  { %v6745_v29 = vpop.f32.mrb[30].mxu1 }
0x345f   :  { %v6747_v14 = vpop.f32.mrb[31].mxu1 }
0x346b   :  { %v3582_v16 = vpop.f32.mrb[32].mxu1 }
0x346c   :  { %v3584_v48 = vpop.f32.mrb[33].mxu1  ;;  %v3589_v31 = vrot.slane %v3582_v16, 6 }
0x346d   :  { %v3590_v12 = vrot.slane %v3584_v48, 6 }
0x346e   :  { %v3593_v2 = vadd.f32 %v3589_v31, %v6723_v6 }
0x346f   :  { %v3594_v58 = vadd.f32 %v3590_v12, %v6713_v19 }
0x3470   :  { %v4510_v26 = vmul.f32 -1.442695, %v3593_v2 }
0x3471   :  { %5454 = vtanh.f32 %v3594_v58  ;;  %v4511_v44 = vmul.f32 -1.442695, %v3594_v58 }
0x3472   :  { %5456 = vpow2.f32 %v4510_v26 }
0x347b   :  { %v5455_v59 = vpop.eup %5454 }
0x347c   :  { %3613 = vrot.lane.b32.xlu1 %v5455_v59, %s5762_s25  ;;  %v5457_v5 = vpop.eup %5456 }
0x347d   :  { %v3601_v30 = vadd.f32 1.0, %v5457_v5 }
0x347f   :  { %5458 = vrcp.f32 %v3601_v30 }
0x3489   :  { %v5459_v38 = vpop.eup %5458 }
0x348a   :  { %v3611_v35 = vmul.f32 %v5459_v38, %v3609_v39 }
0x34ee   :  { %v3614_v3 = vpop.permute.xlu1 %3613 }
0x34ef   :  { %v3616_v47 = vmul.f32 %v5459_v38, %v3614_v3 }
0x34f1   :  { %3618 = vrot.lane.b32.xlu0 %v3616_v47, %s5762_s25 }
0x3563   :  { %v3619_v34 = vpop.permute.xlu0 %3618 }
0x3564   :  { %v3621_v41 = vadd.f32 %v3619_v34, %v3611_v35 }
0x3566   :  { %5460 = vtanh.f32 %v3621_v41  ;;  %v3725_v40 = vrot.slane %v3621_v41, 6 }
0x3567   :  { %5462 = vpow2.f32 %v4511_v44 }
0x3570   :  { %v5461_v49 = vpop.eup %5460 }
0x3571   :  { %3624 = vrot.lane.b32.xlu1 %v5461_v49, %s5762_s25  ;;  %v5463_v11 = vpop.eup %5462 }
0x3572   :  { %v3602_v9 = vadd.f32 1.0, %v5463_v11 }
0x3574   :  { %5464 = vrcp.f32 %v3602_v9 }
0x357e   :  { %v5465_v36 = vpop.eup %5464 }
0x35e3   :  { %v3625_v46 = vpop.permute.xlu1 %3624 }
0x35e4   :  { %v3627_v17 = vmul.f32 %v5465_v36, %v3625_v46 }
0x35e6   :  { %v3629_v45 = vrot.slane %v3627_v17, 2  ;;  %v6795_v17 = vadd.f32 %v6747_v14, %v6708_v24 }
0x35e8   :  { %4512 = vmatmul.mubr.msk.f32.vlgmr.msra.gmra.mrb[34].mxu0 %vm283_vm4, %v3629_v45 }
0x35e9   :  { %5065 = vmatpush1.bf16.msra.mxu0 %v6652_v23  ;;  %3928 = vmatprep.mubr.f32.mxu0 %v5760_v0 }
0x35ea   :  { %5067 = vmatprep.subr.bf16.mxu0 %v6657_v57 }
0x35ed   :  { %5069 = vmatpush1.bf16.msra.mxu0 %v6659_v18 }
0x35ee   :  { %5071 = vmatprep.subr.bf16.mxu0 %v6663_v25 }
0x35f1   :  { %5073 = vmatpush1.bf16.msra.mxu0 %v6665_v28 }
0x35f2   :  { %5075 = vmatprep.subr.bf16.mxu0 %v6670_v1 }
0x35f5   :  { %5077 = vmatpush1.bf16.msra.mxu0 %v6672_v8 }
0x35f6   :  { %5095 = vmatprep.subr.bf16.mxu0 %v6650_v21 }
0x36bb   :  { %v3698_v15 = vpop.f32.mrb[34].mxu0 }
0x36bc   :  { %v3700_v50 = vpop.f32.mrb[35].mxu0  ;;  %v3705_v62 = vrot.slane %v3698_v15, 4 }
0x36bd   :  { %v3706_v33 = vrot.slane %v3700_v50, 4 }
0x36be   :  { %v3709_v7 = vadd.f32 %v3705_v62, %v6723_v6 }
0x36bf   :  { %v3710_v51 = vadd.f32 %v3706_v33, %v6713_v19 }
0x36c0   :  { %v4513_v54 = vmul.f32 -1.442695, %v3709_v7 }
0x36c1   :  { %5466 = vtanh.f32 %v3710_v51  ;;  %v4514_v53 = vmul.f32 -1.442695, %v3710_v51  ;;  %v6801_v51 = vadd.f32 %v6745_v29, %v6719_v27 }
0x36c2   :  { %5468 = vpow2.f32 %v4513_v54 }
0x36cb   :  { %v5467_v56 = vpop.eup %5466 }
0x36cc   :  { %3729 = vrot.lane.b32.xlu0 %v5467_v56, %s5762_s25  ;;  %v5469_v60 = vpop.eup %5468 }
0x36cd   :  { %v3717_v22 = vadd.f32 1.0, %v5469_v60 }
0x36cf   :  { %5470 = vrcp.f32 %v3717_v22 }
0x36d9   :  { %v5471_v42 = vpop.eup %5470 }
0x36da   :  { %v3727_v37 = vmul.f32 %v5471_v42, %v3725_v40 }
0x373e   :  { %v3730_v55 = vpop.permute.xlu0 %3729 }
0x373f   :  { %v3732_v43 = vmul.f32 %v5471_v42, %v3730_v55 }
0x3741   :  { %3734 = vrot.lane.b32.xlu1 %v3732_v43, %s5762_s25 }
0x37b3   :  { %v3735_v20 = vpop.permute.xlu1 %3734 }
0x37b4   :  { %v3737_v63 = vadd.f32 %v3735_v20, %v3727_v37 }
0x37b6   :  { %5472 = vtanh.f32 %v3737_v63  ;;  %v3841_v39 = vrot.slane %v3737_v63, 6 }
0x37b7   :  { %5474 = vpow2.f32 %v4514_v53 }
0x37c0   :  { %v5473_v61 = vpop.eup %5472 }
0x37c1   :  { %3740 = vrot.lane.b32.xlu0 %v5473_v61, %s5762_s25  ;;  %v5475_v13 = vpop.eup %5474 }
0x37c2   :  { %v3718_v10 = vadd.f32 1.0, %v5475_v13 }
0x37c4   :  { %5476 = vrcp.f32 %v3718_v10 }
0x37ce   :  { %v5477_v32 = vpop.eup %5476 }
0x3833   :  { %v3741_v4 = vpop.permute.xlu0 %3740 }
0x3834   :  { %v3743_v52 = vmul.f32 %v5477_v32, %v3741_v4 }
0x3836   :  { %v3745_v16 = vrot.slane %v3743_v52, 4 }
0x3838   :  { %4515 = vmatmul.mubr.msk.f32.vlgmr.msra.gmra.mrb[34].mxu1 %vm283_vm4, %v3745_v16 }
0x3839   :  { %5081 = vmatpush1.bf16.msra.mxu1 %v6652_v23  ;;  %4037 = vmatprep.mubr.f32.mxu1 %v5760_v0 }
0x383a   :  { %5083 = vmatprep.subr.bf16.mxu1 %v6657_v57 }
0x383d   :  { %5085 = vmatpush1.bf16.msra.mxu1 %v6659_v18 }
0x383e   :  { %5087 = vmatprep.subr.bf16.mxu1 %v6663_v25 }
0x3841   :  { %5089 = vmatpush1.bf16.msra.mxu1 %v6665_v28 }
0x3842   :  { %5091 = vmatprep.subr.bf16.mxu1 %v6670_v1 }
0x3845   :  { %5093 = vmatpush1.bf16.msra.mxu1 %v6672_v8 }
0x3846   :  { %5111 = vmatprep.subr.bf16.mxu1 %v6650_v21 }
0x390b   :  { %v3814_v48 = vpop.f32.mrb[34].mxu1 }
0x390c   :  { %v3816_v12 = vpop.f32.mrb[35].mxu1  ;;  %v3821_v2 = vrot.slane %v3814_v48, 2 }
0x390d   :  { %v3822_v58 = vrot.slane %v3816_v12, 2 }
0x390e   :  { %v3825_v26 = vadd.f32 %v3821_v2, %v6723_v6 }
0x390f   :  { %v3826_v59 = vadd.f32 %v3822_v58, %v6713_v19 }
0x3910   :  { %v4516_v5 = vmul.f32 -1.442695, %v3825_v26 }
0x3911   :  { %5478 = vtanh.f32 %v3826_v59  ;;  %v4517_v49 = vmul.f32 -1.442695, %v3826_v59 }
0x3912   :  { %5480 = vpow2.f32 %v4516_v5 }
0x391b   :  { %v5479_v31 = vpop.eup %5478 }
0x391c   :  { %3845 = vrot.lane.b32.xlu1 %v5479_v31, %s5762_s25  ;;  %v5481_v30 = vpop.eup %5480 }
0x391d   :  { %v3833_v38 = vadd.f32 1.0, %v5481_v30 }
0x391f   :  { %5482 = vrcp.f32 %v3833_v38 }
0x3929   :  { %v5483_v3 = vpop.eup %5482 }
0x392a   :  { %v3843_v35 = vmul.f32 %v5483_v3, %v3841_v39 }
0x398e   :  { %v3846_v47 = vpop.permute.xlu1 %3845 }
0x398f   :  { %v3848_v21 = vmul.f32 %v5483_v3, %v3846_v47 }
0x3991   :  { %3850 = vrot.lane.b32.xlu0 %v3848_v21, %s5762_s25 }
0x3a03   :  { %v3851_v19 = vpop.permute.xlu0 %3850 }
0x3a04   :  { %v3853_v34 = vadd.f32 %v3851_v19, %v3843_v35 }
0x3a06   :  { %5484 = vtanh.f32 %v3853_v34  ;;  %v3951_v22 = vrot.slane %v3853_v34, 6 }
0x3a07   :  { %5486 = vpow2.f32 %v4517_v49 }
0x3a10   :  { %v5485_v41 = vpop.eup %5484 }
0x3a11   :  { %3856 = vrot.lane.b32.xlu1 %v5485_v41, %s5762_s25  ;;  %v5487_v6 = vpop.eup %5486 }
0x3a12   :  { %v3834_v44 = vadd.f32 1.0, %v5487_v6 }
0x3a14   :  { %5488 = vrcp.f32 %v3834_v44 }
0x3a1e   :  { %v5489_v11 = vpop.eup %5488 }
0x3a83   :  { %v3857_v9 = vpop.permute.xlu1 %3856 }
0x3a84   :  { %v3859_v36 = vmul.f32 %v5489_v11, %v3857_v9 }
0x3a86   :  { %v3861_v46 = vrot.slane %v3859_v36, 6 }
0x3a88   :  { %4518 = vmatmul.mubr.msk.f32.vlgmr.msra.gmra.mrb[36].mxu0 %vm283_vm4, %v3861_v46 }
0x3a89   :  { %5097 = vmatpush1.bf16.msra.mxu0 %v6652_v23  ;;  %4153 = vmatprep.mubr.f32.mxu0 %v5760_v0 }
0x3a8a   :  { %5099 = vmatprep.subr.bf16.mxu0 %v6657_v57 }
0x3a8d   :  { %5101 = vmatpush1.bf16.msra.mxu0 %v6659_v18 }
0x3a8e   :  { %5103 = vmatprep.subr.bf16.mxu0 %v6663_v25 }
0x3a91   :  { %5105 = vmatpush1.bf16.msra.mxu0 %v6665_v28 }
0x3a92   :  { %5107 = vmatprep.subr.bf16.mxu0 %v6670_v1 }
0x3a95   :  { %5109 = vmatpush1.bf16.msra.mxu0 %v6672_v8 }
0x3b5b   :  { %v3930_v45 = vpop.f32.mrb[36].mxu0 }
0x3b5c   :  { %v3932_v15 = vpop.f32.mrb[37].mxu0  ;;  %v3935_v56 = vadd.f32 %v3930_v45, %v6801_v51 }
0x3b5d   :  { %v3936_v50 = vadd.f32 %v3932_v15, %v6795_v17 }
0x3b5e   :  { %v4519_v62 = vmul.f32 -1.442695, %v3935_v56 }
0x3b5f   :  { %5490 = vtanh.f32 %v3936_v50  ;;  %v4520_v27 = vmul.f32 -1.442695, %v3936_v50 }
0x3b60   :  { %5492 = vpow2.f32 %v4519_v62 }
0x3b69   :  { %v5491_v33 = vpop.eup %5490 }
0x3b6a   :  { %3955 = vrot.lane.b32.xlu0 %v5491_v33, %s5762_s25  ;;  %v5493_v7 = vpop.eup %5492 }
0x3b6b   :  { %v3943_v54 = vadd.f32 1.0, %v5493_v7 }
0x3b6d   :  { %5494 = vrcp.f32 %v3943_v54 }
0x3b77   :  { %v5495_v24 = vpop.eup %5494 }
0x3b78   :  { %v3953_v42 = vmul.f32 %v5495_v24, %v3951_v22 }
0x3bdc   :  { %v3956_v14 = vpop.permute.xlu0 %3955 }
0x3bdd   :  { %v3958_v60 = vmul.f32 %v5495_v24, %v3956_v14 }
0x3bdf   :  { %3960 = vrot.lane.b32.xlu1 %v3958_v60, %s5762_s25 }
0x3c51   :  { %v3961_v55 = vpop.permute.xlu1 %3960 }
0x3c52   :  { %v3963_v43 = vadd.f32 %v3961_v55, %v3953_v42 }
0x3c54   :  { %5496 = vtanh.f32 %v3963_v43  ;;  %v4066_v16 = vrot.slane %v3963_v43, 6 }
0x3c55   :  { %5498 = vpow2.f32 %v4520_v27 }
0x3c5e   :  { %v5497_v40 = vpop.eup %5496 }
0x3c5f   :  { %3966 = vrot.lane.b32.xlu0 %v5497_v40, %s5762_s25  ;;  %v5499_v29 = vpop.eup %5498 }
0x3c60   :  { %v3944_v37 = vadd.f32 1.0, %v5499_v29 }
0x3c62   :  { %5500 = vrcp.f32 %v3944_v37 }
0x3c6c   :  { %v5501_v20 = vpop.eup %5500 }
0x3cd1   :  { %v3967_v63 = vpop.permute.xlu0 %3966 }
0x3cd2   :  { %v3969_v61 = vmul.f32 %v5501_v20, %v3967_v63 }
0x3cd4   :  { %4521 = vmatmul.mubr.msk.f32.vlgmr.msra.gmra.mrb[36].mxu1 %vm283_vm4, %v3969_v61 }
0x3cd5   :  { %5113 = vmatpush1.bf16.msra.mxu1 %v6652_v23  ;;  %4269 = vmatprep.mubr.f32.mxu1 %v5760_v0 }
0x3cd6   :  { %5115 = vmatprep.subr.bf16.mxu1 %v6657_v57 }
0x3cd9   :  { %5117 = vmatpush1.bf16.msra.mxu1 %v6659_v18 }
0x3cda   :  { %5119 = vmatprep.subr.bf16.mxu1 %v6663_v25 }
0x3cdd   :  { %5121 = vmatpush1.bf16.msra.mxu1 %v6665_v28 }
0x3cde   :  { %5123 = vmatprep.subr.bf16.mxu1 %v6670_v1 }
0x3ce1   :  { %5125 = vmatpush1.bf16.msra.mxu1 %v6672_v8 }
0x3da7   :  { %v4039_v53 = vpop.f32.mrb[36].mxu1 }
0x3da8   :  { %v4041_v13 = vpop.f32.mrb[37].mxu1  ;;  %v4046_v57 = vrot.slane %v4039_v53, 6 }
0x3da9   :  { %v4047_v10 = vrot.slane %v4041_v13, 6 }
0x3daa   :  { %v4050_v18 = vadd.f32 %v4046_v57, %v6801_v51  ;;  %v4320_v57 = vld [vmem:[%s6883_s13 + $0x18] sm:$0xff] }
0x3dab   :  { %v4051_v32 = vadd.f32 %v4047_v10, %v6795_v17  ;;  %v4318_v10 = vld [vmem:[%s6883_s13 + $0x8] sm:$0xff] }
0x3dac   :  { %v4522_v4 = vmul.f32 -1.442695, %v4050_v18 }
0x3dad   :  { %5502 = vtanh.f32 %v4051_v32  ;;  %v4523_v31 = vmul.f32 -1.442695, %v4051_v32  ;;  %v5763_v32 = vmov 0.0|0.0  }
0x3dae   :  { %5504 = vpow2.f32 %v4522_v4  ;;  %5126 = vmatprep.subr.bf16.mxu0 %v5763_v32  ;;  %v4321_v4 = vld [vmem:[%s6883_s13 + $0x20] sm:$0xff] }
0x3db7   :  { %v5503_v23 = vpop.eup %5502 }
0x3db8   :  { %4070 = vrot.lane.b32.xlu1 %v5503_v23, %s5762_s25  ;;  %v5505_v25 = vpop.eup %5504 }
0x3db9   :  { %v4058_v28 = vadd.f32 1.0, %v5505_v25  ;;  %v4322_v25 = vld [vmem:[%s6883_s13 + $0x28] sm:$0xff] }
0x3dbb   :  { %5506 = vrcp.f32 %v4058_v28  ;;  %v5133_v28 = vpack.c.bf16 %v4322_v25, %v4321_v4 }
0x3dc5   :  { %v5507_v1 = vpop.eup %5506 }
0x3dc6   :  { %v4068_v48 = vmul.f32 %v5507_v1, %v4066_v16  ;;  %v4324_v16 = vld [vmem:[%s6883_s13 + $0x38] sm:$0xff] }
0x3e2a   :  { %v4071_v52 = vpop.permute.xlu1 %4070 }
0x3e2b   :  { %v4073_v8 = vmul.f32 %v5507_v1, %v4071_v52 }
0x3e2d   :  { %4075 = vrot.lane.b32.xlu0 %v4073_v8, %s5762_s25  ;;  %v4323_v8 = vld [vmem:[%s6883_s13 + $0x30] sm:$0xff] }
0x3e9f   :  { %v4076_v12 = vpop.permute.xlu0 %4075 }
0x3ea0   :  { %v4078_v58 = vadd.f32 %v4076_v12, %v4068_v48  ;;  %v5136_v12 = vpack.c.bf16 %v4324_v16, %v4323_v8 }
0x3ea2   :  { %5508 = vtanh.f32 %v4078_v58  ;;  %v4182_v46 = vrot.slane %v4078_v58, 6 }
0x3ea3   :  { %5510 = vpow2.f32 %v4523_v31 }
0x3eac   :  { %v5509_v59 = vpop.eup %5508 }
0x3ead   :  { %4081 = vrot.lane.b32.xlu1 %v5509_v59, %s5762_s25  ;;  %v5511_v2 = vpop.eup %5510 }
0x3eae   :  { %v4059_v26 = vadd.f32 1.0, %v5511_v2 }
0x3eb0   :  { %5512 = vrcp.f32 %v4059_v26 }
0x3eba   :  { %v5513_v5 = vpop.eup %5512 }
0x3f1f   :  { %v4082_v30 = vpop.permute.xlu1 %4081 }
0x3f20   :  { %v4084_v38 = vmul.f32 %v5513_v5, %v4082_v30 }
0x3f22   :  { %v4086_v3 = vrot.slane %v4084_v38, 2 }
0x3f24   :  { %4524 = vmatmul.mubr.msk.f32.vlgmr.msra.gmra.mrb[38].mxu0 %vm283_vm4, %v4086_v3 }
0x3f25   :  { %4557 = vmatprep.mubr.msk.f32.mxu0 %vm5764_vm8, %v5760_v0 }
0x3ff7   :  { %v4155_v47 = vpop.f32.mrb[38].mxu0 }
0x3ff8   :  { %v4157_v21 = vpop.f32.mrb[39].mxu0  ;;  %v4162_v34 = vrot.slane %v4155_v47, 4  ;;  %v4530_v47 = vld [vmem:[#allocation14] ss:$0 sm:$0xff] }
0x3ff9   :  { %v4163_v39 = vrot.slane %v4157_v21, 4 }
0x3ffa   :  { %v4166_v41 = vadd.f32 %v4162_v34, %v6801_v51 }
0x3ffb   :  { %v4167_v35 = vadd.f32 %v4163_v39, %v6795_v17 }
0x3ffc   :  { %v4525_v49 = vmul.f32 -1.442695, %v4166_v41 }
0x3ffd   :  { %5514 = vtanh.f32 %v4167_v35  ;;  %v4526_v56 = vmul.f32 -1.442695, %v4167_v35 }
0x3ffe   :  { %5516 = vpow2.f32 %v4525_v49 }
0x4007   :  { %v5515_v19 = vpop.eup %5514 }
0x4008   :  { %4186 = vrot.lane.b32.xlu0 %v5515_v19, %s5762_s25  ;;  %v5517_v6 = vpop.eup %5516 }
0x4009   :  { %v4174_v44 = vadd.f32 1.0, %v5517_v6 }
0x400b   :  { %5518 = vrcp.f32 %v4174_v44 }
0x4015   :  { %v5519_v11 = vpop.eup %5518 }
0x4016   :  { %v4184_v45 = vmul.f32 %v5519_v11, %v4182_v46 }
0x407a   :  { %v4187_v9 = vpop.permute.xlu0 %4186 }
0x407b   :  { %v4189_v36 = vmul.f32 %v5519_v11, %v4187_v9 }
0x407d   :  { %4191 = vrot.lane.b32.xlu1 %v4189_v36, %s5762_s25 }
0x40ef   :  { %v4192_v15 = vpop.permute.xlu1 %4191 }
0x40f0   :  { %v4194_v50 = vadd.f32 %v4192_v15, %v4184_v45 }
0x40f2   :  { %5520 = vtanh.f32 %v4194_v50  ;;  %v4298_v1 = vrot.slane %v4194_v50, 6 }
0x40f3   :  { %5522 = vpow2.f32 %v4526_v56 }
0x40fc   :  { %v5521_v33 = vpop.eup %5520 }
0x40fd   :  { %4197 = vrot.lane.b32.xlu0 %v5521_v33, %s5762_s25  ;;  %v5523_v62 = vpop.eup %5522 }
0x40fe   :  { %v4175_v7 = vadd.f32 1.0, %v5523_v62 }
0x4100   :  { %5524 = vrcp.f32 %v4175_v7 }
0x410a   :  { %v5525_v54 = vpop.eup %5524 }
0x416f   :  { %v4198_v24 = vpop.permute.xlu0 %4197 }
0x4170   :  { %v4200_v14 = vmul.f32 %v5525_v54, %v4198_v24 }
0x4172   :  { %v4202_v60 = vrot.slane %v4200_v14, 4 }
0x4174   :  { %4527 = vmatmul.mubr.msk.f32.vlgmr.msra.gmra.mrb[38].mxu1 %vm283_vm4, %v4202_v60 }
0x4247   :  { %v4271_v22 = vpop.f32.mrb[38].mxu1 }
0x4248   :  { %v4273_v42 = vpop.f32.mrb[39].mxu1  ;;  %v4278_v27 = vrot.slane %v4271_v22, 2 }
0x4249   :  { %v4279_v55 = vrot.slane %v4273_v42, 2 }
0x424a   :  { %v4282_v29 = vadd.f32 %v4278_v27, %v6801_v51  ;;  %v4319_v51 = vld [vmem:[%s6883_s13 + $0x10] sm:$0xff] }
0x424b   :  { %v4283_v43 = vadd.f32 %v4279_v55, %v6795_v17  ;;  %v4317_v17 = vld [vmem:[%s6883_s13] sm:$0xff]  ;;  %v5130_v18 = vpack.c.bf16 %v4320_v57, %v4319_v51  ;;  %s5765_s13 = smov [#allocation16]  }
0x424c   :  { %v4528_v37 = vmul.f32 -1.442695, %v4282_v29  ;;  %v5127_v23 = vpack.c.bf16 %v4318_v10, %v4317_v17  ;;  %s4415_s17 = sshll.u32 %s5765_s13, 4  ;;  %s4416_s17 = int_to_ptr.vmem [resolvable:$true] %s4415_s17 }
0x424d   :  { %5526 = vtanh.f32 %v4283_v43  ;;  %v4529_v31 = vmul.f32 -1.442695, %v4283_v43  ;;  %p5721_p9 = scmp.lt.s32.totalorder %s4416_s17, %s4416_s17 }
0x424e   :  { %5528 = vpow2.f32 %v4528_v37  ;;  %5128 = vmatpush3.bf16.msra.mxu0 %v5127_v23 }
0x424f   :  { %5129 = vmatprep.subr.bf16.mxu0 %v5763_v32 }
0x4252   :  { %5131 = vmatpush3.bf16.msra.mxu0 %v5130_v18 }
0x4253   :  { %5132 = vmatprep.subr.bf16.mxu0 %v5763_v32 }
0x4256   :  { %5134 = vmatpush3.bf16.msra.mxu0 %v5133_v28 }
0x4257   :  { %v5527_v40 = vpop.eup %5526  ;;  %5135 = vmatprep.subr.bf16.mxu0 %v5763_v32 }
0x4258   :  { %4302 = vrot.lane.b32.xlu1 %v5527_v40, %s5762_s25  ;;  %v5529_v20 = vpop.eup %5528 }
0x4259   :  { %v4290_v63 = vadd.f32 1.0, %v5529_v20 }
0x425a   :  { %5137 = vmatpush3.bf16.msra.mxu0 %v5136_v12 }
0x425b   :  { %5530 = vrcp.f32 %v4290_v63 }
0x4265   :  { %v5531_v61 = vpop.eup %5530 }
0x4266   :  { %v4300_v52 = vmul.f32 %v5531_v61, %v4298_v1 }
0x42ca   :  { %v4303_v53 = vpop.permute.xlu1 %4302 }
0x42cb   :  { %v4305_v13 = vmul.f32 %v5531_v61, %v4303_v53 }
0x42cd   :  { %4307 = vrot.lane.b32.xlu0 %v4305_v13, %s5762_s25 }
0x433f   :  { %v4308_v48 = vpop.permute.xlu0 %4307 }
0x4340   :  { %v4310_v58 = vadd.f32 %v4308_v48, %v4300_v52 }
0x4342   :  { %5532 = vtanh.f32 %v4310_v58 }
0x4343   :  { %5534 = vpow2.f32 %v4529_v31 }
0x434c   :  { %v5533_v59 = vpop.eup %5532 }
0x434d   :  { %4313 = vrot.lane.b32.xlu1 %v5533_v59, %s5762_s25  ;;  %v5535_v2 = vpop.eup %5534  ;;  %s5716_s25 = scalar_lea.vmem %s4416_s17, 32 }
0x434e   :  { %v4291_v26 = vadd.f32 1.0, %v5535_v2  ;;  %p5717_p8 = scmp.ne.s32.totalorder %s4416_s17, %s5716_s25  ;;  %p5722_p10 = scmp.lt.s32.totalorder %s5716_s25, %s5716_s25 }
0x4350   :  { %5536 = vrcp.f32 %v4291_v26  ;;  %p5723_p11 = por %p5722_p10, %p5721_p9 }
0x4352   :  { %p5724_p12 = pnand %p5723_p11, %p5717_p8 }
0x435a   :  { %v5537_v5 = vpop.eup %5536 }
0x43bf   :  { %v4314_v30 = vpop.permute.xlu1 %4313 }
0x43c0   :  { %v4316_v38 = vmul.f32 %v5537_v5, %v4314_v30 }
0x43c2   :  { %v4333_v3 = vrot.slane %v4316_v38, 6 }
0x43c4   :  { %4558 = vmatmul.mubr.msk.f32.vlgmr.msra.gmra.mrb[40].mxu0 %vm283_vm4, %v4333_v3 }
0x4497   :  { %v4402_v21 = vpop.f32.mrb[40].mxu0 }
0x4498   :  { %v4403_v39 = vadd.f32 %v4530_v47, %v4402_v21  ;;  %v4559_v35 = vpop.f32.mrb[41].mxu0 }
0x449a   :  { %5538 = vtanh.f32 %v4403_v39 }
0x44a4   :  { %v5539_v0 = vpop.eup %5538 }
0x44a5   :  { %4408 = vst.msk [vmem:[#allocation16] sm:$0x3] %vm4407_vm9, %v5539_v0 }
0x44a6   :  { %5727 = shalt.err (!%p5724_p12)
}
0x44a7   :  { %s5728_s21 = scalar_lea.hbm %s6885_s15, 32 }
0x44a8   :  { %p5729_p13 = scmp.ne.s32.totalorder %s6885_s15, %s5728_s21  ;;  %p5732_p0 = scmp.lt.u32.totalorder %s5728_s21, %s6885_s15 }
0x44aa   :  { %p5734_p1 = pnand %p5732_p0, %p5729_p13 }
0x44ac   :  { %5737 = shalt.err (!%p5734_p1)
}
0x44ad   :  { %4418 = dma.vmem_to_hbm [thread:$0]  %s4416_s17, 32, %s6885_s15, [#allocation4]  }
0x44ae   :  { %5748 = dma.done.wait [#allocation4], 32  }
0x44af   :  { %5749 = vsyncadd [#allocation4], 4294967264 }
0x44b0   :  { %4422 = vsyncpa [#allocation3], 1 }
0x44b1   :  { %4423 = vsyncpa [#allocation6], 1 }
0x44b2   :  { %4424 = vsyncpa [#allocation9], 1 }
0x44b3   :  { %4425 = vsyncpa [#allocation12], 1 }
0x44b4   :  { %4426 = vsyncpa [#allocation15], 1 }
0x44b5   :  { %4427 = vsyncpa [#allocation4], 1 }

</bundles_post_ra>
